<compile_context>
chip_gen: v5e
topology: v5e:2x2
jax: 0.10.0
libtpu: 0.0.40
codegen_flags: <defaults>
</compile_context>

<pallas_src>
import functools

import jax
import jax.numpy as jnp
from jax.experimental import pallas as pl
from jax.experimental.pallas import tpu as pltpu


def _round_up(x, m):
    return (x + m - 1) // m * m


def _largest_divisor(n, candidates):
    for c in candidates:
        if n % c == 0:
            return c
    return None


# ----------------------------- matmul + bias kernels -------------------------

def _mm_bias_single_kernel(a_ref, b_ref, bias_ref, o_ref):
    # K fits in one tile: no accumulator scratch, bias fused, A cast in-kernel.
    o_ref[...] = (jnp.dot(a_ref[...].astype(jnp.bfloat16), b_ref[...],
                          preferred_element_type=jnp.float32)
                  + bias_ref[...]).astype(o_ref.dtype)


def _mm_bias_multi_kernel(a_ref, b_ref, bias_ref, o_ref, acc_ref):
    @pl.when(pl.program_id(2) == 0)
    def _():
        acc_ref[...] = jnp.zeros_like(acc_ref)

    acc_ref[...] += jnp.dot(a_ref[...].astype(jnp.bfloat16), b_ref[...],
                            preferred_element_type=jnp.float32)

    @pl.when(pl.program_id(2) == pl.num_programs(2) - 1)
    def _():
        o_ref[...] = (acc_ref[...] + bias_ref[...]).astype(o_ref.dtype)


def _pick_tiles(M, N, K, a_bytes, out_bytes, budget=40 * 1024 * 1024):
    """Tile selection: collapse K when it fits, grow N tiles, bounded M tiles."""
    tk = K if K <= 1024 else _largest_divisor(K, (1024, 512, 256, 128))
    tn = _largest_divisor(N, (1024, 512, 256, 128))
    if M <= 256:
        tm, Mp = M, M
    else:
        tm = 0
        for t in range(256, 7, -8):      # largest divisor <= 256, multiple of 8
            if M % t == 0:
                tm = t
                break
        if tm:
            Mp = M
        else:
            tm, Mp = 256, _round_up(M, 256)

    def footprint(tm_, tn_, tk_):        # double-buffered blocks + f32 acc
        return (2 * (tm_ * tk_ * a_bytes + tk_ * tn_ * 2 + tn_ * 4
                     + tm_ * tn_ * out_bytes) + tm_ * tn_ * 4)

    while footprint(tm, tn, tk) > budget and tn > 128:
        tn = tn // 2 if N % (tn // 2) == 0 else 128
    while footprint(tm, tn, tk) > budget and tk > 128:
        tk = tk // 2 if K % (tk // 2) == 0 else 128
    return tm, Mp, tn, tk


def pallas_matmul_bias(a, b, bias, out_dtype=jnp.float32):
    """[M,K] @ [K,N] + bias[N] on the MXU.  A may be f32 or bf16 (cast inside
    the kernel); B is the pre-padded bf16 weight; K, N are 128-multiples."""
    M, K = a.shape
    K2, N = b.shape
    assert K == K2 and K % 128 == 0 and N % 128 == 0 and M % 8 == 0
    tm, Mp, tn, tk = _pick_tiles(M, N, K, a.dtype.itemsize,
                                 jnp.dtype(out_dtype).itemsize)
    a_p = a if Mp == M else jnp.pad(a, ((0, Mp - M), (0, 0)))
    bias_p = bias.reshape(1, N).astype(jnp.float32)
    cp_args = dict(vmem_limit_bytes=48 * 1024 * 1024)

    if tk == K:
        out = pl.pallas_call(
            _mm_bias_single_kernel,
            out_shape=jax.ShapeDtypeStruct((Mp, N), out_dtype),
            grid=(Mp // tm, N // tn),
            in_specs=[pl.BlockSpec((tm, K), lambda i, j: (i, 0)),
                      pl.BlockSpec((K, tn), lambda i, j: (0, j)),
                      pl.BlockSpec((1, tn), lambda i, j: (0, j))],
            out_specs=pl.BlockSpec((tm, tn), lambda i, j: (i, j)),
            compiler_params=pltpu.CompilerParams(
                dimension_semantics=("parallel", "parallel"), **cp_args),
        )(a_p, b, bias_p)
    else:
        out = pl.pallas_call(
            _mm_bias_multi_kernel,
            out_shape=jax.ShapeDtypeStruct((Mp, N), out_dtype),
            grid_spec=pltpu.PrefetchScalarGridSpec(
                num_scalar_prefetch=0,
                grid=(Mp // tm, N // tn, K // tk),
                in_specs=[pl.BlockSpec((tm, tk), lambda i, j, k: (i, k)),
                          pl.BlockSpec((tk, tn), lambda i, j, k: (k, j)),
                          pl.BlockSpec((1, tn), lambda i, j, k: (0, j))],
                out_specs=pl.BlockSpec((tm, tn), lambda i, j, k: (i, j)),
                scratch_shapes=[pltpu.VMEM((tm, tn), jnp.float32)]),
            compiler_params=pltpu.CompilerParams(
                dimension_semantics=("parallel", "parallel", "arbitrary"),
                **cp_args),
        )(a_p, b, bias_p)
    return out if Mp == M else out[:M]


# ----------------------------- embedding row gather --------------------------

def _gather_row_kernel(ids_ref, row_ref, o_ref):
    # ids_ref (scalar prefetch) is only consumed by the index_maps.
    del ids_ref
    o_ref[...] = row_ref[...]


def pallas_embedding(ids, table_p):
    """True row gather: one table row DMA'd per token (no one-hot matmul,
    no full-table VMEM residency).  Returns [num_tokens, Ep] in table dtype."""
    m = ids.shape[0]
    vp, ep = table_p.shape
    table3 = table_p.reshape(vp, 1, ep)          # free; keeps (8,128) rule happy
    out = pl.pallas_call(
        _gather_row_kernel,
        out_shape=jax.ShapeDtypeStruct((m, 1, ep), table_p.dtype),
        grid_spec=pltpu.PrefetchScalarGridSpec(
            num_scalar_prefetch=1,
            grid=(m,),
            in_specs=[pl.BlockSpec((1, 1, ep), lambda i, ids: (ids[i], 0, 0))],
            out_specs=pl.BlockSpec((1, 1, ep), lambda i, ids: (i, 0, 0))),
        compiler_params=pltpu.CompilerParams(
            dimension_semantics=("arbitrary",)),
    )(ids.astype(jnp.int32), table3)
    return out.reshape(m, ep)


# ----------------------------- LSTM recurrence -------------------------------

def _sigmoid(x):
    # EUP-friendly: one tanh push per sigmoid instead of exp + divide.
    return 0.5 * jnp.tanh(0.5 * x) + 0.5


def _lstm_seq_kernel(pre_ref, whh_ref, o_ref):
    """Whole sequence for one batch tile inside a single grid step."""
    T = pre_ref.shape[0]
    tb = pre_ref.shape[1]
    hp = whh_ref.shape[0]

    def step(t, carry):
        h_bf, c = carry                      # h carried in bf16, c in f32
        gates = pre_ref[t] + jnp.dot(h_bf, whh_ref[...],
                                     preferred_element_type=jnp.float32)
        i_g = _sigmoid(gates[:, 0 * hp:1 * hp])   # PyTorch gate order: i,f,g,o
        f_g = _sigmoid(gates[:, 1 * hp:2 * hp])
        g_g = jnp.tanh(gates[:, 2 * hp:3 * hp])
        o_g = _sigmoid(gates[:, 3 * hp:4 * hp])
        c_new = f_g * c + i_g * g_g
        h_new = (o_g * jnp.tanh(c_new)).astype(o_ref.dtype)   # cast once
        o_ref[t] = h_new
        return h_new, c_new

    h0 = jnp.zeros((tb, hp), o_ref.dtype)
    c0 = jnp.zeros((tb, hp), jnp.float32)
    jax.lax.fori_loop(0, T, step, (h0, c0), unroll=bool(T <= 16))


def _lstm_step_kernel(pre_ref, whh_ref, o_ref, h_ref, c_ref):
    """Large-T fallback: one timestep per grid step, h/c in VMEM scratch."""
    t = pl.program_id(1)

    @pl.when(t == 0)
    def _():
        h_ref[...] = jnp.zeros_like(h_ref)
        c_ref[...] = jnp.zeros_like(c_ref)

    gates = pre_ref[...] + jnp.dot(h_ref[...], whh_ref[...],
                                   preferred_element_type=jnp.float32)
    hp = h_ref.shape[-1]
    i_g = _sigmoid(gates[:, 0 * hp:1 * hp])
    f_g = _sigmoid(gates[:, 1 * hp:2 * hp])
    g_g = jnp.tanh(gates[:, 2 * hp:3 * hp])
    o_g = _sigmoid(gates[:, 3 * hp:4 * hp])
    c = f_g * c_ref[...] + i_g * g_g
    h_bf = (o_g * jnp.tanh(c)).astype(o_ref.dtype)
    c_ref[...] = c
    h_ref[...] = h_bf
    o_ref[...] = h_bf


def _pick_batch_tile(bp):
    """Largest multiple-of-8 divisor of bp (<=256); prefer >=2 blocks when
    bp >= 16 so both v7x TensorCores run the recurrence."""
    cands = [t for t in range(8, min(bp, 256) + 1, 8) if bp % t == 0]
    if not cands:
        return bp
    tb = max(cands)
    if bp >= 16 and tb == bp:
        smaller = [t for t in cands if t < bp]
        if smaller:
            tb = max(smaller)
    return tb


def pallas_lstm(pre_gates, w_hh_p):
    """Sequential LSTM over pre-computed input gates.

    pre_gates: [T, Bp, 4*Hp] f32 (time-major), w_hh_p: [Hp, 4*Hp] bf16.
    Returns lstm_out: [T, Bp, Hp] bf16 (zero initial h/c, as in the module)."""
    T, bp, g = pre_gates.shape
    hp = w_hh_p.shape[0]
    assert g == 4 * hp and bp % 8 == 0
    tb = _pick_batch_tile(bp)
    out_shape = jax.ShapeDtypeStruct((T, bp, hp), jnp.bfloat16)
    cp_args = dict(vmem_limit_bytes=48 * 1024 * 1024)

    # Small-sequence path: the whole (T, tb, 4Hp) block fits VMEM comfortably.
    seq_bytes = T * tb * g * 4 + T * tb * hp * 2
    if seq_bytes <= 6 * 1024 * 1024:
        return pl.pallas_call(
            _lstm_seq_kernel,
            out_shape=out_shape,
            grid=(bp // tb,),
            in_specs=[pl.BlockSpec((T, tb, g), lambda b: (0, b, 0)),
                      pl.BlockSpec((hp, g), lambda b: (0, 0))],
            out_specs=pl.BlockSpec((T, tb, hp), lambda b: (0, b, 0)),
            compiler_params=pltpu.CompilerParams(
                dimension_semantics=("parallel",), **cp_args),
        )(pre_gates, w_hh_p)

    # Large-T fallback: time as a sequential grid axis, batch tiles parallel.
    return pl.pallas_call(
        _lstm_step_kernel,
        out_shape=out_shape,
        grid_spec=pltpu.PrefetchScalarGridSpec(
            num_scalar_prefetch=0,
            grid=(bp // tb, T),
            in_specs=[pl.BlockSpec((None, tb, g), lambda b, t: (t, b, 0)),
                      pl.BlockSpec((hp, g), lambda b, t: (0, 0))],
            out_specs=pl.BlockSpec((None, tb, hp), lambda b, t: (t, b, 0)),
            scratch_shapes=[pltpu.VMEM((tb, hp), jnp.bfloat16),   # h carry
                            pltpu.VMEM((tb, hp), jnp.float32)]),  # c carry
        compiler_params=pltpu.CompilerParams(
            dimension_semantics=("parallel", "arbitrary"), **cp_args),
    )(pre_gates, w_hh_p)


# ----------------------------- parameters ------------------------------------

def init_decoder_params(key, embed_size, hidden_size, vocab_size):
    """Synthetic PyTorch-style init, pre-transposed and pre-padded once."""
    E, H, V = embed_size, hidden_size, vocab_size
    Ep, Hp, Vp = _round_up(E, 128), _round_up(H, 128), _round_up(V, 128)
    k_emb, k_wih, k_whh, k_bih, k_bhh, k_wo, k_bo = jax.random.split(key, 7)

    emb = jax.random.normal(k_emb, (V, E), jnp.float32)          # nn.Embedding
    bound = 1.0 / (H ** 0.5)
    w_ih = jax.random.uniform(k_wih, (4 * H, E), jnp.float32, -bound, bound)
    w_hh = jax.random.uniform(k_whh, (4 * H, H), jnp.float32, -bound, bound)
    b_ih = jax.random.uniform(k_bih, (4 * H,), jnp.float32, -bound, bound)
    b_hh = jax.random.uniform(k_bhh, (4 * H,), jnp.float32, -bound, bound)
    w_out = jax.random.uniform(k_wo, (V, H), jnp.float32, -bound, bound)
    b_out = jax.random.uniform(k_bo, (V,), jnp.float32, -bound, bound)

    def pad_gates_t(w):   # [4H, D] -> [Dp, 4*Hp], per-gate zero padding
        d = w.shape[1]
        dp = _round_up(d, 128)
        wt = w.T.reshape(d, 4, H)
        wt = jnp.pad(wt, ((0, dp - d), (0, 0), (0, Hp - H)))
        return wt.reshape(dp, 4 * Hp)

    b_gates = jnp.pad((b_ih + b_hh).reshape(4, H),
                      ((0, 0), (0, Hp - H))).reshape(4 * Hp)

    return {
        "embed_table": jnp.pad(emb, ((0, Vp - V), (0, Ep - E))).astype(jnp.bfloat16),
        "w_ih": pad_gates_t(w_ih).astype(jnp.bfloat16),          # [Ep, 4Hp]
        "w_hh": pad_gates_t(w_hh).astype(jnp.bfloat16),          # [Hp, 4Hp]
        "b_gates": b_gates.astype(jnp.float32),                  # [4Hp]
        "w_out": jnp.pad(w_out.T, ((0, Hp - H), (0, Vp - V))).astype(jnp.bfloat16),
        "b_out": jnp.pad(b_out, (0, Vp - V)).astype(jnp.float32),
    }


# ----------------------------- forward pass ----------------------------------

def decoder_forward(params, features, captions, *,
                    embed_size, hidden_size, vocab_size):
    """DecoderRNN.forward: embed(captions[:, :-1]) ++ features -> LSTM -> Linear."""
    B = features.shape[0]
    Tcap = captions.shape[1]
    Ep = params["embed_table"].shape[1]
    Hp = params["w_hh"].shape[0]
    Vp = params["w_out"].shape[1]
    T = Tcap

    # 1) caption embeddings, gathered in time-major token order (row gather)
    tok = jnp.transpose(captions[:, :-1]).reshape(-1).astype(jnp.int32)
    cap_emb = pallas_embedding(tok, params["embed_table"])       # [(T-1)*B, Ep] bf16
    cap_emb = cap_emb.reshape(T - 1, B, Ep)

    # 2) prepend the image feature vector at t = 0 (bf16 to match the chain)
    feat = jnp.pad(features, ((0, 0), (0, Ep - embed_size))).astype(jnp.bfloat16)
    x = jnp.concatenate([feat[None], cap_emb], axis=0)           # [T, B, Ep] bf16

    # 3) pad batch once to a sublane-friendly multiple; stay time-major
    Bp = _round_up(B, 8) if B <= 8 else _round_up(B, 16)
    x = jnp.pad(x, ((0, 0), (0, Bp - B), (0, 0)))                # [T, Bp, Ep]

    # 4) input projection for ALL timesteps in one MXU matmul (+ fused bias)
    pre = pallas_matmul_bias(x.reshape(T * Bp, Ep),
                             params["w_ih"], params["b_gates"],
                             out_dtype=jnp.float32)
    pre = pre.reshape(T, Bp, 4 * Hp)

    # 5) sequential LSTM recurrence (zero initial hidden/cell state), bf16 out
    lstm_out = pallas_lstm(pre, params["w_hh"])                  # [T, Bp, Hp] bf16

    # 6) go batch-major on the narrow Hp-wide tensor, THEN project to vocab,
    #    so the large logits tensor never needs an XLA transpose
    lstm_bt = jnp.transpose(lstm_out, (1, 0, 2)).reshape(Bp * T, Hp)
    logits = pallas_matmul_bias(lstm_bt, params["w_out"], params["b_out"],
                                out_dtype=jnp.float32)           # [Bp*T, Vp]
    return logits.reshape(Bp, T, Vp)[:B, :, :vocab_size]         # [B, T, V]


# ----------------------------- main -------------------------------------------

if __name__ == "__main__":
    key = jax.random.PRNGKey(0)
    k_param, k_feat, k_cap = jax.random.split(key, 3)

    embed_size, hidden_size, vocab_size = 32, 32, 40
    B, Tcap = 2, 8

    params = init_decoder_params(k_param, embed_size, hidden_size, vocab_size)
    features = jax.random.normal(k_feat, (B, embed_size), jnp.float32)
    captions = jax.random.randint(k_cap, (B, Tcap), 0, vocab_size, jnp.int32)

    fwd = jax.jit(functools.partial(decoder_forward,
                                    embed_size=embed_size,
                                    hidden_size=hidden_size,
                                    vocab_size=vocab_size))
    out = jax.block_until_ready(fwd(params, features, captions))

    assert out.shape == (B, Tcap, vocab_size), out.shape
    assert bool(jnp.all(jnp.isfinite(out)))
    print("KERNEL_OK")
</pallas_src>

<mosaic_0001>
module attributes {stable_mosaic.version = 11 : i64} {
  func.func @_gather_row_kernel(%arg0: i32, %arg1: memref<14xi32, #tpu.memory_space<smem>>, %arg2: memref<1x1x128xbf16, #tpu.memory_space<vmem>>, %arg3: memref<1x1x128xbf16, #tpu.memory_space<vmem>>) attributes {dimension_semantics = [#tpu.dimension_semantics<arbitrary>], iteration_bounds = array<i64: 14>, scalar_prefetch = 1 : i64, scratch_operands = 0 : i64, tpu.core_type = #tpu.core_type<tc>, window_params = [{transform_indices = @transform_0, window_bounds = array<i64: 1, 1, 128>}, {transform_indices = @transform_1, window_bounds = array<i64: 1, 1, 128>}]} {
    %c0 = arith.constant 0 : index
    %c0_0 = arith.constant 0 : index
    %c0_1 = arith.constant 0 : index
    %0 = vector.load %arg2[%c0, %c0_0, %c0_1] : memref<1x1x128xbf16, #tpu.memory_space<vmem>>, vector<1x1x128xbf16>
    %c0_2 = arith.constant 0 : index
    %c0_3 = arith.constant 0 : index
    %c0_4 = arith.constant 0 : index
    %1 = vector.load %arg3[%c0_2, %c0_3, %c0_4] : memref<1x1x128xbf16, #tpu.memory_space<vmem>>, vector<1x1x128xbf16>
    tpu.vector_store %arg3[%c0_2, %c0_3, %c0_4], %0 {strides = array<i32>} : memref<1x1x128xbf16, #tpu.memory_space<vmem>>, vector<1x1x128xbf16>,
    return
  }
  func.func @transform_0(%arg0: i32, %arg1: memref<14xi32, #tpu.memory_space<smem>>) -> (i32, i32, i32) {
    %0 = arith.index_cast %arg0 : i32 to index
    %1 = memref.load %arg1[%0] : memref<14xi32, #tpu.memory_space<smem>>
    %c0_i32 = arith.constant 0 : i32
    %c0_i32_0 = arith.constant 0 : i32
    %c0_i32_1 = arith.constant 0 : i32
    return %1, %c0_i32, %c0_i32_0 : i32, i32, i32
  }
  func.func @transform_1(%arg0: i32, %arg1: memref<14xi32, #tpu.memory_space<smem>>) -> (i32, i32, i32) {
    %c0_i32 = arith.constant 0 : i32
    %c0_i32_0 = arith.constant 0 : i32
    %c0_i32_1 = arith.constant 0 : i32
    return %arg0, %c0_i32, %c0_i32_0 : i32, i32, i32
  }
}

module attributes {stable_mosaic.version = 11 : i64} {
  func.func @_mm_bias_single_kernel(%arg0: i32, %arg1: i32, %arg2: memref<64x128xbf16, #tpu.memory_space<vmem>>, %arg3: memref<128x512xbf16, #tpu.memory_space<vmem>>, %arg4: memref<1x512xf32, #tpu.memory_space<vmem>>, %arg5: memref<64x512xf32, #tpu.memory_space<vmem>>) attributes {dimension_semantics = [#tpu.dimension_semantics<parallel>, #tpu.dimension_semantics<parallel>], iteration_bounds = array<i64: 1, 1>, scalar_prefetch = 0 : i64, scratch_operands = 0 : i64, tpu.core_type = #tpu.core_type<tc>, window_params = [{transform_indices = @transform_0, window_bounds = array<i64: 64, 128>}, {transform_indices = @transform_1, window_bounds = array<i64: 128, 512>}, {transform_indices = @transform_2, window_bounds = array<i64: 1, 512>}, {transform_indices = @transform_3, window_bounds = array<i64: 64, 512>}]} {
    %c0 = arith.constant 0 : index
    %c0_0 = arith.constant 0 : index
    %0 = vector.load %arg2[%c0, %c0_0] : memref<64x128xbf16, #tpu.memory_space<vmem>>, vector<64x128xbf16>
    %c0_1 = arith.constant 0 : index
    %c0_2 = arith.constant 0 : index
    %1 = vector.load %arg3[%c0_1, %c0_2] : memref<128x512xbf16, #tpu.memory_space<vmem>>, vector<128x512xbf16>
    %cst = arith.constant dense<0.000000e+00> : vector<64x512xf32>
    %2 = tpu.matmul %0, %1, %cst {dimension_numbers = #tpu.dot_dimension_numbers<[1], [0], [0], [1], [0, 0, 1, 1], [], []>} : vector<64x128xbf16>, vector<128x512xbf16>, vector<64x512xf32> -> vector<64x512xf32>
    %c0_3 = arith.constant 0 : index
    %c0_4 = arith.constant 0 : index
    %3 = vector.load %arg4[%c0_3, %c0_4] : memref<1x512xf32, #tpu.memory_space<vmem>>, vector<1x512xf32>
    %4 = vector.broadcast %3 : vector<1x512xf32> to vector<64x512xf32>
    %5 = arith.addf %2, %4 : vector<64x512xf32>
    %c0_5 = arith.constant 0 : index
    %c0_6 = arith.constant 0 : index
    %6 = vector.load %arg5[%c0_5, %c0_6] : memref<64x512xf32, #tpu.memory_space<vmem>>, vector<64x512xf32>
    tpu.vector_store %arg5[%c0_5, %c0_6], %5 {strides = array<i32>} : memref<64x512xf32, #tpu.memory_space<vmem>>, vector<64x512xf32>,
    return
  }
  func.func @transform_0(%arg0: i32, %arg1: i32) -> (i32, i32) {
    %c0_i32 = arith.constant 0 : i32
    %c0_i32_0 = arith.constant 0 : i32
    return %arg0, %c0_i32 : i32, i32
  }
  func.func @transform_1(%arg0: i32, %arg1: i32) -> (i32, i32) {
    %c0_i32 = arith.constant 0 : i32
    %c0_i32_0 = arith.constant 0 : i32
    return %c0_i32, %arg1 : i32, i32
  }
  func.func @transform_2(%arg0: i32, %arg1: i32) -> (i32, i32) {
    %c0_i32 = arith.constant 0 : i32
    %c0_i32_0 = arith.constant 0 : i32
    return %c0_i32, %arg1 : i32, i32
  }
  func.func @transform_3(%arg0: i32, %arg1: i32) -> (i32, i32) {
    %c0_i32 = arith.constant 0 : i32
    return %arg0, %arg1 : i32, i32
  }
}

module attributes {stable_mosaic.version = 11 : i64} {
  func.func @_lstm_seq_kernel(%arg0: i32, %arg1: memref<8x8x512xf32, #tpu.memory_space<vmem>>, %arg2: memref<128x512xbf16, #tpu.memory_space<vmem>>, %arg3: memref<8x8x128xbf16, #tpu.memory_space<vmem>>) attributes {dimension_semantics = [#tpu.dimension_semantics<parallel>], iteration_bounds = array<i64: 1>, scalar_prefetch = 0 : i64, scratch_operands = 0 : i64, tpu.core_type = #tpu.core_type<tc>, window_params = [{transform_indices = @transform_0, window_bounds = array<i64: 8, 8, 512>}, {pipeline_mode = #tpu.pipeline_mode<synchronous>, transform_indices = @transform_1, window_bounds = array<i64: 128, 512>}, {transform_indices = @transform_2, window_bounds = array<i64: 8, 8, 128>}]} {
    %cst = arith.constant 0.000000e+00 : bf16
    %0 = vector.broadcast %cst : bf16 to vector<8x128xbf16>
    %cst_0 = arith.constant 0.000000e+00 : f32
    %1 = vector.broadcast %cst_0 : f32 to vector<8x128xf32>
    %c0_i32 = arith.constant 0 : i32
    %2 = arith.index_cast %c0_i32 : i32 to index
    %c0 = arith.constant 0 : index
    %c0_1 = arith.constant 0 : index
    %3 = vector.load %arg1[%2, %c0, %c0_1] : memref<8x8x512xf32, #tpu.memory_space<vmem>>, vector<1x8x512xf32>
    %4 = vector.shape_cast %3 : vector<1x8x512xf32> to vector<8x512xf32>
    %c0_2 = arith.constant 0 : index
    %c0_3 = arith.constant 0 : index
    %5 = vector.load %arg2[%c0_2, %c0_3] : memref<128x512xbf16, #tpu.memory_space<vmem>>, vector<128x512xbf16>
    %cst_4 = arith.constant dense<0.000000e+00> : vector<8x512xf32>
    %6 = tpu.matmul %0, %5, %cst_4 {dimension_numbers = #tpu.dot_dimension_numbers<[1], [0], [0], [1], [0, 0, 1, 1], [], []>} : vector<8x128xbf16>, vector<128x512xbf16>, vector<8x512xf32> -> vector<8x512xf32>
    %7 = arith.addf %4, %6 : vector<8x512xf32>
    %8 = vector.extract_strided_slice %7 {offsets = [0, 0], sizes = [8, 128], strides = [1, 1]} : vector<8x512xf32> to vector<8x128xf32>
    %cst_5 = arith.constant 5.000000e-01 : f32
    %9 = vector.broadcast %cst_5 : f32 to vector<8x128xf32>
    %10 = arith.mulf %9, %8 : vector<8x128xf32>
    %11 = math.tanh %10 : vector<8x128xf32>
    %cst_6 = arith.constant 5.000000e-01 : f32
    %12 = vector.broadcast %cst_6 : f32 to vector<8x128xf32>
    %13 = arith.mulf %12, %11 : vector<8x128xf32>
    %cst_7 = arith.constant 5.000000e-01 : f32
    %14 = vector.broadcast %cst_7 : f32 to vector<8x128xf32>
    %15 = arith.addf %13, %14 : vector<8x128xf32>
    %16 = vector.extract_strided_slice %7 {offsets = [0, 128], sizes = [8, 128], strides = [1, 1]} : vector<8x512xf32> to vector<8x128xf32>
    %cst_8 = arith.constant 5.000000e-01 : f32
    %17 = vector.broadcast %cst_8 : f32 to vector<8x128xf32>
    %18 = arith.mulf %17, %16 : vector<8x128xf32>
    %19 = math.tanh %18 : vector<8x128xf32>
    %cst_9 = arith.constant 5.000000e-01 : f32
    %20 = vector.broadcast %cst_9 : f32 to vector<8x128xf32>
    %21 = arith.mulf %20, %19 : vector<8x128xf32>
    %cst_10 = arith.constant 5.000000e-01 : f32
    %22 = vector.broadcast %cst_10 : f32 to vector<8x128xf32>
    %23 = arith.addf %21, %22 : vector<8x128xf32>
    %24 = vector.extract_strided_slice %7 {offsets = [0, 256], sizes = [8, 128], strides = [1, 1]} : vector<8x512xf32> to vector<8x128xf32>
    %25 = math.tanh %24 : vector<8x128xf32>
    %26 = vector.extract_strided_slice %7 {offsets = [0, 384], sizes = [8, 128], strides = [1, 1]} : vector<8x512xf32> to vector<8x128xf32>
    %cst_11 = arith.constant 5.000000e-01 : f32
    %27 = vector.broadcast %cst_11 : f32 to vector<8x128xf32>
    %28 = arith.mulf %27, %26 : vector<8x128xf32>
    %29 = math.tanh %28 : vector<8x128xf32>
    %cst_12 = arith.constant 5.000000e-01 : f32
    %30 = vector.broadcast %cst_12 : f32 to vector<8x128xf32>
    %31 = arith.mulf %30, %29 : vector<8x128xf32>
    %cst_13 = arith.constant 5.000000e-01 : f32
    %32 = vector.broadcast %cst_13 : f32 to vector<8x128xf32>
    %33 = arith.addf %31, %32 : vector<8x128xf32>
    %34 = arith.mulf %23, %1 : vector<8x128xf32>
    %35 = arith.mulf %15, %25 : vector<8x128xf32>
    %36 = arith.addf %34, %35 : vector<8x128xf32>
    %37 = math.tanh %36 : vector<8x128xf32>
    %38 = arith.mulf %33, %37 : vector<8x128xf32>
    %39 = arith.truncf %38 : vector<8x128xf32> to vector<8x128xbf16>
    %40 = arith.index_cast %c0_i32 : i32 to index
    %c0_14 = arith.constant 0 : index
    %c0_15 = arith.constant 0 : index
    %41 = vector.load %arg3[%40, %c0_14, %c0_15] : memref<8x8x128xbf16, #tpu.memory_space<vmem>>, vector<1x8x128xbf16>
    %42 = vector.shape_cast %41 : vector<1x8x128xbf16> to vector<8x128xbf16>
    %43 = vector.shape_cast %39 : vector<8x128xbf16> to vector<1x8x128xbf16>
    tpu.vector_store %arg3[%40, %c0_14, %c0_15], %43 {strides = array<i32>} : memref<8x8x128xbf16, #tpu.memory_space<vmem>>, vector<1x8x128xbf16>,
    %c1_i32 = arith.constant 1 : i32
    %44 = arith.index_cast %c1_i32 : i32 to index
    %c0_16 = arith.constant 0 : index
    %c0_17 = arith.constant 0 : index
    %45 = vector.load %arg1[%44, %c0_16, %c0_17] : memref<8x8x512xf32, #tpu.memory_space<vmem>>, vector<1x8x512xf32>
    %46 = vector.shape_cast %45 : vector<1x8x512xf32> to vector<8x512xf32>
    %c0_18 = arith.constant 0 : index
    %c0_19 = arith.constant 0 : index
    %47 = vector.load %arg2[%c0_18, %c0_19] : memref<128x512xbf16, #tpu.memory_space<vmem>>, vector<128x512xbf16>
    %cst_20 = arith.constant dense<0.000000e+00> : vector<8x512xf32>
    %48 = tpu.matmul %39, %47, %cst_20 {dimension_numbers = #tpu.dot_dimension_numbers<[1], [0], [0], [1], [0, 0, 1, 1], [], []>} : vector<8x128xbf16>, vector<128x512xbf16>, vector<8x512xf32> -> vector<8x512xf32>
    %49 = arith.addf %46, %48 : vector<8x512xf32>
    %50 = vector.extract_strided_slice %49 {offsets = [0, 0], sizes = [8, 128], strides = [1, 1]} : vector<8x512xf32> to vector<8x128xf32>
    %cst_21 = arith.constant 5.000000e-01 : f32
    %51 = vector.broadcast %cst_21 : f32 to vector<8x128xf32>
    %52 = arith.mulf %51, %50 : vector<8x128xf32>
    %53 = math.tanh %52 : vector<8x128xf32>
    %cst_22 = arith.constant 5.000000e-01 : f32
    %54 = vector.broadcast %cst_22 : f32 to vector<8x128xf32>
    %55 = arith.mulf %54, %53 : vector<8x128xf32>
    %cst_23 = arith.constant 5.000000e-01 : f32
    %56 = vector.broadcast %cst_23 : f32 to vector<8x128xf32>
    %57 = arith.addf %55, %56 : vector<8x128xf32>
    %58 = vector.extract_strided_slice %49 {offsets = [0, 128], sizes = [8, 128], strides = [1, 1]} : vector<8x512xf32> to vector<8x128xf32>
    %cst_24 = arith.constant 5.000000e-01 : f32
    %59 = vector.broadcast %cst_24 : f32 to vector<8x128xf32>
    %60 = arith.mulf %59, %58 : vector<8x128xf32>
    %61 = math.tanh %60 : vector<8x128xf32>
    %cst_25 = arith.constant 5.000000e-01 : f32
    %62 = vector.broadcast %cst_25 : f32 to vector<8x128xf32>
    %63 = arith.mulf %62, %61 : vector<8x128xf32>
    %cst_26 = arith.constant 5.000000e-01 : f32
    %64 = vector.broadcast %cst_26 : f32 to vector<8x128xf32>
    %65 = arith.addf %63, %64 : vector<8x128xf32>
    %66 = vector.extract_strided_slice %49 {offsets = [0, 256], sizes = [8, 128], strides = [1, 1]} : vector<8x512xf32> to vector<8x128xf32>
    %67 = math.tanh %66 : vector<8x128xf32>
    %68 = vector.extract_strided_slice %49 {offsets = [0, 384], sizes = [8, 128], strides = [1, 1]} : vector<8x512xf32> to vector<8x128xf32>
    %cst_27 = arith.constant 5.000000e-01 : f32
    %69 = vector.broadcast %cst_27 : f32 to vector<8x128xf32>
    %70 = arith.mulf %69, %68 : vector<8x128xf32>
    %71 = math.tanh %70 : vector<8x128xf32>
    %cst_28 = arith.constant 5.000000e-01 : f32
    %72 = vector.broadcast %cst_28 : f32 to vector<8x128xf32>
    %73 = arith.mulf %72, %71 : vector<8x128xf32>
    %cst_29 = arith.constant 5.000000e-01 : f32
    %74 = vector.broadcast %cst_29 : f32 to vector<8x128xf32>
    %75 = arith.addf %73, %74 : vector<8x128xf32>
    %76 = arith.mulf %65, %36 : vector<8x128xf32>
    %77 = arith.mulf %57, %67 : vector<8x128xf32>
    %78 = arith.addf %76, %77 : vector<8x128xf32>
    %79 = math.tanh %78 : vector<8x128xf32>
    %80 = arith.mulf %75, %79 : vector<8x128xf32>
    %81 = arith.truncf %80 : vector<8x128xf32> to vector<8x128xbf16>
    %82 = arith.index_cast %c1_i32 : i32 to index
    %c0_30 = arith.constant 0 : index
    %c0_31 = arith.constant 0 : index
    %83 = vector.load %arg3[%82, %c0_30, %c0_31] : memref<8x8x128xbf16, #tpu.memory_space<vmem>>, vector<1x8x128xbf16>
    %84 = vector.shape_cast %83 : vector<1x8x128xbf16> to vector<8x128xbf16>
    %85 = vector.shape_cast %81 : vector<8x128xbf16> to vector<1x8x128xbf16>
    tpu.vector_store %arg3[%82, %c0_30, %c0_31], %85 {strides = array<i32>} : memref<8x8x128xbf16, #tpu.memory_space<vmem>>, vector<1x8x128xbf16>,
    %c2_i32 = arith.constant 2 : i32
    %86 = arith.index_cast %c2_i32 : i32 to index
    %c0_32 = arith.constant 0 : index
    %c0_33 = arith.constant 0 : index
    %87 = vector.load %arg1[%86, %c0_32, %c0_33] : memref<8x8x512xf32, #tpu.memory_space<vmem>>, vector<1x8x512xf32>
    %88 = vector.shape_cast %87 : vector<1x8x512xf32> to vector<8x512xf32>
    %c0_34 = arith.constant 0 : index
    %c0_35 = arith.constant 0 : index
    %89 = vector.load %arg2[%c0_34, %c0_35] : memref<128x512xbf16, #tpu.memory_space<vmem>>, vector<128x512xbf16>
    %cst_36 = arith.constant dense<0.000000e+00> : vector<8x512xf32>
    %90 = tpu.matmul %81, %89, %cst_36 {dimension_numbers = #tpu.dot_dimension_numbers<[1], [0], [0], [1], [0, 0, 1, 1], [], []>} : vector<8x128xbf16>, vector<128x512xbf16>, vector<8x512xf32> -> vector<8x512xf32>
    %91 = arith.addf %88, %90 : vector<8x512xf32>
    %92 = vector.extract_strided_slice %91 {offsets = [0, 0], sizes = [8, 128], strides = [1, 1]} : vector<8x512xf32> to vector<8x128xf32>
    %cst_37 = arith.constant 5.000000e-01 : f32
    %93 = vector.broadcast %cst_37 : f32 to vector<8x128xf32>
    %94 = arith.mulf %93, %92 : vector<8x128xf32>
    %95 = math.tanh %94 : vector<8x128xf32>
    %cst_38 = arith.constant 5.000000e-01 : f32
    %96 = vector.broadcast %cst_38 : f32 to vector<8x128xf32>
    %97 = arith.mulf %96, %95 : vector<8x128xf32>
    %cst_39 = arith.constant 5.000000e-01 : f32
    %98 = vector.broadcast %cst_39 : f32 to vector<8x128xf32>
    %99 = arith.addf %97, %98 : vector<8x128xf32>
    %100 = vector.extract_strided_slice %91 {offsets = [0, 128], sizes = [8, 128], strides = [1, 1]} : vector<8x512xf32> to vector<8x128xf32>
    %cst_40 = arith.constant 5.000000e-01 : f32
    %101 = vector.broadcast %cst_40 : f32 to vector<8x128xf32>
    %102 = arith.mulf %101, %100 : vector<8x128xf32>
    %103 = math.tanh %102 : vector<8x128xf32>
    %cst_41 = arith.constant 5.000000e-01 : f32
    %104 = vector.broadcast %cst_41 : f32 to vector<8x128xf32>
    %105 = arith.mulf %104, %103 : vector<8x128xf32>
    %cst_42 = arith.constant 5.000000e-01 : f32
    %106 = vector.broadcast %cst_42 : f32 to vector<8x128xf32>
    %107 = arith.addf %105, %106 : vector<8x128xf32>
    %108 = vector.extract_strided_slice %91 {offsets = [0, 256], sizes = [8, 128], strides = [1, 1]} : vector<8x512xf32> to vector<8x128xf32>
    %109 = math.tanh %108 : vector<8x128xf32>
    %110 = vector.extract_strided_slice %91 {offsets = [0, 384], sizes = [8, 128], strides = [1, 1]} : vector<8x512xf32> to vector<8x128xf32>
    %cst_43 = arith.constant 5.000000e-01 : f32
    %111 = vector.broadcast %cst_43 : f32 to vector<8x128xf32>
    %112 = arith.mulf %111, %110 : vector<8x128xf32>
    %113 = math.tanh %112 : vector<8x128xf32>
    %cst_44 = arith.constant 5.000000e-01 : f32
    %114 = vector.broadcast %cst_44 : f32 to vector<8x128xf32>
    %115 = arith.mulf %114, %113 : vector<8x128xf32>
    %cst_45 = arith.constant 5.000000e-01 : f32
    %116 = vector.broadcast %cst_45 : f32 to vector<8x128xf32>
    %117 = arith.addf %115, %116 : vector<8x128xf32>
    %118 = arith.mulf %107, %78 : vector<8x128xf32>
    %119 = arith.mulf %99, %109 : vector<8x128xf32>
    %120 = arith.addf %118, %119 : vector<8x128xf32>
    %121 = math.tanh %120 : vector<8x128xf32>
    %122 = arith.mulf %117, %121 : vector<8x128xf32>
    %123 = arith.truncf %122 : vector<8x128xf32> to vector<8x128xbf16>
    %124 = arith.index_cast %c2_i32 : i32 to index
    %c0_46 = arith.constant 0 : index
    %c0_47 = arith.constant 0 : index
    %125 = vector.load %arg3[%124, %c0_46, %c0_47] : memref<8x8x128xbf16, #tpu.memory_space<vmem>>, vector<1x8x128xbf16>
    %126 = vector.shape_cast %125 : vector<1x8x128xbf16> to vector<8x128xbf16>
    %127 = vector.shape_cast %123 : vector<8x128xbf16> to vector<1x8x128xbf16>
    tpu.vector_store %arg3[%124, %c0_46, %c0_47], %127 {strides = array<i32>} : memref<8x8x128xbf16, #tpu.memory_space<vmem>>, vector<1x8x128xbf16>,
    %c3_i32 = arith.constant 3 : i32
    %128 = arith.index_cast %c3_i32 : i32 to index
    %c0_48 = arith.constant 0 : index
    %c0_49 = arith.constant 0 : index
    %129 = vector.load %arg1[%128, %c0_48, %c0_49] : memref<8x8x512xf32, #tpu.memory_space<vmem>>, vector<1x8x512xf32>
    %130 = vector.shape_cast %129 : vector<1x8x512xf32> to vector<8x512xf32>
    %c0_50 = arith.constant 0 : index
    %c0_51 = arith.constant 0 : index
    %131 = vector.load %arg2[%c0_50, %c0_51] : memref<128x512xbf16, #tpu.memory_space<vmem>>, vector<128x512xbf16>
    %cst_52 = arith.constant dense<0.000000e+00> : vector<8x512xf32>
    %132 = tpu.matmul %123, %131, %cst_52 {dimension_numbers = #tpu.dot_dimension_numbers<[1], [0], [0], [1], [0, 0, 1, 1], [], []>} : vector<8x128xbf16>, vector<128x512xbf16>, vector<8x512xf32> -> vector<8x512xf32>
    %133 = arith.addf %130, %132 : vector<8x512xf32>
    %134 = vector.extract_strided_slice %133 {offsets = [0, 0], sizes = [8, 128], strides = [1, 1]} : vector<8x512xf32> to vector<8x128xf32>
    %cst_53 = arith.constant 5.000000e-01 : f32
    %135 = vector.broadcast %cst_53 : f32 to vector<8x128xf32>
    %136 = arith.mulf %135, %134 : vector<8x128xf32>
    %137 = math.tanh %136 : vector<8x128xf32>
    %cst_54 = arith.constant 5.000000e-01 : f32
    %138 = vector.broadcast %cst_54 : f32 to vector<8x128xf32>
    %139 = arith.mulf %138, %137 : vector<8x128xf32>
    %cst_55 = arith.constant 5.000000e-01 : f32
    %140 = vector.broadcast %cst_55 : f32 to vector<8x128xf32>
    %141 = arith.addf %139, %140 : vector<8x128xf32>
    %142 = vector.extract_strided_slice %133 {offsets = [0, 128], sizes = [8, 128], strides = [1, 1]} : vector<8x512xf32> to vector<8x128xf32>
    %cst_56 = arith.constant 5.000000e-01 : f32
    %143 = vector.broadcast %cst_56 : f32 to vector<8x128xf32>
    %144 = arith.mulf %143, %142 : vector<8x128xf32>
    %145 = math.tanh %144 : vector<8x128xf32>
    %cst_57 = arith.constant 5.000000e-01 : f32
    %146 = vector.broadcast %cst_57 : f32 to vector<8x128xf32>
    %147 = arith.mulf %146, %145 : vector<8x128xf32>
    %cst_58 = arith.constant 5.000000e-01 : f32
    %148 = vector.broadcast %cst_58 : f32 to vector<8x128xf32>
    %149 = arith.addf %147, %148 : vector<8x128xf32>
    %150 = vector.extract_strided_slice %133 {offsets = [0, 256], sizes = [8, 128], strides = [1, 1]} : vector<8x512xf32> to vector<8x128xf32>
    %151 = math.tanh %150 : vector<8x128xf32>
    %152 = vector.extract_strided_slice %133 {offsets = [0, 384], sizes = [8, 128], strides = [1, 1]} : vector<8x512xf32> to vector<8x128xf32>
    %cst_59 = arith.constant 5.000000e-01 : f32
    %153 = vector.broadcast %cst_59 : f32 to vector<8x128xf32>
    %154 = arith.mulf %153, %152 : vector<8x128xf32>
    %155 = math.tanh %154 : vector<8x128xf32>
    %cst_60 = arith.constant 5.000000e-01 : f32
    %156 = vector.broadcast %cst_60 : f32 to vector<8x128xf32>
    %157 = arith.mulf %156, %155 : vector<8x128xf32>
    %cst_61 = arith.constant 5.000000e-01 : f32
    %158 = vector.broadcast %cst_61 : f32 to vector<8x128xf32>
    %159 = arith.addf %157, %158 : vector<8x128xf32>
    %160 = arith.mulf %149, %120 : vector<8x128xf32>
    %161 = arith.mulf %141, %151 : vector<8x128xf32>
    %162 = arith.addf %160, %161 : vector<8x128xf32>
    %163 = math.tanh %162 : vector<8x128xf32>
    %164 = arith.mulf %159, %163 : vector<8x128xf32>
    %165 = arith.truncf %164 : vector<8x128xf32> to vector<8x128xbf16>
    %166 = arith.index_cast %c3_i32 : i32 to index
    %c0_62 = arith.constant 0 : index
    %c0_63 = arith.constant 0 : index
    %167 = vector.load %arg3[%166, %c0_62, %c0_63] : memref<8x8x128xbf16, #tpu.memory_space<vmem>>, vector<1x8x128xbf16>
    %168 = vector.shape_cast %167 : vector<1x8x128xbf16> to vector<8x128xbf16>
    %169 = vector.shape_cast %165 : vector<8x128xbf16> to vector<1x8x128xbf16>
    tpu.vector_store %arg3[%166, %c0_62, %c0_63], %169 {strides = array<i32>} : memref<8x8x128xbf16, #tpu.memory_space<vmem>>, vector<1x8x128xbf16>,
    %c4_i32 = arith.constant 4 : i32
    %170 = arith.index_cast %c4_i32 : i32 to index
    %c0_64 = arith.constant 0 : index
    %c0_65 = arith.constant 0 : index
    %171 = vector.load %arg1[%170, %c0_64, %c0_65] : memref<8x8x512xf32, #tpu.memory_space<vmem>>, vector<1x8x512xf32>
    %172 = vector.shape_cast %171 : vector<1x8x512xf32> to vector<8x512xf32>
    %c0_66 = arith.constant 0 : index
    %c0_67 = arith.constant 0 : index
    %173 = vector.load %arg2[%c0_66, %c0_67] : memref<128x512xbf16, #tpu.memory_space<vmem>>, vector<128x512xbf16>
    %cst_68 = arith.constant dense<0.000000e+00> : vector<8x512xf32>
    %174 = tpu.matmul %165, %173, %cst_68 {dimension_numbers = #tpu.dot_dimension_numbers<[1], [0], [0], [1], [0, 0, 1, 1], [], []>} : vector<8x128xbf16>, vector<128x512xbf16>, vector<8x512xf32> -> vector<8x512xf32>
    %175 = arith.addf %172, %174 : vector<8x512xf32>
    %176 = vector.extract_strided_slice %175 {offsets = [0, 0], sizes = [8, 128], strides = [1, 1]} : vector<8x512xf32> to vector<8x128xf32>
    %cst_69 = arith.constant 5.000000e-01 : f32
    %177 = vector.broadcast %cst_69 : f32 to vector<8x128xf32>
    %178 = arith.mulf %177, %176 : vector<8x128xf32>
    %179 = math.tanh %178 : vector<8x128xf32>
    %cst_70 = arith.constant 5.000000e-01 : f32
    %180 = vector.broadcast %cst_70 : f32 to vector<8x128xf32>
    %181 = arith.mulf %180, %179 : vector<8x128xf32>
    %cst_71 = arith.constant 5.000000e-01 : f32
    %182 = vector.broadcast %cst_71 : f32 to vector<8x128xf32>
    %183 = arith.addf %181, %182 : vector<8x128xf32>
    %184 = vector.extract_strided_slice %175 {offsets = [0, 128], sizes = [8, 128], strides = [1, 1]} : vector<8x512xf32> to vector<8x128xf32>
    %cst_72 = arith.constant 5.000000e-01 : f32
    %185 = vector.broadcast %cst_72 : f32 to vector<8x128xf32>
    %186 = arith.mulf %185, %184 : vector<8x128xf32>
    %187 = math.tanh %186 : vector<8x128xf32>
    %cst_73 = arith.constant 5.000000e-01 : f32
    %188 = vector.broadcast %cst_73 : f32 to vector<8x128xf32>
    %189 = arith.mulf %188, %187 : vector<8x128xf32>
    %cst_74 = arith.constant 5.000000e-01 : f32
    %190 = vector.broadcast %cst_74 : f32 to vector<8x128xf32>
    %191 = arith.addf %189, %190 : vector<8x128xf32>
    %192 = vector.extract_strided_slice %175 {offsets = [0, 256], sizes = [8, 128], strides = [1, 1]} : vector<8x512xf32> to vector<8x128xf32>
    %193 = math.tanh %192 : vector<8x128xf32>
    %194 = vector.extract_strided_slice %175 {offsets = [0, 384], sizes = [8, 128], strides = [1, 1]} : vector<8x512xf32> to vector<8x128xf32>
    %cst_75 = arith.constant 5.000000e-01 : f32
    %195 = vector.broadcast %cst_75 : f32 to vector<8x128xf32>
    %196 = arith.mulf %195, %194 : vector<8x128xf32>
    %197 = math.tanh %196 : vector<8x128xf32>
    %cst_76 = arith.constant 5.000000e-01 : f32
    %198 = vector.broadcast %cst_76 : f32 to vector<8x128xf32>
    %199 = arith.mulf %198, %197 : vector<8x128xf32>
    %cst_77 = arith.constant 5.000000e-01 : f32
    %200 = vector.broadcast %cst_77 : f32 to vector<8x128xf32>
    %201 = arith.addf %199, %200 : vector<8x128xf32>
    %202 = arith.mulf %191, %162 : vector<8x128xf32>
    %203 = arith.mulf %183, %193 : vector<8x128xf32>
    %204 = arith.addf %202, %203 : vector<8x128xf32>
    %205 = math.tanh %204 : vector<8x128xf32>
    %206 = arith.mulf %201, %205 : vector<8x128xf32>
    %207 = arith.truncf %206 : vector<8x128xf32> to vector<8x128xbf16>
    %208 = arith.index_cast %c4_i32 : i32 to index
    %c0_78 = arith.constant 0 : index
    %c0_79 = arith.constant 0 : index
    %209 = vector.load %arg3[%208, %c0_78, %c0_79] : memref<8x8x128xbf16, #tpu.memory_space<vmem>>, vector<1x8x128xbf16>
    %210 = vector.shape_cast %209 : vector<1x8x128xbf16> to vector<8x128xbf16>
    %211 = vector.shape_cast %207 : vector<8x128xbf16> to vector<1x8x128xbf16>
    tpu.vector_store %arg3[%208, %c0_78, %c0_79], %211 {strides = array<i32>} : memref<8x8x128xbf16, #tpu.memory_space<vmem>>, vector<1x8x128xbf16>,
    %c5_i32 = arith.constant 5 : i32
    %212 = arith.index_cast %c5_i32 : i32 to index
    %c0_80 = arith.constant 0 : index
    %c0_81 = arith.constant 0 : index
    %213 = vector.load %arg1[%212, %c0_80, %c0_81] : memref<8x8x512xf32, #tpu.memory_space<vmem>>, vector<1x8x512xf32>
    %214 = vector.shape_cast %213 : vector<1x8x512xf32> to vector<8x512xf32>
    %c0_82 = arith.constant 0 : index
    %c0_83 = arith.constant 0 : index
    %215 = vector.load %arg2[%c0_82, %c0_83] : memref<128x512xbf16, #tpu.memory_space<vmem>>, vector<128x512xbf16>
    %cst_84 = arith.constant dense<0.000000e+00> : vector<8x512xf32>
    %216 = tpu.matmul %207, %215, %cst_84 {dimension_numbers = #tpu.dot_dimension_numbers<[1], [0], [0], [1], [0, 0, 1, 1], [], []>} : vector<8x128xbf16>, vector<128x512xbf16>, vector<8x512xf32> -> vector<8x512xf32>
    %217 = arith.addf %214, %216 : vector<8x512xf32>
    %218 = vector.extract_strided_slice %217 {offsets = [0, 0], sizes = [8, 128], strides = [1, 1]} : vector<8x512xf32> to vector<8x128xf32>
    %cst_85 = arith.constant 5.000000e-01 : f32
    %219 = vector.broadcast %cst_85 : f32 to vector<8x128xf32>
    %220 = arith.mulf %219, %218 : vector<8x128xf32>
    %221 = math.tanh %220 : vector<8x128xf32>
    %cst_86 = arith.constant 5.000000e-01 : f32
    %222 = vector.broadcast %cst_86 : f32 to vector<8x128xf32>
    %223 = arith.mulf %222, %221 : vector<8x128xf32>
    %cst_87 = arith.constant 5.000000e-01 : f32
    %224 = vector.broadcast %cst_87 : f32 to vector<8x128xf32>
    %225 = arith.addf %223, %224 : vector<8x128xf32>
    %226 = vector.extract_strided_slice %217 {offsets = [0, 128], sizes = [8, 128], strides = [1, 1]} : vector<8x512xf32> to vector<8x128xf32>
    %cst_88 = arith.constant 5.000000e-01 : f32
    %227 = vector.broadcast %cst_88 : f32 to vector<8x128xf32>
    %228 = arith.mulf %227, %226 : vector<8x128xf32>
    %229 = math.tanh %228 : vector<8x128xf32>
    %cst_89 = arith.constant 5.000000e-01 : f32
    %230 = vector.broadcast %cst_89 : f32 to vector<8x128xf32>
    %231 = arith.mulf %230, %229 : vector<8x128xf32>
    %cst_90 = arith.constant 5.000000e-01 : f32
    %232 = vector.broadcast %cst_90 : f32 to vector<8x128xf32>
    %233 = arith.addf %231, %232 : vector<8x128xf32>
    %234 = vector.extract_strided_slice %217 {offsets = [0, 256], sizes = [8, 128], strides = [1, 1]} : vector<8x512xf32> to vector<8x128xf32>
    %235 = math.tanh %234 : vector<8x128xf32>
    %236 = vector.extract_strided_slice %217 {offsets = [0, 384], sizes = [8, 128], strides = [1, 1]} : vector<8x512xf32> to vector<8x128xf32>
    %cst_91 = arith.constant 5.000000e-01 : f32
    %237 = vector.broadcast %cst_91 : f32 to vector<8x128xf32>
    %238 = arith.mulf %237, %236 : vector<8x128xf32>
    %239 = math.tanh %238 : vector<8x128xf32>
    %cst_92 = arith.constant 5.000000e-01 : f32
    %240 = vector.broadcast %cst_92 : f32 to vector<8x128xf32>
    %241 = arith.mulf %240, %239 : vector<8x128xf32>
    %cst_93 = arith.constant 5.000000e-01 : f32
    %242 = vector.broadcast %cst_93 : f32 to vector<8x128xf32>
    %243 = arith.addf %241, %242 : vector<8x128xf32>
    %244 = arith.mulf %233, %204 : vector<8x128xf32>
    %245 = arith.mulf %225, %235 : vector<8x128xf32>
    %246 = arith.addf %244, %245 : vector<8x128xf32>
    %247 = math.tanh %246 : vector<8x128xf32>
    %248 = arith.mulf %243, %247 : vector<8x128xf32>
    %249 = arith.truncf %248 : vector<8x128xf32> to vector<8x128xbf16>
    %250 = arith.index_cast %c5_i32 : i32 to index
    %c0_94 = arith.constant 0 : index
    %c0_95 = arith.constant 0 : index
    %251 = vector.load %arg3[%250, %c0_94, %c0_95] : memref<8x8x128xbf16, #tpu.memory_space<vmem>>, vector<1x8x128xbf16>
    %252 = vector.shape_cast %251 : vector<1x8x128xbf16> to vector<8x128xbf16>
    %253 = vector.shape_cast %249 : vector<8x128xbf16> to vector<1x8x128xbf16>
    tpu.vector_store %arg3[%250, %c0_94, %c0_95], %253 {strides = array<i32>} : memref<8x8x128xbf16, #tpu.memory_space<vmem>>, vector<1x8x128xbf16>,
    %c6_i32 = arith.constant 6 : i32
    %254 = arith.index_cast %c6_i32 : i32 to index
    %c0_96 = arith.constant 0 : index
    %c0_97 = arith.constant 0 : index
    %255 = vector.load %arg1[%254, %c0_96, %c0_97] : memref<8x8x512xf32, #tpu.memory_space<vmem>>, vector<1x8x512xf32>
    %256 = vector.shape_cast %255 : vector<1x8x512xf32> to vector<8x512xf32>
    %c0_98 = arith.constant 0 : index
    %c0_99 = arith.constant 0 : index
    %257 = vector.load %arg2[%c0_98, %c0_99] : memref<128x512xbf16, #tpu.memory_space<vmem>>, vector<128x512xbf16>
    %cst_100 = arith.constant dense<0.000000e+00> : vector<8x512xf32>
    %258 = tpu.matmul %249, %257, %cst_100 {dimension_numbers = #tpu.dot_dimension_numbers<[1], [0], [0], [1], [0, 0, 1, 1], [], []>} : vector<8x128xbf16>, vector<128x512xbf16>, vector<8x512xf32> -> vector<8x512xf32>
    %259 = arith.addf %256, %258 : vector<8x512xf32>
    %260 = vector.extract_strided_slice %259 {offsets = [0, 0], sizes = [8, 128], strides = [1, 1]} : vector<8x512xf32> to vector<8x128xf32>
    %cst_101 = arith.constant 5.000000e-01 : f32
    %261 = vector.broadcast %cst_101 : f32 to vector<8x128xf32>
    %262 = arith.mulf %261, %260 : vector<8x128xf32>
    %263 = math.tanh %262 : vector<8x128xf32>
    %cst_102 = arith.constant 5.000000e-01 : f32
    %264 = vector.broadcast %cst_102 : f32 to vector<8x128xf32>
    %265 = arith.mulf %264, %263 : vector<8x128xf32>
    %cst_103 = arith.constant 5.000000e-01 : f32
    %266 = vector.broadcast %cst_103 : f32 to vector<8x128xf32>
    %267 = arith.addf %265, %266 : vector<8x128xf32>
    %268 = vector.extract_strided_slice %259 {offsets = [0, 128], sizes = [8, 128], strides = [1, 1]} : vector<8x512xf32> to vector<8x128xf32>
    %cst_104 = arith.constant 5.000000e-01 : f32
    %269 = vector.broadcast %cst_104 : f32 to vector<8x128xf32>
    %270 = arith.mulf %269, %268 : vector<8x128xf32>
    %271 = math.tanh %270 : vector<8x128xf32>
    %cst_105 = arith.constant 5.000000e-01 : f32
    %272 = vector.broadcast %cst_105 : f32 to vector<8x128xf32>
    %273 = arith.mulf %272, %271 : vector<8x128xf32>
    %cst_106 = arith.constant 5.000000e-01 : f32
    %274 = vector.broadcast %cst_106 : f32 to vector<8x128xf32>
    %275 = arith.addf %273, %274 : vector<8x128xf32>
    %276 = vector.extract_strided_slice %259 {offsets = [0, 256], sizes = [8, 128], strides = [1, 1]} : vector<8x512xf32> to vector<8x128xf32>
    %277 = math.tanh %276 : vector<8x128xf32>
    %278 = vector.extract_strided_slice %259 {offsets = [0, 384], sizes = [8, 128], strides = [1, 1]} : vector<8x512xf32> to vector<8x128xf32>
    %cst_107 = arith.constant 5.000000e-01 : f32
    %279 = vector.broadcast %cst_107 : f32 to vector<8x128xf32>
    %280 = arith.mulf %279, %278 : vector<8x128xf32>
    %281 = math.tanh %280 : vector<8x128xf32>
    %cst_108 = arith.constant 5.000000e-01 : f32
    %282 = vector.broadcast %cst_108 : f32 to vector<8x128xf32>
    %283 = arith.mulf %282, %281 : vector<8x128xf32>
    %cst_109 = arith.constant 5.000000e-01 : f32
    %284 = vector.broadcast %cst_109 : f32 to vector<8x128xf32>
    %285 = arith.addf %283, %284 : vector<8x128xf32>
    %286 = arith.mulf %275, %246 : vector<8x128xf32>
    %287 = arith.mulf %267, %277 : vector<8x128xf32>
    %288 = arith.addf %286, %287 : vector<8x128xf32>
    %289 = math.tanh %288 : vector<8x128xf32>
    %290 = arith.mulf %285, %289 : vector<8x128xf32>
    %291 = arith.truncf %290 : vector<8x128xf32> to vector<8x128xbf16>
    %292 = arith.index_cast %c6_i32 : i32 to index
    %c0_110 = arith.constant 0 : index
    %c0_111 = arith.constant 0 : index
    %293 = vector.load %arg3[%292, %c0_110, %c0_111] : memref<8x8x128xbf16, #tpu.memory_space<vmem>>, vector<1x8x128xbf16>
    %294 = vector.shape_cast %293 : vector<1x8x128xbf16> to vector<8x128xbf16>
    %295 = vector.shape_cast %291 : vector<8x128xbf16> to vector<1x8x128xbf16>
    tpu.vector_store %arg3[%292, %c0_110, %c0_111], %295 {strides = array<i32>} : memref<8x8x128xbf16, #tpu.memory_space<vmem>>, vector<1x8x128xbf16>,
    %c7_i32 = arith.constant 7 : i32
    %296 = arith.index_cast %c7_i32 : i32 to index
    %c0_112 = arith.constant 0 : index
    %c0_113 = arith.constant 0 : index
    %297 = vector.load %arg1[%296, %c0_112, %c0_113] : memref<8x8x512xf32, #tpu.memory_space<vmem>>, vector<1x8x512xf32>
    %298 = vector.shape_cast %297 : vector<1x8x512xf32> to vector<8x512xf32>
    %c0_114 = arith.constant 0 : index
    %c0_115 = arith.constant 0 : index
    %299 = vector.load %arg2[%c0_114, %c0_115] : memref<128x512xbf16, #tpu.memory_space<vmem>>, vector<128x512xbf16>
    %cst_116 = arith.constant dense<0.000000e+00> : vector<8x512xf32>
    %300 = tpu.matmul %291, %299, %cst_116 {dimension_numbers = #tpu.dot_dimension_numbers<[1], [0], [0], [1], [0, 0, 1, 1], [], []>} : vector<8x128xbf16>, vector<128x512xbf16>, vector<8x512xf32> -> vector<8x512xf32>
    %301 = arith.addf %298, %300 : vector<8x512xf32>
    %302 = vector.extract_strided_slice %301 {offsets = [0, 0], sizes = [8, 128], strides = [1, 1]} : vector<8x512xf32> to vector<8x128xf32>
    %cst_117 = arith.constant 5.000000e-01 : f32
    %303 = vector.broadcast %cst_117 : f32 to vector<8x128xf32>
    %304 = arith.mulf %303, %302 : vector<8x128xf32>
    %305 = math.tanh %304 : vector<8x128xf32>
    %cst_118 = arith.constant 5.000000e-01 : f32
    %306 = vector.broadcast %cst_118 : f32 to vector<8x128xf32>
    %307 = arith.mulf %306, %305 : vector<8x128xf32>
    %cst_119 = arith.constant 5.000000e-01 : f32
    %308 = vector.broadcast %cst_119 : f32 to vector<8x128xf32>
    %309 = arith.addf %307, %308 : vector<8x128xf32>
    %310 = vector.extract_strided_slice %301 {offsets = [0, 128], sizes = [8, 128], strides = [1, 1]} : vector<8x512xf32> to vector<8x128xf32>
    %cst_120 = arith.constant 5.000000e-01 : f32
    %311 = vector.broadcast %cst_120 : f32 to vector<8x128xf32>
    %312 = arith.mulf %311, %310 : vector<8x128xf32>
    %313 = math.tanh %312 : vector<8x128xf32>
    %cst_121 = arith.constant 5.000000e-01 : f32
    %314 = vector.broadcast %cst_121 : f32 to vector<8x128xf32>
    %315 = arith.mulf %314, %313 : vector<8x128xf32>
    %cst_122 = arith.constant 5.000000e-01 : f32
    %316 = vector.broadcast %cst_122 : f32 to vector<8x128xf32>
    %317 = arith.addf %315, %316 : vector<8x128xf32>
    %318 = vector.extract_strided_slice %301 {offsets = [0, 256], sizes = [8, 128], strides = [1, 1]} : vector<8x512xf32> to vector<8x128xf32>
    %319 = math.tanh %318 : vector<8x128xf32>
    %320 = vector.extract_strided_slice %301 {offsets = [0, 384], sizes = [8, 128], strides = [1, 1]} : vector<8x512xf32> to vector<8x128xf32>
    %cst_123 = arith.constant 5.000000e-01 : f32
    %321 = vector.broadcast %cst_123 : f32 to vector<8x128xf32>
    %322 = arith.mulf %321, %320 : vector<8x128xf32>
    %323 = math.tanh %322 : vector<8x128xf32>
    %cst_124 = arith.constant 5.000000e-01 : f32
    %324 = vector.broadcast %cst_124 : f32 to vector<8x128xf32>
    %325 = arith.mulf %324, %323 : vector<8x128xf32>
    %cst_125 = arith.constant 5.000000e-01 : f32
    %326 = vector.broadcast %cst_125 : f32 to vector<8x128xf32>
    %327 = arith.addf %325, %326 : vector<8x128xf32>
    %328 = arith.mulf %317, %288 : vector<8x128xf32>
    %329 = arith.mulf %309, %319 : vector<8x128xf32>
    %330 = arith.addf %328, %329 : vector<8x128xf32>
    %331 = math.tanh %330 : vector<8x128xf32>
    %332 = arith.mulf %327, %331 : vector<8x128xf32>
    %333 = arith.truncf %332 : vector<8x128xf32> to vector<8x128xbf16>
    %334 = arith.index_cast %c7_i32 : i32 to index
    %c0_126 = arith.constant 0 : index
    %c0_127 = arith.constant 0 : index
    %335 = vector.load %arg3[%334, %c0_126, %c0_127] : memref<8x8x128xbf16, #tpu.memory_space<vmem>>, vector<1x8x128xbf16>
    %336 = vector.shape_cast %335 : vector<1x8x128xbf16> to vector<8x128xbf16>
    %337 = vector.shape_cast %333 : vector<8x128xbf16> to vector<1x8x128xbf16>
    tpu.vector_store %arg3[%334, %c0_126, %c0_127], %337 {strides = array<i32>} : memref<8x8x128xbf16, #tpu.memory_space<vmem>>, vector<1x8x128xbf16>,
    %c8_i32 = arith.constant 8 : i32
    return
  }
  func.func @transform_0(%arg0: i32) -> (i32, i32, i32) {
    %c0_i32 = arith.constant 0 : i32
    %c0_i32_0 = arith.constant 0 : i32
    %c0_i32_1 = arith.constant 0 : i32
    return %c0_i32, %arg0, %c0_i32_0 : i32, i32, i32
  }
  func.func @transform_1(%arg0: i32) -> (i32, i32) {
    %c0_i32 = arith.constant 0 : i32
    %c0_i32_0 = arith.constant 0 : i32
    %c0_i32_1 = arith.constant 0 : i32
    return %c0_i32, %c0_i32_0 : i32, i32
  }
  func.func @transform_2(%arg0: i32) -> (i32, i32, i32) {
    %c0_i32 = arith.constant 0 : i32
    %c0_i32_0 = arith.constant 0 : i32
    %c0_i32_1 = arith.constant 0 : i32
    return %c0_i32, %arg0, %c0_i32_0 : i32, i32, i32
  }
}

module attributes {stable_mosaic.version = 11 : i64} {
  func.func @_mm_bias_single_kernel(%arg0: i32, %arg1: i32, %arg2: memref<64x128xbf16, #tpu.memory_space<vmem>>, %arg3: memref<128x128xbf16, #tpu.memory_space<vmem>>, %arg4: memref<1x128xf32, #tpu.memory_space<vmem>>, %arg5: memref<64x128xf32, #tpu.memory_space<vmem>>) attributes {dimension_semantics = [#tpu.dimension_semantics<parallel>, #tpu.dimension_semantics<parallel>], iteration_bounds = array<i64: 1, 1>, scalar_prefetch = 0 : i64, scratch_operands = 0 : i64, tpu.core_type = #tpu.core_type<tc>, window_params = [{transform_indices = @transform_0, window_bounds = array<i64: 64, 128>}, {transform_indices = @transform_1, window_bounds = array<i64: 128, 128>}, {transform_indices = @transform_2, window_bounds = array<i64: 1, 128>}, {transform_indices = @transform_3, window_bounds = array<i64: 64, 128>}]} {
    %c0 = arith.constant 0 : index
    %c0_0 = arith.constant 0 : index
    %0 = vector.load %arg2[%c0, %c0_0] : memref<64x128xbf16, #tpu.memory_space<vmem>>, vector<64x128xbf16>
    %c0_1 = arith.constant 0 : index
    %c0_2 = arith.constant 0 : index
    %1 = vector.load %arg3[%c0_1, %c0_2] : memref<128x128xbf16, #tpu.memory_space<vmem>>, vector<128x128xbf16>
    %cst = arith.constant dense<0.000000e+00> : vector<64x128xf32>
    %2 = tpu.matmul %0, %1, %cst {dimension_numbers = #tpu.dot_dimension_numbers<[1], [0], [0], [1], [0, 0, 1, 1], [], []>} : vector<64x128xbf16>, vector<128x128xbf16>, vector<64x128xf32> -> vector<64x128xf32>
    %c0_3 = arith.constant 0 : index
    %c0_4 = arith.constant 0 : index
    %3 = vector.load %arg4[%c0_3, %c0_4] : memref<1x128xf32, #tpu.memory_space<vmem>>, vector<1x128xf32>
    %4 = vector.broadcast %3 : vector<1x128xf32> to vector<64x128xf32>
    %5 = arith.addf %2, %4 : vector<64x128xf32>
    %c0_5 = arith.constant 0 : index
    %c0_6 = arith.constant 0 : index
    %6 = vector.load %arg5[%c0_5, %c0_6] : memref<64x128xf32, #tpu.memory_space<vmem>>, vector<64x128xf32>
    tpu.vector_store %arg5[%c0_5, %c0_6], %5 {strides = array<i32>} : memref<64x128xf32, #tpu.memory_space<vmem>>, vector<64x128xf32>,
    return
  }
  func.func @transform_0(%arg0: i32, %arg1: i32) -> (i32, i32) {
    %c0_i32 = arith.constant 0 : i32
    %c0_i32_0 = arith.constant 0 : i32
    return %arg0, %c0_i32 : i32, i32
  }
  func.func @transform_1(%arg0: i32, %arg1: i32) -> (i32, i32) {
    %c0_i32 = arith.constant 0 : i32
    %c0_i32_0 = arith.constant 0 : i32
    return %c0_i32, %arg1 : i32, i32
  }
  func.func @transform_2(%arg0: i32, %arg1: i32) -> (i32, i32) {
    %c0_i32 = arith.constant 0 : i32
    %c0_i32_0 = arith.constant 0 : i32
    return %c0_i32, %arg1 : i32, i32
  }
  func.func @transform_3(%arg0: i32, %arg1: i32) -> (i32, i32) {
    %c0_i32 = arith.constant 0 : i32
    return %arg0, %arg1 : i32, i32
  }
}

</mosaic_0001>

<bundles_post_ra>
// kernel: decoder_forward.4
= control target key start
LH: loop header
LB: loop body
LE: loop exit
PB: predicated region body
PF: predicated region fallthrough
CT: control target
= control target key end

     0   :  { %s212_s12 = smov [#allocation3]   ;;  %s237_s0 = inlined_call_operand.vmem [shape: s32[14], index: 0, kind: input, shape index: {}]   ;;  %s238_s1 = inlined_call_operand.vmem [shape: bf16[128,1,128], index: 1, kind: input, shape index: {}]   ;;  %s239_s2 = inlined_call_operand.vmem [shape: bf16[14,1,128], index: 2, kind: output, shape index: {}]  }
   0x1   :  { %s8_s11 = sshll.u32 %s237_s0, 4  ;;  %s9_s11 = int_to_ptr.vmem [resolvable:$true] %s8_s11 }
   0x2   :  { %11 = dma.vmem_to_smem %s9_s11, 16, %s212_s12, [#allocation2] }
   0x3   :  { %206 = dma.done.wait [#allocation2], 16 }
   0x4   :  { %207 = vsyncadd [#allocation2], 4294967280 }
   0x5   :  { %14 = sfence }
   0x6   :  { %s208_s13 = smov 0  }
   0x7 LB: > { %s174_s14 = sadd.s32 4294967295, %s210_s13   ;;  %p178_p0 = scmp.ge.s32.totalorder %s210_s13, 1  ;;  %s210_s13 = sphi %s208_s13, %s20_s13  }
   0x8   : > { %p98_p1 = scmp.lt.s32.totalorder %s210_s13, 15 }
   0xa   : > { %p99_p2 = pnand %p178_p0, %p98_p1 }
   0xb   : > { %s115_s15 = sld [smem:[#allocation3 + %s174_s14]] (!%p99_p2)  ;;  %p120_p3 = scmp.lt.s32.totalorder (!%p99_p2), %s174_s14, 13 }
   0xc   : > { %102 = sbr.rel (%p99_p2) target bundleno = 24 (0x18), region = 24 }
  0x11   : > { %s241_s14 = smov (!%p120_p3, %s174_s14), 13  ;;  %p116_p4 = scmp.lt.s32.totalorder %s115_s15, 127  ;;  %vm124_vm0 = vcmask 1040384   ;;  %vm125_vm1 = vsmask.f32 256 }
  0x12   : > { %s122_s17 = scalar_lea.vmem %s239_s2, %s241_s14  ;;  %vm126_vm2 = vmand %vm124_vm0, %vm125_vm1 }
  0x13   : > { %s243_s15 = smov (!%p116_p4, %s115_s15), 127  ;;  %v127_v0 = vld [vmem:[%s122_s17] sm:$0x1] }
  0x14   : > { %s118_s20 = scalar_lea.vmem %s238_s1, %s243_s15 }
  0x15   : > { %v123_v1 = vld [vmem:[%s118_s20] sm:$0x1] }
  0x16   : > { %v128_v2 = vsel %vm126_vm2, %v123_v1, %v127_v0 }
  0x17   : > { %129 = vst [vmem:[%s122_s17] sm:$0x1] %v128_v2 }
  0x18 PF: > { %s20_s13 = sadd.s32 1, %s210_s13  }
  0x19   : > { %p17_p5 = scmp.ge.s32.totalorder %s20_s13, 16  }
  0x1b   :  { %19 = sbr.rel (!%p17_p5) target bundleno = 7 (0x7), region = 54 }

// kernel: decoder_forward.7
= control target key start
LH: loop header
LB: loop body
LE: loop exit
PB: predicated region body
PF: predicated region fallthrough
CT: control target
= control target key end

     0   :  { %s323_s1 = inlined_call_operand.vmem [shape: bf16[128,128], index: 1, kind: input, shape index: {}]   ;;  %s324_s2 = inlined_call_operand.vmem [shape: f32[1,128], index: 2, kind: input, shape index: {}]   ;;  %s325_s0 = inlined_call_operand.vmem [shape: bf16[64,128], index: 0, kind: input, shape index: {}]   ;;  %s326_s3 = inlined_call_operand.vmem [shape: f32[64,128], index: 3, kind: output, shape index: {}]  }
   0x1   :  { %v214_v0 = vld [vmem:[%s323_s1 + $0x38] sm:$0xff]  ;;  %v213_v1 = vld [vmem:[%s323_s1 + $0x30] sm:$0xff]  ;;  %v212_v2 = vld [vmem:[%s323_s1 + $0x28] sm:$0xff] }
   0x2   :  { %114 = vmatpush.bf16.msra.mxu0 %v214_v0  ;;  %215 = vmatpush.bf16.msra.mxu1 %v214_v0  ;;  %v211_v3 = vld [vmem:[%s323_s1 + $0x20] sm:$0xff]  ;;  %v210_v4 = vld [vmem:[%s323_s1 + $0x18] sm:$0xff]  ;;  %v209_v5 = vld [vmem:[%s323_s1 + $0x10] sm:$0xff] }
   0x3   :  { %216 = vmatpush.bf16.msra.mxu2 %v214_v0  ;;  %217 = vmatpush.bf16.msra.mxu3 %v214_v0  ;;  %v208_v6 = vld [vmem:[%s323_s1 + $0x8] sm:$0xff]  ;;  %v207_v7 = vld [vmem:[%s323_s1] sm:$0xff]  ;;  %v205_v10 = vld [vmem:[%s325_s0 + $0x10] sm:$0xff] }
   0x4   :  { %v203_v8 = vld [vmem:[%s325_s0] sm:$0xff]  ;;  %v204_v9 = vld [vmem:[%s325_s0 + $0x8] sm:$0xff]  ;;  %v206_v11 = vld [vmem:[%s325_s0 + $0x18] sm:$0xff] }
   0x5   :  { %v239_v12 = vld [vmem:[%s324_s2] ss:$0 sm:$0xff] }
   0x6   :  { %115 = vmatpush.bf16.msra.mxu0 %v213_v1  ;;  %218 = vmatpush.bf16.msra.mxu1 %v213_v1 }
   0x7   :  { %219 = vmatpush.bf16.msra.mxu2 %v213_v1  ;;  %220 = vmatpush.bf16.msra.mxu3 %v213_v1 }
   0xa   :  { %116 = vmatpush.bf16.msra.mxu0 %v212_v2  ;;  %221 = vmatpush.bf16.msra.mxu1 %v212_v2 }
   0xb   :  { %222 = vmatpush.bf16.msra.mxu2 %v212_v2  ;;  %223 = vmatpush.bf16.msra.mxu3 %v212_v2 }
   0xe   :  { %117 = vmatpush.bf16.msra.mxu0 %v211_v3  ;;  %224 = vmatpush.bf16.msra.mxu1 %v211_v3 }
   0xf   :  { %225 = vmatpush.bf16.msra.mxu2 %v211_v3  ;;  %226 = vmatpush.bf16.msra.mxu3 %v211_v3 }
  0x12   :  { %118 = vmatpush.bf16.msra.mxu0 %v210_v4  ;;  %227 = vmatpush.bf16.msra.mxu1 %v210_v4 }
  0x13   :  { %228 = vmatpush.bf16.msra.mxu2 %v210_v4  ;;  %229 = vmatpush.bf16.msra.mxu3 %v210_v4 }
  0x16   :  { %119 = vmatpush.bf16.msra.mxu0 %v209_v5  ;;  %230 = vmatpush.bf16.msra.mxu1 %v209_v5 }
  0x17   :  { %231 = vmatpush.bf16.msra.mxu2 %v209_v5  ;;  %232 = vmatpush.bf16.msra.mxu3 %v209_v5 }
  0x1a   :  { %120 = vmatpush.bf16.msra.mxu0 %v208_v6  ;;  %233 = vmatpush.bf16.msra.mxu1 %v208_v6 }
  0x1b   :  { %234 = vmatpush.bf16.msra.mxu2 %v208_v6  ;;  %235 = vmatpush.bf16.msra.mxu3 %v208_v6 }
  0x1e   :  { %121 = vmatpush.bf16.msra.mxu0 %v207_v7  ;;  %236 = vmatpush.bf16.msra.mxu1 %v207_v7 }
  0x1f   :  { %237 = vmatpush.bf16.msra.mxu2 %v207_v7  ;;  %238 = vmatpush.bf16.msra.mxu3 %v207_v7 }
  0x21   :  { %122 = vmatmul.bf16.vlgmr.msra.gmra.mxu0 %v203_v8  ;;  %127 = vmatmul.bf16.vlgmr.msra.gmra.mxu1 %v204_v9 }
  0x22   :  { %132 = vmatmul.bf16.vlgmr.msra.gmra.mxu2 %v205_v10  ;;  %137 = vmatmul.bf16.vlgmr.msra.gmra.mxu3 %v206_v11 }
  0x9e   :  { %v123_v13 = vpop.f32.mrf.mxu0  ;;  %v128_v14 = vpop.f32.mrf.mxu1 }
  0x9f   :  { %v124_v15 = vadd.f32 %v239_v12, %v123_v13  ;;  %v129_v16 = vadd.f32 %v239_v12, %v128_v14 }
  0xa1   :  { %143 = vst [vmem:[%s326_s3] sm:$0xff] %v124_v15 }
  0xa2   :  { %145 = vst [vmem:[%s326_s3 + $0x10] sm:$0xff] %v129_v16 }
  0xa5   :  { %v133_v17 = vpop.f32.mrf.mxu2  ;;  %v138_v18 = vpop.f32.mrf.mxu3 }
  0xa6   :  { %v134_v19 = vadd.f32 %v239_v12, %v133_v17  ;;  %v139_v20 = vadd.f32 %v239_v12, %v138_v18  ;;  %v125_v21 = vpop.f32.mrf.mxu0  ;;  %v130_v22 = vpop.f32.mrf.mxu1 }
  0xa7   :  { %v126_v23 = vadd.f32 %v239_v12, %v125_v21  ;;  %v131_v24 = vadd.f32 %v239_v12, %v130_v22 }
  0xa8   :  { %147 = vst [vmem:[%s326_s3 + $0x20] sm:$0xff] %v134_v19 }
  0xa9   :  { %149 = vst [vmem:[%s326_s3 + $0x30] sm:$0xff] %v139_v20 }
  0xaa   :  { %144 = vst [vmem:[%s326_s3 + $0x8] sm:$0xff] %v126_v23 }
  0xab   :  { %146 = vst [vmem:[%s326_s3 + $0x18] sm:$0xff] %v131_v24 }
  0xad   :  { %v135_v25 = vpop.f32.mrf.mxu2  ;;  %v140_v26 = vpop.f32.mrf.mxu3 }
  0xae   :  { %v136_v27 = vadd.f32 %v239_v12, %v135_v25  ;;  %v141_v28 = vadd.f32 %v239_v12, %v140_v26 }
  0xb0   :  { %148 = vst [vmem:[%s326_s3 + $0x28] sm:$0xff] %v136_v27 }
  0xb1   :  { %150 = vst [vmem:[%s326_s3 + $0x38] sm:$0xff] %v141_v28 }

// kernel: decoder_forward.5
= control target key start
LH: loop header
LB: loop body
LE: loop exit
PB: predicated region body
PF: predicated region fallthrough
CT: control target
= control target key end

     0   :  { %s943_s1 = inlined_call_operand.vmem [shape: bf16[128,512], index: 1, kind: input, shape index: {}]   ;;  %s944_s0 = inlined_call_operand.vmem [shape: bf16[64,128], index: 0, kind: input, shape index: {}]   ;;  %s945_s2 = inlined_call_operand.vmem [shape: f32[1,512], index: 2, kind: input, shape index: {}]   ;;  %s946_s3 = inlined_call_operand.vmem [shape: f32[64,512], index: 3, kind: output, shape index: {}]  }
   0x1   :  { %v530_v0 = vld [vmem:[%s943_s1 + $0xe0] sm:$0xf]  ;;  %v578_v1 = vld [vmem:[%s943_s1 + $0xec] sm:$0xf0]  ;;  %v576_v2 = vld [vmem:[%s943_s1 + $0xe4] sm:$0xf] }
   0x2   :  { %v531_v3 = vor.u32 %v578_v1, %v530_v0  ;;  %v532_v4 = vld [vmem:[%s943_s1 + $0xf0] sm:$0xf0]  ;;  %v538_v5 = vld [vmem:[%s943_s1 + $0xe8] sm:$0xf]  ;;  %v579_v6 = vld [vmem:[%s943_s1 + $0xf4] sm:$0xf0] }
   0x3   :  { %v535_v7 = vor.u32 %v576_v2, %v532_v4  ;;  %v539_v8 = vor.u32 %v579_v6, %v538_v5  ;;  %v577_v9 = vld [vmem:[%s943_s1 + $0xec] sm:$0xf]  ;;  %v540_v10 = vld [vmem:[%s943_s1 + $0xf8] sm:$0xf0]  ;;  %v514_v11 = vld [vmem:[%s943_s1 + $0xc0] sm:$0xf] }
   0x4   :  { %248 = vmatpush.bf16.msra.mxu0 %v531_v3  ;;  %v543_v12 = vor.u32 %v577_v9, %v540_v10  ;;  %v574_v13 = vld [vmem:[%s943_s1 + $0xcc] sm:$0xf0]  ;;  %v572_v14 = vld [vmem:[%s943_s1 + $0xc4] sm:$0xf]  ;;  %v516_v15 = vld [vmem:[%s943_s1 + $0xd0] sm:$0xf0] }
   0x5   :  { %277 = vmatpush.bf16.msra.mxu1 %v535_v7  ;;  %306 = vmatpush.bf16.msra.mxu2 %v539_v8  ;;  %v515_v16 = vor.u32 %v574_v13, %v514_v11  ;;  %v519_v17 = vor.u32 %v572_v14, %v516_v15  ;;  %v522_v18 = vld [vmem:[%s943_s1 + $0xc8] sm:$0xf]  ;;  %v575_v19 = vld [vmem:[%s943_s1 + $0xd4] sm:$0xf0]  ;;  %v573_v20 = vld [vmem:[%s943_s1 + $0xcc] sm:$0xf] }
   0x6   :  { %335 = vmatpush.bf16.msra.mxu3 %v543_v12  ;;  %v523_v21 = vor.u32 %v575_v19, %v522_v18  ;;  %v524_v22 = vld [vmem:[%s943_s1 + $0xd8] sm:$0xf0]  ;;  %v498_v23 = vld [vmem:[%s943_s1 + $0xa0] sm:$0xf]  ;;  %v570_v24 = vld [vmem:[%s943_s1 + $0xac] sm:$0xf0] }
   0x7   :  { %v527_v25 = vor.u32 %v573_v20, %v524_v22  ;;  %v568_v26 = vld [vmem:[%s943_s1 + $0xa4] sm:$0xf]  ;;  %v500_v27 = vld [vmem:[%s943_s1 + $0xb0] sm:$0xf0]  ;;  %v506_v28 = vld [vmem:[%s943_s1 + $0xa8] sm:$0xf]  ;;  %v499_v29 = vor.u32 %v570_v24, %v498_v23 }
   0x8   :  { %249 = vmatpush.bf16.msra.mxu0 %v515_v16  ;;  %v571_v30 = vld [vmem:[%s943_s1 + $0xb4] sm:$0xf0]  ;;  %v569_v31 = vld [vmem:[%s943_s1 + $0xac] sm:$0xf]  ;;  %v508_v32 = vld [vmem:[%s943_s1 + $0xb8] sm:$0xf0]  ;;  %v503_v33 = vor.u32 %v568_v26, %v500_v27 }
   0x9   :  { %278 = vmatpush.bf16.msra.mxu1 %v519_v17  ;;  %307 = vmatpush.bf16.msra.mxu2 %v523_v21  ;;  %v507_v34 = vor.u32 %v571_v30, %v506_v28  ;;  %v482_v35 = vld [vmem:[%s943_s1 + $0x80] sm:$0xf]  ;;  %v566_v36 = vld [vmem:[%s943_s1 + $0x8c] sm:$0xf0]  ;;  %v564_v37 = vld [vmem:[%s943_s1 + $0x84] sm:$0xf]  ;;  %v511_v38 = vor.u32 %v569_v31, %v508_v32 }
   0xa   :  { %336 = vmatpush.bf16.msra.mxu3 %v527_v25  ;;  %v484_v39 = vld [vmem:[%s943_s1 + $0x90] sm:$0xf0]  ;;  %v490_v40 = vld [vmem:[%s943_s1 + $0x88] sm:$0xf]  ;;  %v567_v41 = vld [vmem:[%s943_s1 + $0x94] sm:$0xf0]  ;;  %v483_v44 = vor.u32 %v566_v36, %v482_v35 }
   0xb   :  { %v565_v42 = vld [vmem:[%s943_s1 + $0x8c] sm:$0xf]  ;;  %v492_v43 = vld [vmem:[%s943_s1 + $0x98] sm:$0xf0]  ;;  %v487_v45 = vor.u32 %v564_v37, %v484_v39  ;;  %v491_v46 = vor.u32 %v567_v41, %v490_v40  ;;  %v466_v47 = vld [vmem:[%s943_s1 + $0x60] sm:$0xf] }
   0xc   :  { %250 = vmatpush.bf16.msra.mxu0 %v499_v29  ;;  %v562_v48 = vld [vmem:[%s943_s1 + $0x6c] sm:$0xf0]  ;;  %v560_v49 = vld [vmem:[%s943_s1 + $0x64] sm:$0xf]  ;;  %v495_v50 = vor.u32 %v565_v42, %v492_v43  ;;  %v468_v51 = vld [vmem:[%s943_s1 + $0x70] sm:$0xf0] }
   0xd   :  { %279 = vmatpush.bf16.msra.mxu1 %v503_v33  ;;  %308 = vmatpush.bf16.msra.mxu2 %v507_v34  ;;  %v474_v52 = vld [vmem:[%s943_s1 + $0x68] sm:$0xf]  ;;  %v563_v53 = vld [vmem:[%s943_s1 + $0x74] sm:$0xf0]  ;;  %v561_v54 = vld [vmem:[%s943_s1 + $0x6c] sm:$0xf]  ;;  %v467_v56 = vor.u32 %v562_v48, %v466_v47  ;;  %v471_v57 = vor.u32 %v560_v49, %v468_v51 }
   0xe   :  { %337 = vmatpush.bf16.msra.mxu3 %v511_v38  ;;  %v476_v55 = vld [vmem:[%s943_s1 + $0x78] sm:$0xf0]  ;;  %v475_v58 = vor.u32 %v563_v53, %v474_v52  ;;  %v450_v59 = vld [vmem:[%s943_s1 + $0x40] sm:$0xf]  ;;  %v558_v60 = vld [vmem:[%s943_s1 + $0x4c] sm:$0xf0] }
   0xf   :  { %v556_v61 = vld [vmem:[%s943_s1 + $0x44] sm:$0xf]  ;;  %v479_v62 = vor.u32 %v561_v54, %v476_v55  ;;  %v452_v63 = vld [vmem:[%s943_s1 + $0x50] sm:$0xf0]  ;;  %v458_v0 = vld [vmem:[%s943_s1 + $0x48] sm:$0xf]  ;;  %v451_v4 = vor.u32 %v558_v60, %v450_v59 }
  0x10   :  { %251 = vmatpush.bf16.msra.mxu0 %v483_v44  ;;  %v559_v1 = vld [vmem:[%s943_s1 + $0x54] sm:$0xf0]  ;;  %v557_v2 = vld [vmem:[%s943_s1 + $0x4c] sm:$0xf]  ;;  %v460_v3 = vld [vmem:[%s943_s1 + $0x58] sm:$0xf0]  ;;  %v455_v5 = vor.u32 %v556_v61, %v452_v63 }
  0x11   :  { %280 = vmatpush.bf16.msra.mxu1 %v487_v45  ;;  %309 = vmatpush.bf16.msra.mxu2 %v491_v46  ;;  %v459_v6 = vor.u32 %v559_v1, %v458_v0  ;;  %v434_v7 = vld [vmem:[%s943_s1 + $0x20] sm:$0xf]  ;;  %v554_v8 = vld [vmem:[%s943_s1 + $0x2c] sm:$0xf0]  ;;  %v552_v9 = vld [vmem:[%s943_s1 + $0x24] sm:$0xf]  ;;  %v463_v10 = vor.u32 %v557_v2, %v460_v3 }
  0x12   :  { %338 = vmatpush.bf16.msra.mxu3 %v495_v50  ;;  %v436_v11 = vld [vmem:[%s943_s1 + $0x30] sm:$0xf0]  ;;  %v442_v12 = vld [vmem:[%s943_s1 + $0x28] sm:$0xf]  ;;  %v555_v13 = vld [vmem:[%s943_s1 + $0x34] sm:$0xf0]  ;;  %v435_v16 = vor.u32 %v554_v8, %v434_v7 }
  0x13   :  { %v553_v14 = vld [vmem:[%s943_s1 + $0x2c] sm:$0xf]  ;;  %v444_v15 = vld [vmem:[%s943_s1 + $0x38] sm:$0xf0]  ;;  %v439_v17 = vor.u32 %v552_v9, %v436_v11  ;;  %v443_v18 = vor.u32 %v555_v13, %v442_v12  ;;  %v418_v19 = vld [vmem:[%s943_s1] sm:$0xf] }
  0x14   :  { %252 = vmatpush.bf16.msra.mxu0 %v467_v56  ;;  %v550_v20 = vld [vmem:[%s943_s1 + $0xc] sm:$0xf0]  ;;  %v548_v21 = vld [vmem:[%s943_s1 + $0x4] sm:$0xf]  ;;  %v447_v22 = vor.u32 %v553_v14, %v444_v15  ;;  %v420_v23 = vld [vmem:[%s943_s1 + $0x10] sm:$0xf0] }
  0x15   :  { %281 = vmatpush.bf16.msra.mxu1 %v471_v57  ;;  %310 = vmatpush.bf16.msra.mxu2 %v475_v58  ;;  %v426_v24 = vld [vmem:[%s943_s1 + $0x8] sm:$0xf]  ;;  %v551_v25 = vld [vmem:[%s943_s1 + $0x14] sm:$0xf0]  ;;  %v549_v26 = vld [vmem:[%s943_s1 + $0xc] sm:$0xf]  ;;  %v419_v28 = vor.u32 %v550_v20, %v418_v19  ;;  %v423_v29 = vor.u32 %v548_v21, %v420_v23 }
  0x16   :  { %339 = vmatpush.bf16.msra.mxu3 %v479_v62  ;;  %v428_v27 = vld [vmem:[%s943_s1 + $0x18] sm:$0xf0]  ;;  %v427_v30 = vor.u32 %v551_v25, %v426_v24  ;;  %v544_v32 = vld [vmem:[%s944_s0] sm:$0xff]  ;;  %v545_v33 = vld [vmem:[%s944_s0 + $0x8] sm:$0xff] }
  0x17   :  { %v431_v31 = vor.u32 %v549_v26, %v428_v27  ;;  %v546_v34 = vld [vmem:[%s944_s0 + $0x10] sm:$0xff]  ;;  %v547_v35 = vld [vmem:[%s944_s0 + $0x18] sm:$0xff]  ;;  %v54_v36 = vld [vmem:[%s945_s2] sm:$0xf] }
  0x18   :  { %253 = vmatpush.bf16.msra.mxu0 %v451_v4  ;;  %v807_v37 = vperm.slane %v54_v36, 0  ;;  %v809_v38 = vperm.slane %v54_v36, 1  ;;  %v819_v43 = vperm.slane %v54_v36, 2  ;;  %v821_v44 = vperm.slane %v54_v36, 3 }
  0x19   :  { %282 = vmatpush.bf16.msra.mxu1 %v455_v5  ;;  %311 = vmatpush.bf16.msra.mxu2 %v459_v6 }
  0x1a   :  { %340 = vmatpush.bf16.msra.mxu3 %v463_v10 }
  0x1c   :  { %254 = vmatpush.bf16.msra.mxu0 %v435_v16 }
  0x1d   :  { %283 = vmatpush.bf16.msra.mxu1 %v439_v17  ;;  %312 = vmatpush.bf16.msra.mxu2 %v443_v18 }
  0x1e   :  { %341 = vmatpush.bf16.msra.mxu3 %v447_v22 }
  0x20   :  { %255 = vmatpush.bf16.msra.mxu0 %v419_v28 }
  0x21   :  { %284 = vmatpush.bf16.msra.mxu1 %v423_v29  ;;  %313 = vmatpush.bf16.msra.mxu2 %v427_v30 }
  0x22   :  { %342 = vmatpush.bf16.msra.mxu3 %v431_v31 }
  0x23   :  { %256 = vmatmul.bf16.vlgmr.msra.gmra.mxu0 %v544_v32 }
  0x24   :  { %285 = vmatmul.bf16.vlgmr.msra.gmra.mxu1 %v544_v32  ;;  %314 = vmatmul.bf16.vlgmr.msra.gmra.mxu2 %v544_v32 }
  0x25   :  { %343 = vmatmul.bf16.vlgmr.msra.gmra.mxu3 %v544_v32 }
  0x33   :  { %261 = vmatmul.bf16.gmra.mxu0 %v545_v33 }
  0x34   :  { %290 = vmatmul.bf16.gmra.mxu1 %v545_v33  ;;  %319 = vmatmul.bf16.gmra.mxu2 %v545_v33 }
  0x35   :  { %348 = vmatmul.bf16.gmra.mxu3 %v545_v33 }
  0x43   :  { %266 = vmatmul.bf16.gmra.mxu0 %v546_v34 }
  0x44   :  { %295 = vmatmul.bf16.gmra.mxu1 %v546_v34  ;;  %324 = vmatmul.bf16.gmra.mxu2 %v546_v34 }
  0x45   :  { %353 = vmatmul.bf16.gmra.mxu3 %v546_v34 }
  0x53   :  { %271 = vmatmul.bf16.gmra.mxu0 %v547_v35 }
  0x54   :  { %300 = vmatmul.bf16.gmra.mxu1 %v547_v35  ;;  %329 = vmatmul.bf16.gmra.mxu2 %v547_v35 }
  0x55   :  { %358 = vmatmul.bf16.gmra.mxu3 %v547_v35 }
  0xa0   :  { %v257_v39 = vpop.f32.mrf.mxu0 }
  0xa1   :  { %v258_v40 = vadd.f32 %v257_v39, %v807_v37  ;;  %v286_v41 = vpop.f32.mrf.mxu1 }
  0xa2   :  { %v287_v42 = vadd.f32 %v286_v41, %v809_v38 }
  0xa3   :  { %364 = vst [vmem:[%s946_s3] sm:$0xff] %v258_v40 }
  0xa4   :  { %365 = vst [vmem:[%s946_s3 + $0x8] sm:$0xff] %v287_v42 }
  0xa7   :  { %v315_v45 = vpop.f32.mrf.mxu2 }
  0xa8   :  { %v316_v46 = vadd.f32 %v315_v45, %v819_v43  ;;  %v344_v47 = vpop.f32.mrf.mxu3  ;;  %v259_v48 = vpop.f32.mrf.mxu0 }
  0xa9   :  { %v345_v49 = vadd.f32 %v344_v47, %v821_v44  ;;  %v260_v50 = vadd.f32 %v259_v48, %v807_v37  ;;  %v288_v51 = vpop.f32.mrf.mxu1 }
  0xaa   :  { %366 = vst [vmem:[%s946_s3 + $0x10] sm:$0xff] %v316_v46  ;;  %v289_v52 = vadd.f32 %v288_v51, %v809_v38 }
  0xab   :  { %367 = vst [vmem:[%s946_s3 + $0x18] sm:$0xff] %v345_v49 }
  0xac   :  { %368 = vst [vmem:[%s946_s3 + $0x20] sm:$0xff] %v260_v50 }
  0xad   :  { %369 = vst [vmem:[%s946_s3 + $0x28] sm:$0xff] %v289_v52 }
  0xaf   :  { %v317_v53 = vpop.f32.mrf.mxu2 }
  0xb0   :  { %v318_v54 = vadd.f32 %v317_v53, %v819_v43  ;;  %v346_v55 = vpop.f32.mrf.mxu3  ;;  %v262_v56 = vpop.f32.mrf.mxu0 }
  0xb1   :  { %v347_v57 = vadd.f32 %v346_v55, %v821_v44  ;;  %v263_v58 = vadd.f32 %v262_v56, %v807_v37  ;;  %v291_v59 = vpop.f32.mrf.mxu1 }
  0xb2   :  { %370 = vst [vmem:[%s946_s3 + $0x30] sm:$0xff] %v318_v54  ;;  %v292_v60 = vadd.f32 %v291_v59, %v809_v38 }
  0xb3   :  { %371 = vst [vmem:[%s946_s3 + $0x38] sm:$0xff] %v347_v57 }
  0xb4   :  { %372 = vst [vmem:[%s946_s3 + $0x40] sm:$0xff] %v263_v58 }
  0xb5   :  { %373 = vst [vmem:[%s946_s3 + $0x48] sm:$0xff] %v292_v60 }
  0xb7   :  { %v320_v61 = vpop.f32.mrf.mxu2 }
  0xb8   :  { %v321_v62 = vadd.f32 %v320_v61, %v819_v43  ;;  %v349_v63 = vpop.f32.mrf.mxu3  ;;  %v264_v0 = vpop.f32.mrf.mxu0 }
  0xb9   :  { %v350_v1 = vadd.f32 %v349_v63, %v821_v44  ;;  %v265_v2 = vadd.f32 %v264_v0, %v807_v37  ;;  %v293_v3 = vpop.f32.mrf.mxu1 }
  0xba   :  { %374 = vst [vmem:[%s946_s3 + $0x50] sm:$0xff] %v321_v62  ;;  %v294_v4 = vadd.f32 %v293_v3, %v809_v38 }
  0xbb   :  { %375 = vst [vmem:[%s946_s3 + $0x58] sm:$0xff] %v350_v1 }
  0xbc   :  { %376 = vst [vmem:[%s946_s3 + $0x60] sm:$0xff] %v265_v2 }
  0xbd   :  { %377 = vst [vmem:[%s946_s3 + $0x68] sm:$0xff] %v294_v4 }
  0xbf   :  { %v322_v5 = vpop.f32.mrf.mxu2 }
  0xc0   :  { %v323_v6 = vadd.f32 %v322_v5, %v819_v43  ;;  %v351_v7 = vpop.f32.mrf.mxu3  ;;  %v267_v8 = vpop.f32.mrf.mxu0 }
  0xc1   :  { %v352_v9 = vadd.f32 %v351_v7, %v821_v44  ;;  %v268_v10 = vadd.f32 %v267_v8, %v807_v37  ;;  %v296_v11 = vpop.f32.mrf.mxu1 }
  0xc2   :  { %378 = vst [vmem:[%s946_s3 + $0x70] sm:$0xff] %v323_v6  ;;  %v297_v12 = vadd.f32 %v296_v11, %v809_v38 }
  0xc3   :  { %379 = vst [vmem:[%s946_s3 + $0x78] sm:$0xff] %v352_v9 }
  0xc4   :  { %380 = vst [vmem:[%s946_s3 + $0x80] sm:$0xff] %v268_v10 }
  0xc5   :  { %381 = vst [vmem:[%s946_s3 + $0x88] sm:$0xff] %v297_v12 }
  0xc7   :  { %v325_v13 = vpop.f32.mrf.mxu2 }
  0xc8   :  { %v326_v14 = vadd.f32 %v325_v13, %v819_v43  ;;  %v354_v15 = vpop.f32.mrf.mxu3  ;;  %v269_v16 = vpop.f32.mrf.mxu0 }
  0xc9   :  { %v355_v17 = vadd.f32 %v354_v15, %v821_v44  ;;  %v270_v18 = vadd.f32 %v269_v16, %v807_v37  ;;  %v298_v19 = vpop.f32.mrf.mxu1 }
  0xca   :  { %382 = vst [vmem:[%s946_s3 + $0x90] sm:$0xff] %v326_v14  ;;  %v299_v20 = vadd.f32 %v298_v19, %v809_v38 }
  0xcb   :  { %383 = vst [vmem:[%s946_s3 + $0x98] sm:$0xff] %v355_v17 }
  0xcc   :  { %384 = vst [vmem:[%s946_s3 + $0xa0] sm:$0xff] %v270_v18 }
  0xcd   :  { %385 = vst [vmem:[%s946_s3 + $0xa8] sm:$0xff] %v299_v20 }
  0xcf   :  { %v327_v21 = vpop.f32.mrf.mxu2 }
  0xd0   :  { %v328_v22 = vadd.f32 %v327_v21, %v819_v43  ;;  %v356_v23 = vpop.f32.mrf.mxu3  ;;  %v272_v24 = vpop.f32.mrf.mxu0 }
  0xd1   :  { %v357_v25 = vadd.f32 %v356_v23, %v821_v44  ;;  %v273_v26 = vadd.f32 %v272_v24, %v807_v37  ;;  %v301_v27 = vpop.f32.mrf.mxu1 }
  0xd2   :  { %386 = vst [vmem:[%s946_s3 + $0xb0] sm:$0xff] %v328_v22  ;;  %v302_v28 = vadd.f32 %v301_v27, %v809_v38 }
  0xd3   :  { %387 = vst [vmem:[%s946_s3 + $0xb8] sm:$0xff] %v357_v25 }
  0xd4   :  { %388 = vst [vmem:[%s946_s3 + $0xc0] sm:$0xff] %v273_v26 }
  0xd5   :  { %389 = vst [vmem:[%s946_s3 + $0xc8] sm:$0xff] %v302_v28 }
  0xd7   :  { %v330_v29 = vpop.f32.mrf.mxu2 }
  0xd8   :  { %v331_v30 = vadd.f32 %v330_v29, %v819_v43  ;;  %v359_v31 = vpop.f32.mrf.mxu3  ;;  %v274_v32 = vpop.f32.mrf.mxu0 }
  0xd9   :  { %v360_v33 = vadd.f32 %v359_v31, %v821_v44  ;;  %v275_v34 = vadd.f32 %v274_v32, %v807_v37  ;;  %v303_v35 = vpop.f32.mrf.mxu1 }
  0xda   :  { %390 = vst [vmem:[%s946_s3 + $0xd0] sm:$0xff] %v331_v30  ;;  %v304_v36 = vadd.f32 %v303_v35, %v809_v38 }
  0xdb   :  { %391 = vst [vmem:[%s946_s3 + $0xd8] sm:$0xff] %v360_v33 }
  0xdc   :  { %392 = vst [vmem:[%s946_s3 + $0xe0] sm:$0xff] %v275_v34 }
  0xdd   :  { %393 = vst [vmem:[%s946_s3 + $0xe8] sm:$0xff] %v304_v36 }
  0xdf   :  { %v332_v37 = vpop.f32.mrf.mxu2 }
  0xe0   :  { %v333_v39 = vadd.f32 %v332_v37, %v819_v43  ;;  %v361_v40 = vpop.f32.mrf.mxu3 }
  0xe1   :  { %v362_v41 = vadd.f32 %v361_v40, %v821_v44 }
  0xe2   :  { %394 = vst [vmem:[%s946_s3 + $0xf0] sm:$0xff] %v333_v39 }
  0xe3   :  { %395 = vst [vmem:[%s946_s3 + $0xf8] sm:$0xff] %v362_v41 }

// kernel: decoder_forward.6
= control target key start
LH: loop header
LB: loop body
LE: loop exit
PB: predicated region body
PF: predicated region fallthrough
CT: control target
= control target key end

     0   :  { %7 = vsyncpa [#allocation3], 0  ;;  %s3648_s12 = smov [#allocation2]   ;;  %s3649_s14 = smov 256   ;;  %s3814_s0 = inlined_call_operand.vmem [shape: f32[8,8,512], index: 0, kind: input, shape index: {}]   ;;  %s3815_s1 = inlined_call_operand.hbm [shape: bf16[128,512], index: 1, kind: input, shape index: {}]   ;;  %s3816_s2 = inlined_call_operand.vmem [shape: bf16[8,8,128], index: 2, kind: output, shape index: {}]  }
   0x1   :  { %s14_s11 = sshll.u32 %s3815_s1, 4  ;;  %s16_s13 = sshll.u32 %s3648_s12, 4  ;;  %s15_s11 = int_to_ptr.hbm [resolvable:$true] %s14_s11  ;;  %s17_s13 = int_to_ptr.vmem [resolvable:$true] %s16_s13 }
   0x2   :  { %s3650_s15 = smov 16  }
   0x3   :  { %22 = dma.hbm_to_vmem [thread:$0]  %s15_s11, 4096, %s17_s13, [#allocation3], %s3649_s14, %s3649_s14, %s3650_s15  }
   0x4   :  { %3646 = dma.done.wait [#allocation3], 4096  }
   0x5   :  { %3647 = vsyncadd [#allocation3], 4294963200  ;;  %v2337_v0 = vld [vmem:[#allocation2 + $0xe0] sm:$0xf]  ;;  %v3312_v1 = vld [vmem:[#allocation2 + $0xec] sm:$0xf0] }
   0x6   :  { %v3310_v2 = vld [vmem:[#allocation2 + $0xe4] sm:$0xf]  ;;  %v2338_v3 = vor.u32 %v3312_v1, %v2337_v0  ;;  %v2339_v4 = vld [vmem:[#allocation2 + $0xf0] sm:$0xf0]  ;;  %v2345_v5 = vld [vmem:[#allocation2 + $0xe8] sm:$0xf] }
   0x7   :  { %v3313_v6 = vld [vmem:[#allocation2 + $0xf4] sm:$0xf0]  ;;  %v2342_v7 = vor.u32 %v3310_v2, %v2339_v4  ;;  %v3311_v9 = vld [vmem:[#allocation2 + $0xec] sm:$0xf]  ;;  %v2347_v10 = vld [vmem:[#allocation2 + $0xf8] sm:$0xf0] }
   0x8   :  { %v2346_v8 = vor.u32 %v3313_v6, %v2345_v5  ;;  %v2321_v11 = vld [vmem:[#allocation2 + $0xc0] sm:$0xf]  ;;  %224 = vmatpush.bf16.msra.mxu0 %v2338_v3  ;;  %v2350_v12 = vor.u32 %v3311_v9, %v2347_v10  ;;  %v3308_v13 = vld [vmem:[#allocation2 + $0xcc] sm:$0xf0]  ;;  %v3306_v14 = vld [vmem:[#allocation2 + $0xc4] sm:$0xf] }
   0x9   :  { %v2323_v15 = vld [vmem:[#allocation2 + $0xd0] sm:$0xf0]  ;;  %237 = vmatpush.bf16.msra.mxu1 %v2342_v7  ;;  %v2322_v16 = vor.u32 %v3308_v13, %v2321_v11  ;;  %v2329_v18 = vld [vmem:[#allocation2 + $0xc8] sm:$0xf]  ;;  %v3309_v19 = vld [vmem:[#allocation2 + $0xd4] sm:$0xf0] }
   0xa   :  { %250 = vmatpush.bf16.msra.mxu2 %v2346_v8  ;;  %v2326_v17 = vor.u32 %v3306_v14, %v2323_v15  ;;  %v3307_v20 = vld [vmem:[#allocation2 + $0xcc] sm:$0xf]  ;;  %263 = vmatpush.bf16.msra.mxu3 %v2350_v12  ;;  %v2330_v21 = vor.u32 %v3309_v19, %v2329_v18  ;;  %v2331_v22 = vld [vmem:[#allocation2 + $0xd8] sm:$0xf0]  ;;  %v2305_v23 = vld [vmem:[#allocation2 + $0xa0] sm:$0xf] }
   0xb   :  { %v3304_v24 = vld [vmem:[#allocation2 + $0xac] sm:$0xf0]  ;;  %v2334_v25 = vor.u32 %v3307_v20, %v2331_v22  ;;  %v3302_v26 = vld [vmem:[#allocation2 + $0xa4] sm:$0xf]  ;;  %v2307_v27 = vld [vmem:[#allocation2 + $0xb0] sm:$0xf0] }
   0xc   :  { %v2313_v28 = vld [vmem:[#allocation2 + $0xa8] sm:$0xf]  ;;  %225 = vmatpush.bf16.msra.mxu0 %v2322_v16  ;;  %v2306_v29 = vor.u32 %v3304_v24, %v2305_v23  ;;  %v3305_v30 = vld [vmem:[#allocation2 + $0xb4] sm:$0xf0]  ;;  %v3303_v31 = vld [vmem:[#allocation2 + $0xac] sm:$0xf]  ;;  %v2310_v33 = vor.u32 %v3302_v26, %v2307_v27 }
   0xd   :  { %v2315_v32 = vld [vmem:[#allocation2 + $0xb8] sm:$0xf0]  ;;  %238 = vmatpush.bf16.msra.mxu1 %v2326_v17  ;;  %v2314_v34 = vor.u32 %v3305_v30, %v2313_v28  ;;  %v2289_v35 = vld [vmem:[#allocation2 + $0x80] sm:$0xf]  ;;  %v3300_v36 = vld [vmem:[#allocation2 + $0x8c] sm:$0xf0] }
   0xe   :  { %251 = vmatpush.bf16.msra.mxu2 %v2330_v21  ;;  %v3298_v37 = vld [vmem:[#allocation2 + $0x84] sm:$0xf]  ;;  %264 = vmatpush.bf16.msra.mxu3 %v2334_v25  ;;  %v2318_v38 = vor.u32 %v3303_v31, %v2315_v32  ;;  %v2291_v39 = vld [vmem:[#allocation2 + $0x90] sm:$0xf0]  ;;  %v2297_v40 = vld [vmem:[#allocation2 + $0x88] sm:$0xf]  ;;  %v2290_v44 = vor.u32 %v3300_v36, %v2289_v35 }
   0xf   :  { %v3301_v41 = vld [vmem:[#allocation2 + $0x94] sm:$0xf0]  ;;  %v3299_v42 = vld [vmem:[#allocation2 + $0x8c] sm:$0xf]  ;;  %v2299_v43 = vld [vmem:[#allocation2 + $0x98] sm:$0xf0]  ;;  %v2294_v45 = vor.u32 %v3298_v37, %v2291_v39 }
  0x10   :  { %226 = vmatpush.bf16.msra.mxu0 %v2306_v29  ;;  %v2298_v46 = vor.u32 %v3301_v41, %v2297_v40  ;;  %v2273_v47 = vld [vmem:[#allocation2 + $0x60] sm:$0xf]  ;;  %v3296_v48 = vld [vmem:[#allocation2 + $0x6c] sm:$0xf0]  ;;  %v3294_v49 = vld [vmem:[#allocation2 + $0x64] sm:$0xf]  ;;  %v2302_v50 = vor.u32 %v3299_v42, %v2299_v43 }
  0x11   :  { %239 = vmatpush.bf16.msra.mxu1 %v2310_v33  ;;  %v2275_v51 = vld [vmem:[#allocation2 + $0x70] sm:$0xf0]  ;;  %v2281_v52 = vld [vmem:[#allocation2 + $0x68] sm:$0xf]  ;;  %v3297_v53 = vld [vmem:[#allocation2 + $0x74] sm:$0xf0]  ;;  %v2274_v56 = vor.u32 %v3296_v48, %v2273_v47 }
  0x12   :  { %252 = vmatpush.bf16.msra.mxu2 %v2314_v34  ;;  %265 = vmatpush.bf16.msra.mxu3 %v2318_v38  ;;  %v3295_v54 = vld [vmem:[#allocation2 + $0x6c] sm:$0xf]  ;;  %v2283_v55 = vld [vmem:[#allocation2 + $0x78] sm:$0xf0]  ;;  %v2278_v57 = vor.u32 %v3294_v49, %v2275_v51  ;;  %v2282_v58 = vor.u32 %v3297_v53, %v2281_v52  ;;  %v2257_v59 = vld [vmem:[#allocation2 + $0x40] sm:$0xf] }
  0x13   :  { %v3292_v60 = vld [vmem:[#allocation2 + $0x4c] sm:$0xf0]  ;;  %v3290_v61 = vld [vmem:[#allocation2 + $0x44] sm:$0xf]  ;;  %v2286_v62 = vor.u32 %v3295_v54, %v2283_v55  ;;  %v2259_v63 = vld [vmem:[#allocation2 + $0x50] sm:$0xf0] }
  0x14   :  { %227 = vmatpush.bf16.msra.mxu0 %v2290_v44  ;;  %v2265_v0 = vld [vmem:[#allocation2 + $0x48] sm:$0xf]  ;;  %v3293_v1 = vld [vmem:[#allocation2 + $0x54] sm:$0xf0]  ;;  %v3291_v2 = vld [vmem:[#allocation2 + $0x4c] sm:$0xf]  ;;  %v2258_v4 = vor.u32 %v3292_v60, %v2257_v59  ;;  %v2262_v5 = vor.u32 %v3290_v61, %v2259_v63 }
  0x15   :  { %240 = vmatpush.bf16.msra.mxu1 %v2294_v45  ;;  %v2267_v3 = vld [vmem:[#allocation2 + $0x58] sm:$0xf0]  ;;  %v2266_v6 = vor.u32 %v3293_v1, %v2265_v0  ;;  %v2241_v7 = vld [vmem:[#allocation2 + $0x20] sm:$0xf]  ;;  %v3288_v8 = vld [vmem:[#allocation2 + $0x2c] sm:$0xf0] }
  0x16   :  { %253 = vmatpush.bf16.msra.mxu2 %v2298_v46  ;;  %266 = vmatpush.bf16.msra.mxu3 %v2302_v50  ;;  %v3286_v9 = vld [vmem:[#allocation2 + $0x24] sm:$0xf]  ;;  %v2270_v10 = vor.u32 %v3291_v2, %v2267_v3  ;;  %v2243_v11 = vld [vmem:[#allocation2 + $0x30] sm:$0xf0]  ;;  %v2249_v12 = vld [vmem:[#allocation2 + $0x28] sm:$0xf]  ;;  %v2242_v16 = vor.u32 %v3288_v8, %v2241_v7 }
  0x17   :  { %v3289_v13 = vld [vmem:[#allocation2 + $0x34] sm:$0xf0]  ;;  %v3287_v14 = vld [vmem:[#allocation2 + $0x2c] sm:$0xf]  ;;  %v2251_v15 = vld [vmem:[#allocation2 + $0x38] sm:$0xf0]  ;;  %v2246_v17 = vor.u32 %v3286_v9, %v2243_v11 }
  0x18   :  { %228 = vmatpush.bf16.msra.mxu0 %v2274_v56  ;;  %v2250_v18 = vor.u32 %v3289_v13, %v2249_v12  ;;  %v2225_v19 = vld [vmem:[#allocation2] sm:$0xf]  ;;  %v3284_v20 = vld [vmem:[#allocation2 + $0xc] sm:$0xf0]  ;;  %v3282_v21 = vld [vmem:[#allocation2 + $0x4] sm:$0xf]  ;;  %v2254_v22 = vor.u32 %v3287_v14, %v2251_v15 }
  0x19   :  { %241 = vmatpush.bf16.msra.mxu1 %v2278_v57  ;;  %v2227_v23 = vld [vmem:[#allocation2 + $0x10] sm:$0xf0]  ;;  %v2233_v24 = vld [vmem:[#allocation2 + $0x8] sm:$0xf]  ;;  %v3285_v25 = vld [vmem:[#allocation2 + $0x14] sm:$0xf0]  ;;  %v2226_v28 = vor.u32 %v3284_v20, %v2225_v19 }
  0x1a   :  { %254 = vmatpush.bf16.msra.mxu2 %v2282_v58  ;;  %267 = vmatpush.bf16.msra.mxu3 %v2286_v62  ;;  %v3283_v26 = vld [vmem:[#allocation2 + $0xc] sm:$0xf]  ;;  %v2235_v27 = vld [vmem:[#allocation2 + $0x18] sm:$0xf0]  ;;  %v2230_v29 = vor.u32 %v3282_v21, %v2227_v23  ;;  %v2234_v30 = vor.u32 %v3285_v25, %v2233_v24  ;;  %v3651_v32 = vmov 0  }
  0x1b   :  { %v2238_v31 = vor.u32 %v3283_v26, %v2235_v27  ;;  %v2469_v33 = vld [vmem:[#allocation2 + $0xe0] sm:$0xf]  ;;  %v3344_v34 = vld [vmem:[#allocation2 + $0xec] sm:$0xf0]  ;;  %v3342_v35 = vld [vmem:[#allocation2 + $0xe4] sm:$0xf] }
  0x1c   :  { %229 = vmatpush.bf16.msra.mxu0 %v2258_v4  ;;  %v2470_v36 = vor.u32 %v3344_v34, %v2469_v33  ;;  %v2471_v37 = vld [vmem:[#allocation2 + $0xf0] sm:$0xf0]  ;;  %v2477_v38 = vld [vmem:[#allocation2 + $0xe8] sm:$0xf]  ;;  %v3345_v39 = vld [vmem:[#allocation2 + $0xf4] sm:$0xf0] }
  0x1d   :  { %242 = vmatpush.bf16.msra.mxu1 %v2262_v5  ;;  %v2474_v40 = vor.u32 %v3342_v35, %v2471_v37  ;;  %v2478_v41 = vor.u32 %v3345_v39, %v2477_v38  ;;  %v3343_v42 = vld [vmem:[#allocation2 + $0xec] sm:$0xf]  ;;  %v2479_v43 = vld [vmem:[#allocation2 + $0xf8] sm:$0xf0]  ;;  %v2453_v45 = vld [vmem:[#allocation2 + $0xc0] sm:$0xf] }
  0x1e   :  { %255 = vmatpush.bf16.msra.mxu2 %v2266_v6  ;;  %268 = vmatpush.bf16.msra.mxu3 %v2270_v10  ;;  %v2482_v44 = vor.u32 %v3343_v42, %v2479_v43  ;;  %v3340_v46 = vld [vmem:[#allocation2 + $0xcc] sm:$0xf0]  ;;  %v3338_v47 = vld [vmem:[#allocation2 + $0xc4] sm:$0xf]  ;;  %v2455_v49 = vld [vmem:[#allocation2 + $0xd0] sm:$0xf0] }
  0x1f   :  { %v2454_v48 = vor.u32 %v3340_v46, %v2453_v45  ;;  %v2461_v50 = vld [vmem:[#allocation2 + $0xc8] sm:$0xf]  ;;  %v3341_v51 = vld [vmem:[#allocation2 + $0xd4] sm:$0xf0]  ;;  %v2458_v52 = vor.u32 %v3338_v47, %v2455_v49  ;;  %v3339_v54 = vld [vmem:[#allocation2 + $0xcc] sm:$0xf] }
  0x20   :  { %230 = vmatpush.bf16.msra.mxu0 %v2242_v16  ;;  %v2462_v53 = vor.u32 %v3341_v51, %v2461_v50  ;;  %v2463_v55 = vld [vmem:[#allocation2 + $0xd8] sm:$0xf0]  ;;  %v2437_v57 = vld [vmem:[#allocation2 + $0xa0] sm:$0xf]  ;;  %v3336_v58 = vld [vmem:[#allocation2 + $0xac] sm:$0xf0] }
  0x21   :  { %243 = vmatpush.bf16.msra.mxu1 %v2246_v17  ;;  %v2466_v56 = vor.u32 %v3339_v54, %v2463_v55  ;;  %v3334_v59 = vld [vmem:[#allocation2 + $0xa4] sm:$0xf]  ;;  %v2438_v60 = vor.u32 %v3336_v58, %v2437_v57  ;;  %v2439_v61 = vld [vmem:[#allocation2 + $0xb0] sm:$0xf0]  ;;  %v2445_v62 = vld [vmem:[#allocation2 + $0xa8] sm:$0xf] }
  0x22   :  { %256 = vmatpush.bf16.msra.mxu2 %v2250_v18  ;;  %269 = vmatpush.bf16.msra.mxu3 %v2254_v22  ;;  %v2442_v63 = vor.u32 %v3334_v59, %v2439_v61  ;;  %v3337_v0 = vld [vmem:[#allocation2 + $0xb4] sm:$0xf0]  ;;  %v3335_v1 = vld [vmem:[#allocation2 + $0xac] sm:$0xf]  ;;  %v2447_v2 = vld [vmem:[#allocation2 + $0xb8] sm:$0xf0] }
  0x23   :  { %v2446_v3 = vor.u32 %v3337_v0, %v2445_v62  ;;  %v2450_v4 = vor.u32 %v3335_v1, %v2447_v2  ;;  %v2421_v5 = vld [vmem:[#allocation2 + $0x80] sm:$0xf]  ;;  %v3332_v6 = vld [vmem:[#allocation2 + $0x8c] sm:$0xf0]  ;;  %v3330_v7 = vld [vmem:[#allocation2 + $0x84] sm:$0xf] }
  0x24   :  { %231 = vmatpush.bf16.msra.mxu0 %v2226_v28  ;;  %v2422_v8 = vor.u32 %v3332_v6, %v2421_v5  ;;  %v2423_v9 = vld [vmem:[#allocation2 + $0x90] sm:$0xf0]  ;;  %v2429_v10 = vld [vmem:[#allocation2 + $0x88] sm:$0xf]  ;;  %v3333_v11 = vld [vmem:[#allocation2 + $0x94] sm:$0xf0] }
  0x25   :  { %244 = vmatpush.bf16.msra.mxu1 %v2230_v29  ;;  %v2426_v12 = vor.u32 %v3330_v7, %v2423_v9  ;;  %v2430_v13 = vor.u32 %v3333_v11, %v2429_v10  ;;  %v3331_v14 = vld [vmem:[#allocation2 + $0x8c] sm:$0xf]  ;;  %v2431_v15 = vld [vmem:[#allocation2 + $0x98] sm:$0xf0]  ;;  %v2405_v17 = vld [vmem:[#allocation2 + $0x60] sm:$0xf] }
  0x26   :  { %257 = vmatpush.bf16.msra.mxu2 %v2234_v30  ;;  %270 = vmatpush.bf16.msra.mxu3 %v2238_v31  ;;  %v2434_v16 = vor.u32 %v3331_v14, %v2431_v15  ;;  %v3328_v18 = vld [vmem:[#allocation2 + $0x6c] sm:$0xf0]  ;;  %v3326_v19 = vld [vmem:[#allocation2 + $0x64] sm:$0xf]  ;;  %v2407_v21 = vld [vmem:[#allocation2 + $0x70] sm:$0xf0] }
  0x27   :  { %232 = vmatmul.bf16.vlgmr.msra.gmra.mxu0 %v3651_v32  ;;  %v2406_v20 = vor.u32 %v3328_v18, %v2405_v17  ;;  %v2413_v22 = vld [vmem:[#allocation2 + $0x68] sm:$0xf]  ;;  %v3329_v23 = vld [vmem:[#allocation2 + $0x74] sm:$0xf0]  ;;  %v2410_v24 = vor.u32 %v3326_v19, %v2407_v21  ;;  %v3327_v26 = vld [vmem:[#allocation2 + $0x6c] sm:$0xf] }
  0x28   :  { %245 = vmatmul.bf16.vlgmr.msra.gmra.mxu1 %v3651_v32  ;;  %497 = vmatpush.bf16.msrb.mxu0 %v2470_v36  ;;  %v2414_v25 = vor.u32 %v3329_v23, %v2413_v22  ;;  %v2415_v27 = vld [vmem:[#allocation2 + $0x78] sm:$0xf0]  ;;  %v2389_v29 = vld [vmem:[#allocation2 + $0x40] sm:$0xf]  ;;  %v3324_v30 = vld [vmem:[#allocation2 + $0x4c] sm:$0xf0] }
  0x29   :  { %258 = vmatmul.bf16.vlgmr.msra.gmra.mxu2 %v3651_v32  ;;  %271 = vmatmul.bf16.vlgmr.msra.gmra.mxu3 %v3651_v32  ;;  %v2418_v28 = vor.u32 %v3327_v26, %v2415_v27  ;;  %v3322_v31 = vld [vmem:[#allocation2 + $0x44] sm:$0xf]  ;;  %v2390_v32 = vor.u32 %v3324_v30, %v2389_v29  ;;  %v2391_v33 = vld [vmem:[#allocation2 + $0x50] sm:$0xf0]  ;;  %v2397_v34 = vld [vmem:[#allocation2 + $0x48] sm:$0xf] }
  0x2a   :  { %510 = vmatpush.bf16.msrb.mxu1 %v2474_v40  ;;  %523 = vmatpush.bf16.msrb.mxu2 %v2478_v41  ;;  %v3325_v35 = vld [vmem:[#allocation2 + $0x54] sm:$0xf0]  ;;  %v2394_v36 = vor.u32 %v3322_v31, %v2391_v33  ;;  %v3323_v38 = vld [vmem:[#allocation2 + $0x4c] sm:$0xf]  ;;  %v2399_v39 = vld [vmem:[#allocation2 + $0x58] sm:$0xf0] }
  0x2b   :  { %536 = vmatpush.bf16.msrb.mxu3 %v2482_v44  ;;  %v2398_v37 = vor.u32 %v3325_v35, %v2397_v34  ;;  %v2402_v40 = vor.u32 %v3323_v38, %v2399_v39  ;;  %v2373_v41 = vld [vmem:[#allocation2 + $0x20] sm:$0xf]  ;;  %v3320_v42 = vld [vmem:[#allocation2 + $0x2c] sm:$0xf0]  ;;  %v3318_v43 = vld [vmem:[#allocation2 + $0x24] sm:$0xf] }
  0x2c   :  { %498 = vmatpush.bf16.msrb.mxu0 %v2454_v48  ;;  %v2374_v44 = vor.u32 %v3320_v42, %v2373_v41  ;;  %v2375_v45 = vld [vmem:[#allocation2 + $0x30] sm:$0xf0]  ;;  %v2381_v46 = vld [vmem:[#allocation2 + $0x28] sm:$0xf]  ;;  %v3321_v47 = vld [vmem:[#allocation2 + $0x34] sm:$0xf0] }
  0x2d   :  { %v2378_v48 = vor.u32 %v3318_v43, %v2375_v45  ;;  %v2382_v49 = vor.u32 %v3321_v47, %v2381_v46  ;;  %v3319_v50 = vld [vmem:[#allocation2 + $0x2c] sm:$0xf]  ;;  %v2383_v51 = vld [vmem:[#allocation2 + $0x38] sm:$0xf0]  ;;  %v3316_v54 = vld [vmem:[#allocation2 + $0xc] sm:$0xf0] }
  0x2e   :  { %511 = vmatpush.bf16.msrb.mxu1 %v2458_v52  ;;  %524 = vmatpush.bf16.msrb.mxu2 %v2462_v53  ;;  %v2386_v52 = vor.u32 %v3319_v50, %v2383_v51  ;;  %v2357_v53 = vld [vmem:[#allocation2] sm:$0xf]  ;;  %v3314_v55 = vld [vmem:[#allocation2 + $0x4] sm:$0xf]  ;;  %v2359_v57 = vld [vmem:[#allocation2 + $0x10] sm:$0xf0] }
  0x2f   :  { %537 = vmatpush.bf16.msrb.mxu3 %v2466_v56  ;;  %v2358_v56 = vor.u32 %v3316_v54, %v2357_v53  ;;  %v2365_v58 = vld [vmem:[#allocation2 + $0x8] sm:$0xf]  ;;  %v3317_v59 = vld [vmem:[#allocation2 + $0x14] sm:$0xf0]  ;;  %v3315_v62 = vld [vmem:[#allocation2 + $0xc] sm:$0xf] }
  0x30   :  { %499 = vmatpush.bf16.msrb.mxu0 %v2438_v60  ;;  %v2362_v60 = vor.u32 %v3314_v55, %v2359_v57  ;;  %v2366_v61 = vor.u32 %v3317_v59, %v2365_v58  ;;  %v28_v0 = vld [vmem:[%s3814_s0] sm:$0xff]  ;;  %v29_v2 = vld [vmem:[%s3814_s0 + $0x8] sm:$0xff]  ;;  %v30_v9 = vld [vmem:[%s3814_s0 + $0x10] sm:$0xff] }
  0x31   :  { %v31_v10 = vld [vmem:[%s3814_s0 + $0x18] sm:$0xff]  ;;  %v3374_v38 = vld [vmem:[#allocation2 + $0xe4] sm:$0xf]  ;;  %v2610_v41 = vld [vmem:[#allocation2 + $0xe8] sm:$0xf] }
  0x32   :  { %512 = vmatpush.bf16.msrb.mxu1 %v2442_v63  ;;  %525 = vmatpush.bf16.msrb.mxu2 %v2446_v3  ;;  %v2367_v63 = vld [vmem:[#allocation2 + $0x18] sm:$0xf0]  ;;  %v3377_v42 = vld [vmem:[#allocation2 + $0xf4] sm:$0xf0]  ;;  %v3375_v45 = vld [vmem:[#allocation2 + $0xec] sm:$0xf] }
  0x33   :  { %538 = vmatpush.bf16.msrb.mxu3 %v2450_v4  ;;  %v2370_v1 = vor.u32 %v3315_v62, %v2367_v63  ;;  %v2612_v46 = vld [vmem:[#allocation2 + $0xf8] sm:$0xf0]  ;;  %v3370_v50 = vld [vmem:[#allocation2 + $0xc4] sm:$0xf]  ;;  %v2594_v53 = vld [vmem:[#allocation2 + $0xc8] sm:$0xf] }
  0x34   :  { %500 = vmatpush.bf16.msrb.mxu0 %v2422_v8  ;;  %v2615_v47 = vor.u32 %v3375_v45, %v2612_v46  ;;  %v3373_v54 = vld [vmem:[#allocation2 + $0xd4] sm:$0xf0]  ;;  %v3371_v57 = vld [vmem:[#allocation2 + $0xcc] sm:$0xf]  ;;  %v2596_v58 = vld [vmem:[#allocation2 + $0xd8] sm:$0xf0] }
  0x35   :  { %v2599_v59 = vor.u32 %v3371_v57, %v2596_v58  ;;  %v3366_v62 = vld [vmem:[#allocation2 + $0xa4] sm:$0xf]  ;;  %v2506_v45 = vld [vmem:[#allocation2 + $0x20] sm:$0xf]  ;;  %v3352_v46 = vld [vmem:[#allocation2 + $0x2c] sm:$0xf0] }
  0x36   :  { %513 = vmatpush.bf16.msrb.mxu1 %v2426_v12  ;;  %526 = vmatpush.bf16.msrb.mxu2 %v2430_v13  ;;  %v2490_v57 = vld [vmem:[#allocation2] sm:$0xf]  ;;  %v3348_v58 = vld [vmem:[#allocation2 + $0xc] sm:$0xf0] }
  0x37   :  { %539 = vmatpush.bf16.msrb.mxu3 %v2434_v16 }
  0x38   :  { %501 = vmatpush.bf16.msrb.mxu0 %v2406_v20 }
  0x3a   :  { %514 = vmatpush.bf16.msrb.mxu1 %v2410_v24  ;;  %527 = vmatpush.bf16.msrb.mxu2 %v2414_v25 }
  0x3b   :  { %540 = vmatpush.bf16.msrb.mxu3 %v2418_v28 }
  0x3c   :  { %502 = vmatpush.bf16.msrb.mxu0 %v2390_v32 }
  0x3e   :  { %515 = vmatpush.bf16.msrb.mxu1 %v2394_v36  ;;  %528 = vmatpush.bf16.msrb.mxu2 %v2398_v37  ;;  %v2602_v36 = vld [vmem:[#allocation2 + $0xe0] sm:$0xf]  ;;  %v3376_v37 = vld [vmem:[#allocation2 + $0xec] sm:$0xf0] }
  0x3f   :  { %541 = vmatpush.bf16.msrb.mxu3 %v2402_v40  ;;  %v2603_v39 = vor.u32 %v3376_v37, %v2602_v36  ;;  %v2604_v40 = vld [vmem:[#allocation2 + $0xf0] sm:$0xf0] }
  0x40   :  { %503 = vmatpush.bf16.msrb.mxu0 %v2374_v44  ;;  %v2607_v43 = vor.u32 %v3374_v38, %v2604_v40  ;;  %v2611_v44 = vor.u32 %v3377_v42, %v2610_v41  ;;  %v2524_v37 = vld [vmem:[#allocation2 + $0x50] sm:$0xf0]  ;;  %v2530_v38 = vld [vmem:[#allocation2 + $0x48] sm:$0xf]  ;;  %v3355_v42 = vld [vmem:[#allocation2 + $0x4c] sm:$0xf] }
  0x42   :  { %516 = vmatpush.bf16.msrb.mxu1 %v2378_v48  ;;  %529 = vmatpush.bf16.msrb.mxu2 %v2382_v49  ;;  %v2586_v48 = vld [vmem:[#allocation2 + $0xc0] sm:$0xf]  ;;  %v3372_v49 = vld [vmem:[#allocation2 + $0xcc] sm:$0xf0] }
  0x43   :  { %542 = vmatpush.bf16.msrb.mxu3 %v2386_v52  ;;  %v2587_v51 = vor.u32 %v3372_v49, %v2586_v48  ;;  %v2588_v52 = vld [vmem:[#allocation2 + $0xd0] sm:$0xf0]  ;;  %v2507_v48 = vor.u32 %v3352_v46, %v2506_v45  ;;  %v2743_v45 = vld [vmem:[#allocation2 + $0xe8] sm:$0xf]  ;;  %v3409_v46 = vld [vmem:[#allocation2 + $0xf4] sm:$0xf0] }
  0x44   :  { %504 = vmatpush.bf16.msrb.mxu0 %v2358_v56  ;;  %v2591_v55 = vor.u32 %v3370_v50, %v2588_v52  ;;  %v2595_v56 = vor.u32 %v3373_v54, %v2594_v53  ;;  %v2508_v49 = vld [vmem:[#allocation2 + $0x30] sm:$0xf0]  ;;  %v2514_v50 = vld [vmem:[#allocation2 + $0x28] sm:$0xf]  ;;  %v3351_v54 = vld [vmem:[#allocation2 + $0x2c] sm:$0xf] }
  0x46   :  { %517 = vmatpush.bf16.msrb.mxu1 %v2362_v60  ;;  %530 = vmatpush.bf16.msrb.mxu2 %v2366_v61  ;;  %v2570_v60 = vld [vmem:[#allocation2 + $0xa0] sm:$0xf]  ;;  %v3368_v61 = vld [vmem:[#allocation2 + $0xac] sm:$0xf0] }
  0x47   :  { %543 = vmatpush.bf16.msrb.mxu3 %v2370_v1  ;;  %v2571_v63 = vor.u32 %v3368_v61, %v2570_v60  ;;  %v2491_v60 = vor.u32 %v3348_v58, %v2490_v57  ;;  %v2492_v61 = vld [vmem:[#allocation2 + $0x10] sm:$0xf0]  ;;  %v2727_v57 = vld [vmem:[#allocation2 + $0xc8] sm:$0xf]  ;;  %v3405_v58 = vld [vmem:[#allocation2 + $0xd4] sm:$0xf0] }
  0x48   :  { %771 = vmatpush.bf16.msra.mxu0 %v2603_v39  ;;  %v3357_v39 = vld [vmem:[#allocation2 + $0x54] sm:$0xf0] }
  0x49   :  { %v2531_v41 = vor.u32 %v3357_v39, %v2530_v38 }
  0x4a   :  { %784 = vmatpush.bf16.msra.mxu1 %v2607_v43  ;;  %797 = vmatpush.bf16.msra.mxu2 %v2611_v44  ;;  %v2532_v43 = vld [vmem:[#allocation2 + $0x58] sm:$0xf0] }
  0x4b   :  { %810 = vmatpush.bf16.msra.mxu3 %v2615_v47  ;;  %v2535_v44 = vor.u32 %v3355_v42, %v2532_v43  ;;  %v3350_v47 = vld [vmem:[#allocation2 + $0x24] sm:$0xf] }
  0x4c   :  { %772 = vmatpush.bf16.msra.mxu0 %v2587_v51  ;;  %v3353_v51 = vld [vmem:[#allocation2 + $0x34] sm:$0xf0]  ;;  %v2511_v52 = vor.u32 %v3350_v47, %v2508_v49  ;;  %v3406_v42 = vld [vmem:[#allocation2 + $0xe4] sm:$0xf]  ;;  %v3407_v49 = vld [vmem:[#allocation2 + $0xec] sm:$0xf] }
  0x4d   :  { %v2515_v53 = vor.u32 %v3353_v51, %v2514_v50  ;;  %v2745_v50 = vld [vmem:[#allocation2 + $0xf8] sm:$0xf0] }
  0x4e   :  { %785 = vmatpush.bf16.msra.mxu1 %v2591_v55  ;;  %798 = vmatpush.bf16.msra.mxu2 %v2595_v56  ;;  %v2516_v55 = vld [vmem:[#allocation2 + $0x38] sm:$0xf0]  ;;  %v2748_v51 = vor.u32 %v3407_v49, %v2745_v50  ;;  %v2639_v49 = vld [vmem:[#allocation2 + $0x20] sm:$0xf]  ;;  %v3384_v50 = vld [vmem:[#allocation2 + $0x2c] sm:$0xf0] }
  0x4f   :  { %811 = vmatpush.bf16.msra.mxu3 %v2599_v59  ;;  %v2519_v56 = vor.u32 %v3351_v54, %v2516_v55  ;;  %v3346_v59 = vld [vmem:[#allocation2 + $0x4] sm:$0xf] }
  0x50   :  { %773 = vmatpush.bf16.msra.mxu0 %v2571_v63  ;;  %v3349_v63 = vld [vmem:[#allocation2 + $0x14] sm:$0xf0]  ;;  %v3402_v54 = vld [vmem:[#allocation2 + $0xc4] sm:$0xf] }
  0xa4   :  { %v233_v3 = vpop.f32.mrf.mxu0 }
  0xa5   :  { %v276_v4 = vadd.f32 %v233_v3, %v28_v0  ;;  %v246_v5 = vpop.f32.mrf.mxu1  ;;  %v2572_v0 = vld [vmem:[#allocation2 + $0xb0] sm:$0xf0]  ;;  %v3369_v3 = vld [vmem:[#allocation2 + $0xb4] sm:$0xf0] }
  0xa6   :  { %v277_v6 = vadd.f32 %v246_v5, %v29_v2  ;;  %v2575_v1 = vor.u32 %v3366_v62, %v2572_v0  ;;  %v2578_v2 = vld [vmem:[#allocation2 + $0xa8] sm:$0xf]  ;;  %v2495_v0 = vor.u32 %v3346_v59, %v2492_v61  ;;  %v3403_v61 = vld [vmem:[#allocation2 + $0xcc] sm:$0xf] }
  0xa7   :  { %v280_v7 = vmul.f32 0.5, %v276_v4  ;;  %v3367_v4 = vld [vmem:[#allocation2 + $0xac] sm:$0xf]  ;;  %v2579_v5 = vor.u32 %v3369_v3, %v2578_v2  ;;  %v2498_v62 = vld [vmem:[#allocation2 + $0x8] sm:$0xf] }
  0xa8   :  { %v284_v8 = vmul.f32 0.5, %v277_v6  ;;  %v2580_v6 = vld [vmem:[#allocation2 + $0xb8] sm:$0xf0]  ;;  %786 = vmatpush.bf16.msra.mxu1 %v2575_v1  ;;  %v2499_v1 = vor.u32 %v3349_v63, %v2498_v62  ;;  %v3347_v2 = vld [vmem:[#allocation2 + $0xc] sm:$0xf] }
  0xa9   :  { %3542 = vtanh.f32 %v280_v7  ;;  %v2583_v7 = vor.u32 %v3367_v4, %v2580_v6  ;;  %799 = vmatpush.bf16.msra.mxu2 %v2579_v5  ;;  %v2500_v3 = vld [vmem:[#allocation2 + $0x18] sm:$0xf0]  ;;  %v2351_v5 = vld [vmem:[%s3814_s0 + $0x20] sm:$0xff]  ;;  %v2352_v6 = vld [vmem:[%s3814_s0 + $0x28] sm:$0xff] }
  0xaa   :  { %3544 = vtanh.f32 %v284_v8  ;;  %v2554_v8 = vld [vmem:[#allocation2 + $0x80] sm:$0xf]  ;;  %v2503_v4 = vor.u32 %v3347_v2, %v2500_v3  ;;  %v2729_v62 = vld [vmem:[#allocation2 + $0xd8] sm:$0xf0]  ;;  %v3398_v2 = vld [vmem:[#allocation2 + $0xa4] sm:$0xf] }
  0xab   :  { %812 = vmatpush.bf16.msra.mxu3 %v2583_v7  ;;  %v2732_v63 = vor.u32 %v3403_v61, %v2729_v62  ;;  %v2623_v61 = vld [vmem:[#allocation2] sm:$0xf]  ;;  %v3380_v62 = vld [vmem:[#allocation2 + $0xc] sm:$0xf0] }
  0xac   :  { %v259_v11 = vpop.f32.mrf.mxu2  ;;  %v272_v13 = vpop.f32.mrf.mxu3 }
  0xad   :  { %v278_v12 = vadd.f32 %v259_v11, %v30_v9  ;;  %v235_v14 = vpop.f32.mrf.mxu0  ;;  %v279_v15 = vadd.f32 %v272_v13, %v31_v10  ;;  %v248_v16 = vpop.f32.mrf.mxu1  ;;  %v3364_v9 = vld [vmem:[#allocation2 + $0x8c] sm:$0xf0]  ;;  %v3362_v10 = vld [vmem:[#allocation2 + $0x84] sm:$0xf]  ;;  %v2562_v13 = vld [vmem:[#allocation2 + $0x88] sm:$0xf] }
  0xae   :  { %v2555_v11 = vor.u32 %v3364_v9, %v2554_v8  ;;  %v3365_v14 = vld [vmem:[#allocation2 + $0x94] sm:$0xf0] }
  0xaf   :  { %3546 = vtanh.f32 %v278_v12  ;;  %v3543_v17 = vpop.eup %3542  ;;  %v289_v18 = vmul.f32 0.5, %v279_v15  ;;  %v2556_v12 = vld [vmem:[#allocation2 + $0x90] sm:$0xf0]  ;;  %v2563_v16 = vor.u32 %v3365_v14, %v2562_v13  ;;  %v2354_v14 = vld [vmem:[%s3814_s0 + $0x38] sm:$0xff] }
  0xb0   :  { %v3545_v19 = vpop.eup %3544  ;;  %v282_v20 = vmul.f32 0.5, %v3543_v17  ;;  %v2559_v15 = vor.u32 %v3362_v10, %v2556_v12  ;;  %v3363_v17 = vld [vmem:[#allocation2 + $0x8c] sm:$0xf]  ;;  %774 = vmatpush.bf16.msra.mxu0 %v2555_v11  ;;  %v2353_v13 = vld [vmem:[%s3814_s0 + $0x30] sm:$0xff] }
  0xb1   :  { %v286_v21 = vmul.f32 0.5, %v3545_v19  ;;  %3548 = vtanh.f32 %v289_v18  ;;  %v2564_v18 = vld [vmem:[#allocation2 + $0x98] sm:$0xf0]  ;;  %800 = vmatpush.bf16.msra.mxu2 %v2563_v16 }
  0xb2   :  { %v283_v22 = vadd.f32 0.5, %v282_v20  ;;  %v2567_v19 = vor.u32 %v3363_v17, %v2564_v18  ;;  %787 = vmatpush.bf16.msra.mxu1 %v2559_v15  ;;  %v2538_v20 = vld [vmem:[#allocation2 + $0x60] sm:$0xf] }
  0xb3   :  { %v287_v23 = vadd.f32 0.5, %v286_v21  ;;  %v3360_v21 = vld [vmem:[#allocation2 + $0x6c] sm:$0xf0] }
  0xb4   :  { %v261_v24 = vpop.f32.mrf.mxu2  ;;  %v274_v26 = vpop.f32.mrf.mxu3  ;;  %813 = vmatpush.bf16.msra.mxu3 %v2567_v19 }
  0xb5   :  { %v3547_v25 = vpop.eup %3546  ;;  %v293_v27 = vmul.f32 0.0, %v287_v23  ;;  %v2539_v23 = vor.u32 %v3360_v21, %v2538_v20  ;;  %v2540_v24 = vld [vmem:[#allocation2 + $0x70] sm:$0xf0]  ;;  %v3361_v26 = vld [vmem:[#allocation2 + $0x74] sm:$0xf0] }
  0xb6   :  { %v294_v28 = vmul.f32 %v3547_v25, %v283_v22  ;;  %v3358_v22 = vld [vmem:[#allocation2 + $0x64] sm:$0xf]  ;;  %v2546_v25 = vld [vmem:[#allocation2 + $0x68] sm:$0xf] }
  0xb7   :  { %v3549_v29 = vpop.eup %3548  ;;  %775 = vmatpush.bf16.msra.mxu0 %v2539_v23 }
  0xb8   :  { %v3682_v30 = vadd.f32 %v294_v28, %v293_v27  ;;  %v291_v31 = vmul.f32 0.5, %v3549_v29  ;;  %v2543_v27 = vor.u32 %v3358_v22, %v2540_v24  ;;  %v2547_v28 = vor.u32 %v3361_v26, %v2546_v25  ;;  %v3359_v29 = vld [vmem:[#allocation2 + $0x6c] sm:$0xf] }
  0xba   :  { %3550 = vtanh.f32 %v3682_v30  ;;  %v292_v32 = vadd.f32 0.5, %v291_v31  ;;  %v2548_v31 = vld [vmem:[#allocation2 + $0x78] sm:$0xf0]  ;;  %788 = vmatpush.bf16.msra.mxu1 %v2543_v27  ;;  %801 = vmatpush.bf16.msra.mxu2 %v2547_v28 }
  0xbe   :  { %802 = vmatpush.bf16.msra.mxu2 %v2531_v41  ;;  %v3408_v41 = vld [vmem:[#allocation2 + $0xec] sm:$0xf0] }
  0xc0   :  { %v3551_v33 = vpop.eup %3550 }
  0xc1   :  { %v297_v34 = vmul.f32 %v3551_v33, %v292_v32  ;;  %v2551_v32 = vor.u32 %v3359_v29, %v2548_v31  ;;  %v2522_v33 = vld [vmem:[#allocation2 + $0x40] sm:$0xf] }
  0xc2   :  { %803 = vmatpush.bf16.msra.mxu2 %v2515_v53  ;;  %v3404_v53 = vld [vmem:[#allocation2 + $0xcc] sm:$0xf0] }
  0xc3   :  { %v298_v35 = vpack.c.bf16 %v297_v34, %v297_v34  ;;  %v3356_v34 = vld [vmem:[#allocation2 + $0x4c] sm:$0xf0]  ;;  %814 = vmatpush.bf16.msra.mxu3 %v2551_v32 }
  0xc4   :  { %v2523_v36 = vor.u32 %v3356_v34, %v2522_v33 }
  0xc5   :  { %299 = vst [vmem:[%s3816_s2] sm:$0xf] %v298_v35  ;;  %505 = vmatmul.bf16.vlgmr.msrb.gmra.mxu0 %v298_v35  ;;  %518 = vmatmul.bf16.vlgmr.msrb.gmra.mxu1 %v298_v35 }
  0xc6   :  { %531 = vmatmul.bf16.vlgmr.msrb.gmra.mxu2 %v298_v35  ;;  %544 = vmatmul.bf16.vlgmr.msrb.gmra.mxu3 %v298_v35  ;;  %v3354_v35 = vld [vmem:[#allocation2 + $0x44] sm:$0xf] }
  0xc7   :  { %v2527_v40 = vor.u32 %v3354_v35, %v2524_v37  ;;  %776 = vmatpush.bf16.msra.mxu0 %v2523_v36  ;;  %815 = vmatpush.bf16.msra.mxu3 %v2535_v44  ;;  %v2737_v44 = vld [vmem:[#allocation2 + $0xf0] sm:$0xf0] }
  0xc8   :  { %804 = vmatpush.bf16.msra.mxu2 %v2499_v1  ;;  %v2740_v47 = vor.u32 %v3406_v42, %v2737_v44  ;;  %v3400_v1 = vld [vmem:[#allocation2 + $0xac] sm:$0xf0]  ;;  %v2663_v42 = vld [vmem:[#allocation2 + $0x48] sm:$0xf] }
  0xc9   :  { %789 = vmatpush.bf16.msra.mxu1 %v2527_v40 }
  0xcb   :  { %777 = vmatpush.bf16.msra.mxu0 %v2507_v48  ;;  %816 = vmatpush.bf16.msra.mxu3 %v2519_v56  ;;  %v2744_v48 = vor.u32 %v3409_v46, %v2743_v45  ;;  %v2721_v56 = vld [vmem:[#allocation2 + $0xd0] sm:$0xf0]  ;;  %v3387_v46 = vld [vmem:[#allocation2 + $0x4c] sm:$0xf] }
  0xcc   :  { %v2724_v59 = vor.u32 %v3402_v54, %v2721_v56  ;;  %v2647_v54 = vld [vmem:[#allocation2 + $0x28] sm:$0xf] }
  0xcd   :  { %790 = vmatpush.bf16.msra.mxu1 %v2511_v52  ;;  %1071 = vmatpush.bf16.msrb.mxu2 %v2744_v48  ;;  %v2719_v52 = vld [vmem:[#allocation2 + $0xc0] sm:$0xf] }
  0xce   :  { %v2720_v55 = vor.u32 %v3404_v53, %v2719_v52  ;;  %v2640_v52 = vor.u32 %v3384_v50, %v2639_v49  ;;  %v2641_v53 = vld [vmem:[#allocation2 + $0x30] sm:$0xf0]  ;;  %v2876_v49 = vld [vmem:[#allocation2 + $0xe8] sm:$0xf]  ;;  %v3441_v50 = vld [vmem:[#allocation2 + $0xf4] sm:$0xf0] }
  0xcf   :  { %778 = vmatpush.bf16.msra.mxu0 %v2491_v60  ;;  %817 = vmatpush.bf16.msra.mxu3 %v2503_v4  ;;  %v2728_v60 = vor.u32 %v3405_v58, %v2727_v57  ;;  %v2705_v4 = vld [vmem:[#allocation2 + $0xb0] sm:$0xf0]  ;;  %v3383_v58 = vld [vmem:[#allocation2 + $0x2c] sm:$0xf] }
  0xd1   :  { %791 = vmatpush.bf16.msra.mxu1 %v2495_v0  ;;  %1072 = vmatpush.bf16.msrb.mxu2 %v2728_v60  ;;  %v2703_v0 = vld [vmem:[#allocation2 + $0xa0] sm:$0xf] }
  0xd2   :  { %v2704_v3 = vor.u32 %v3400_v1, %v2703_v0  ;;  %v2624_v0 = vor.u32 %v3380_v62, %v2623_v61  ;;  %v2625_v1 = vld [vmem:[#allocation2 + $0x10] sm:$0xf0]  ;;  %v2860_v61 = vld [vmem:[#allocation2 + $0xc8] sm:$0xf]  ;;  %v3437_v62 = vld [vmem:[#allocation2 + $0xd4] sm:$0xf0] }
  0xd3   :  { %1084 = vmatpush.bf16.msrb.mxu3 %v2748_v51  ;;  %v3382_v51 = vld [vmem:[#allocation2 + $0x24] sm:$0xf] }
  0xd4   :  { %v2644_v56 = vor.u32 %v3382_v51, %v2641_v53  ;;  %v3439_v53 = vld [vmem:[#allocation2 + $0xec] sm:$0xf] }
  0xd5   :  { %1058 = vmatpush.bf16.msrb.mxu1 %v2740_v47  ;;  %v2665_v47 = vld [vmem:[#allocation2 + $0x58] sm:$0xf0] }
  0xd6   :  { %v2668_v48 = vor.u32 %v3387_v46, %v2665_v47  ;;  %v3438_v46 = vld [vmem:[#allocation2 + $0xe4] sm:$0xf] }
  0xd7   :  { %1085 = vmatpush.bf16.msrb.mxu3 %v2732_v63  ;;  %v3378_v63 = vld [vmem:[#allocation2 + $0x4] sm:$0xf] }
  0xd9   :  { %1059 = vmatpush.bf16.msrb.mxu1 %v2724_v59  ;;  %v2649_v59 = vld [vmem:[#allocation2 + $0x38] sm:$0xf0] }
  0xda   :  { %v2652_v60 = vor.u32 %v3383_v58, %v2649_v59  ;;  %v3434_v58 = vld [vmem:[#allocation2 + $0xc4] sm:$0xf] }
 0x142   :  { %v506_v7 = vpop.f32.mrf.mxu0  ;;  %v519_v8 = vpop.f32.mrf.mxu1 }
 0x143   :  { %v549_v9 = vadd.f32 %v2351_v5, %v506_v7  ;;  %v550_v10 = vadd.f32 %v2352_v6, %v519_v8  ;;  %v2708_v5 = vor.u32 %v3398_v2, %v2705_v4  ;;  %v2711_v6 = vld [vmem:[#allocation2 + $0xa8] sm:$0xf]  ;;  %v3401_v7 = vld [vmem:[#allocation2 + $0xb4] sm:$0xf0]  ;;  %v3399_v8 = vld [vmem:[#allocation2 + $0xac] sm:$0xf]  ;;  %v2628_v4 = vor.u32 %v3378_v63, %v2625_v1 }
 0x144   :  { %v2631_v2 = vld [vmem:[#allocation2 + $0x8] sm:$0xf]  ;;  %v3435_v1 = vld [vmem:[#allocation2 + $0xcc] sm:$0xf] }
 0x145   :  { %v553_v11 = vmul.f32 0.5, %v549_v9  ;;  %v557_v12 = vmul.f32 0.5, %v550_v10  ;;  %v2712_v9 = vor.u32 %v3401_v7, %v2711_v6  ;;  %v2713_v10 = vld [vmem:[#allocation2 + $0xb8] sm:$0xf0]  ;;  %1060 = vmatpush.bf16.msrb.mxu1 %v2708_v5  ;;  %v3379_v6 = vld [vmem:[#allocation2 + $0xc] sm:$0xf] }
 0x146   :  { %v2633_v7 = vld [vmem:[#allocation2 + $0x18] sm:$0xf0] }
 0x147   :  { %3552 = vtanh.f32 %v553_v11  ;;  %v2716_v11 = vor.u32 %v3399_v8, %v2713_v10  ;;  %1073 = vmatpush.bf16.msrb.mxu2 %v2712_v9  ;;  %v2636_v8 = vor.u32 %v3379_v6, %v2633_v7  ;;  %v2484_v9 = vld [vmem:[%s3814_s0 + $0x40] sm:$0xff]  ;;  %v2485_v10 = vld [vmem:[%s3814_s0 + $0x48] sm:$0xff] }
 0x148   :  { %3554 = vtanh.f32 %v557_v12  ;;  %v2687_v12 = vld [vmem:[#allocation2 + $0x80] sm:$0xf]  ;;  %v3430_v6 = vld [vmem:[#allocation2 + $0xa4] sm:$0xf] }
 0x149   :  { %v532_v15 = vpop.f32.mrf.mxu2  ;;  %v545_v16 = vpop.f32.mrf.mxu3  ;;  %1086 = vmatpush.bf16.msrb.mxu3 %v2716_v11 }
 0x14a   :  { %v551_v17 = vadd.f32 %v2353_v13, %v532_v15  ;;  %v552_v18 = vadd.f32 %v2354_v14, %v545_v16  ;;  %v508_v19 = vpop.f32.mrf.mxu0  ;;  %v521_v20 = vpop.f32.mrf.mxu1  ;;  %v3396_v13 = vld [vmem:[#allocation2 + $0x8c] sm:$0xf0]  ;;  %v3394_v14 = vld [vmem:[#allocation2 + $0x84] sm:$0xf]  ;;  %v2689_v16 = vld [vmem:[#allocation2 + $0x90] sm:$0xf0] }
 0x14b   :  { %v2688_v15 = vor.u32 %v3396_v13, %v2687_v12  ;;  %v2692_v19 = vor.u32 %v3394_v14, %v2689_v16 }
 0x14c   :  { %3556 = vtanh.f32 %v551_v17  ;;  %v562_v21 = vmul.f32 0.5, %v552_v18  ;;  %v2695_v17 = vld [vmem:[#allocation2 + $0x88] sm:$0xf]  ;;  %v3397_v18 = vld [vmem:[#allocation2 + $0x94] sm:$0xf0] }
 0x14d   :  { %v3553_v22 = vpop.eup %3552  ;;  %v2696_v20 = vor.u32 %v3397_v18, %v2695_v17  ;;  %1061 = vmatpush.bf16.msrb.mxu1 %v2692_v19  ;;  %v2486_v17 = vld [vmem:[%s3814_s0 + $0x50] sm:$0xff]  ;;  %v2487_v18 = vld [vmem:[%s3814_s0 + $0x58] sm:$0xff] }
 0x14e   :  { %v3555_v23 = vpop.eup %3554  ;;  %v555_v24 = vmul.f32 0.5, %v3553_v22  ;;  %3558 = vtanh.f32 %v562_v21  ;;  %v3395_v21 = vld [vmem:[#allocation2 + $0x8c] sm:$0xf]  ;;  %v2697_v22 = vld [vmem:[#allocation2 + $0x98] sm:$0xf0] }
 0x14f   :  { %v559_v25 = vmul.f32 0.5, %v3555_v23  ;;  %v2700_v23 = vor.u32 %v3395_v21, %v2697_v22  ;;  %1074 = vmatpush.bf16.msrb.mxu2 %v2696_v20 }
 0x150   :  { %v556_v26 = vadd.f32 0.5, %v555_v24  ;;  %v2671_v24 = vld [vmem:[#allocation2 + $0x60] sm:$0xf] }
 0x151   :  { %v560_v27 = vadd.f32 0.5, %v559_v25  ;;  %v534_v28 = vpop.f32.mrf.mxu2  ;;  %v547_v29 = vpop.f32.mrf.mxu3  ;;  %v3392_v25 = vld [vmem:[#allocation2 + $0x6c] sm:$0xf0]  ;;  %1087 = vmatpush.bf16.msrb.mxu3 %v2700_v23 }
 0x152   :  { %v3557_v31 = vpop.eup %3556  ;;  %v2673_v28 = vld [vmem:[#allocation2 + $0x70] sm:$0xf0]  ;;  %v2679_v29 = vld [vmem:[#allocation2 + $0x68] sm:$0xf] }
 0x153   :  { %v566_v32 = vmul.f32 %v560_v27, %v3682_v30  ;;  %v567_v33 = vmul.f32 %v3557_v31, %v556_v26  ;;  %v2735_v30 = vld [vmem:[#allocation2 + $0xe0] sm:$0xf]  ;;  %v3390_v26 = vld [vmem:[#allocation2 + $0x64] sm:$0xf]  ;;  %v2672_v27 = vor.u32 %v3392_v25, %v2671_v24  ;;  %v3393_v31 = vld [vmem:[#allocation2 + $0x74] sm:$0xf0] }
 0x154   :  { %v3559_v34 = vpop.eup %3558  ;;  %v2736_v43 = vor.u32 %v3408_v41, %v2735_v30  ;;  %v2657_v41 = vld [vmem:[#allocation2 + $0x50] sm:$0xf0] }
 0x155   :  { %v3701_v35 = vadd.f32 %v567_v33, %v566_v32  ;;  %v564_v36 = vmul.f32 0.5, %v3559_v34  ;;  %v2676_v32 = vor.u32 %v3390_v26, %v2673_v28  ;;  %v2680_v33 = vor.u32 %v3393_v31, %v2679_v29  ;;  %v3391_v34 = vld [vmem:[#allocation2 + $0x6c] sm:$0xf] }
 0x156   :  { %1045 = vmatpush.bf16.msrb.mxu0 %v2736_v43  ;;  %v3389_v43 = vld [vmem:[#allocation2 + $0x54] sm:$0xf0] }
 0x157   :  { %3560 = vtanh.f32 %v3701_v35  ;;  %v565_v37 = vadd.f32 0.5, %v564_v36  ;;  %v2681_v36 = vld [vmem:[#allocation2 + $0x78] sm:$0xf0]  ;;  %1062 = vmatpush.bf16.msrb.mxu1 %v2676_v32  ;;  %1075 = vmatpush.bf16.msrb.mxu2 %v2680_v33  ;;  %v2664_v45 = vor.u32 %v3389_v43, %v2663_v42 }
 0x15a   :  { %1046 = vmatpush.bf16.msrb.mxu0 %v2720_v55  ;;  %v3385_v55 = vld [vmem:[#allocation2 + $0x34] sm:$0xf0] }
 0x15b   :  { %1076 = vmatpush.bf16.msrb.mxu2 %v2664_v45  ;;  %v2648_v57 = vor.u32 %v3385_v55, %v2647_v54  ;;  %v3440_v45 = vld [vmem:[#allocation2 + $0xec] sm:$0xf0]  ;;  %v2878_v54 = vld [vmem:[#allocation2 + $0xf8] sm:$0xf0] }
 0x15c   :  { %v2881_v55 = vor.u32 %v3439_v53, %v2878_v54  ;;  %v2772_v53 = vld [vmem:[#allocation2 + $0x20] sm:$0xf]  ;;  %v3416_v54 = vld [vmem:[#allocation2 + $0x2c] sm:$0xf0] }
 0x15d   :  { %v3561_v38 = vpop.eup %3560 }
 0x15e   :  { %v570_v39 = vmul.f32 %v3561_v38, %v565_v37  ;;  %1047 = vmatpush.bf16.msrb.mxu0 %v2704_v3  ;;  %v2684_v37 = vor.u32 %v3391_v34, %v2681_v36  ;;  %v2655_v38 = vld [vmem:[#allocation2 + $0x40] sm:$0xf]  ;;  %v3381_v3 = vld [vmem:[#allocation2 + $0x14] sm:$0xf0] }
 0x15f   :  { %1077 = vmatpush.bf16.msrb.mxu2 %v2648_v57  ;;  %v2632_v5 = vor.u32 %v3381_v3, %v2631_v2  ;;  %v3436_v57 = vld [vmem:[#allocation2 + $0xcc] sm:$0xf0]  ;;  %v2862_v2 = vld [vmem:[#allocation2 + $0xd8] sm:$0xf0] }
 0x160   :  { %v571_v40 = vpack.c.bf16 %v570_v39, %v570_v39  ;;  %v3388_v39 = vld [vmem:[#allocation2 + $0x4c] sm:$0xf0]  ;;  %1088 = vmatpush.bf16.msrb.mxu3 %v2684_v37  ;;  %v2865_v3 = vor.u32 %v3435_v1, %v2862_v2  ;;  %v2756_v1 = vld [vmem:[#allocation2] sm:$0xf] }
 0x161   :  { %v2656_v30 = vor.u32 %v3388_v39, %v2655_v38  ;;  %v3412_v2 = vld [vmem:[#allocation2 + $0xc] sm:$0xf0] }
 0x162   :  { %2483 = vst [vmem:[%s3816_s2 + $0x4] sm:$0xf] %v571_v40  ;;  %779 = vmatmul.bf16.vlgmr.msra.gmra.mxu0 %v571_v40  ;;  %792 = vmatmul.bf16.vlgmr.msra.gmra.mxu1 %v571_v40 }
 0x163   :  { %805 = vmatmul.bf16.vlgmr.msra.gmra.mxu2 %v571_v40  ;;  %818 = vmatmul.bf16.vlgmr.msra.gmra.mxu3 %v571_v40  ;;  %v3386_v40 = vld [vmem:[#allocation2 + $0x44] sm:$0xf] }
 0x164   :  { %1048 = vmatpush.bf16.msrb.mxu0 %v2688_v15  ;;  %v2660_v44 = vor.u32 %v3386_v40, %v2657_v41  ;;  %1089 = vmatpush.bf16.msrb.mxu3 %v2668_v48  ;;  %v2870_v48 = vld [vmem:[#allocation2 + $0xf0] sm:$0xf0] }
 0x165   :  { %1078 = vmatpush.bf16.msrb.mxu2 %v2632_v5  ;;  %v2873_v51 = vor.u32 %v3438_v46, %v2870_v48  ;;  %v3432_v5 = vld [vmem:[#allocation2 + $0xac] sm:$0xf0]  ;;  %v2796_v46 = vld [vmem:[#allocation2 + $0x48] sm:$0xf] }
 0x166   :  { %1063 = vmatpush.bf16.msrb.mxu1 %v2660_v44 }
 0x168   :  { %1049 = vmatpush.bf16.msrb.mxu0 %v2672_v27  ;;  %1090 = vmatpush.bf16.msrb.mxu3 %v2652_v60  ;;  %v2854_v60 = vld [vmem:[#allocation2 + $0xd0] sm:$0xf0] }
 0x169   :  { %v2857_v63 = vor.u32 %v3434_v58, %v2854_v60  ;;  %v2780_v58 = vld [vmem:[#allocation2 + $0x28] sm:$0xf] }
 0x16a   :  { %1064 = vmatpush.bf16.msrb.mxu1 %v2644_v56  ;;  %v2852_v56 = vld [vmem:[#allocation2 + $0xc0] sm:$0xf] }
 0x16b   :  { %v2853_v59 = vor.u32 %v3436_v57, %v2852_v56  ;;  %v2773_v56 = vor.u32 %v3416_v54, %v2772_v53  ;;  %v2774_v57 = vld [vmem:[#allocation2 + $0x30] sm:$0xf0]  ;;  %v3009_v53 = vld [vmem:[#allocation2 + $0xe8] sm:$0xf]  ;;  %v3473_v54 = vld [vmem:[#allocation2 + $0xf4] sm:$0xf0] }
 0x16c   :  { %1050 = vmatpush.bf16.msrb.mxu0 %v2656_v30  ;;  %1091 = vmatpush.bf16.msrb.mxu3 %v2636_v8  ;;  %v2838_v8 = vld [vmem:[#allocation2 + $0xb0] sm:$0xf0] }
 0x16e   :  { %1065 = vmatpush.bf16.msrb.mxu1 %v2628_v4  ;;  %v2836_v4 = vld [vmem:[#allocation2 + $0xa0] sm:$0xf] }
 0x16f   :  { %v2837_v7 = vor.u32 %v3432_v5, %v2836_v4  ;;  %v2757_v4 = vor.u32 %v3412_v2, %v2756_v1  ;;  %v2758_v5 = vld [vmem:[#allocation2 + $0x10] sm:$0xf0]  ;;  %v2993_v1 = vld [vmem:[#allocation2 + $0xc8] sm:$0xf]  ;;  %v3469_v2 = vld [vmem:[#allocation2 + $0xd4] sm:$0xf0] }
 0x170   :  { %1051 = vmatpush.bf16.msrb.mxu0 %v2640_v52  ;;  %v2877_v52 = vor.u32 %v3441_v50, %v2876_v49  ;;  %1358 = vmatpush.bf16.msra.mxu3 %v2881_v55  ;;  %v3419_v50 = vld [vmem:[#allocation2 + $0x4c] sm:$0xf]  ;;  %v3414_v55 = vld [vmem:[#allocation2 + $0x24] sm:$0xf] }
 0x171   :  { %v2777_v60 = vor.u32 %v3414_v55, %v2774_v57  ;;  %v3471_v57 = vld [vmem:[#allocation2 + $0xec] sm:$0xf] }
 0x172   :  { %1332 = vmatpush.bf16.msra.mxu1 %v2873_v51  ;;  %1345 = vmatpush.bf16.msra.mxu2 %v2877_v52  ;;  %v2798_v51 = vld [vmem:[#allocation2 + $0x58] sm:$0xf0] }
 0x173   :  { %v2801_v52 = vor.u32 %v3419_v50, %v2798_v51  ;;  %v3470_v50 = vld [vmem:[#allocation2 + $0xe4] sm:$0xf] }
 0x174   :  { %1052 = vmatpush.bf16.msrb.mxu0 %v2624_v0  ;;  %v2861_v0 = vor.u32 %v3437_v62, %v2860_v61  ;;  %1359 = vmatpush.bf16.msra.mxu3 %v2865_v3  ;;  %v3415_v62 = vld [vmem:[#allocation2 + $0x2c] sm:$0xf]  ;;  %v3410_v3 = vld [vmem:[#allocation2 + $0x4] sm:$0xf] }
 0x176   :  { %1333 = vmatpush.bf16.msra.mxu1 %v2857_v63  ;;  %1346 = vmatpush.bf16.msra.mxu2 %v2861_v0  ;;  %v2782_v63 = vld [vmem:[#allocation2 + $0x38] sm:$0xf0] }
 0x177   :  { %v2785_v0 = vor.u32 %v3415_v62, %v2782_v63  ;;  %v3466_v62 = vld [vmem:[#allocation2 + $0xc4] sm:$0xf] }
 0x1df   :  { %v780_v11 = vpop.f32.mrf.mxu0  ;;  %v793_v12 = vpop.f32.mrf.mxu1 }
 0x1e0   :  { %v823_v13 = vadd.f32 %v2484_v9, %v780_v11  ;;  %v824_v14 = vadd.f32 %v2485_v10, %v793_v12  ;;  %v2841_v9 = vor.u32 %v3430_v6, %v2838_v8  ;;  %v2844_v10 = vld [vmem:[#allocation2 + $0xa8] sm:$0xf]  ;;  %v3433_v11 = vld [vmem:[#allocation2 + $0xb4] sm:$0xf0]  ;;  %v3431_v12 = vld [vmem:[#allocation2 + $0xac] sm:$0xf]  ;;  %v2761_v8 = vor.u32 %v3410_v3, %v2758_v5 }
 0x1e1   :  { %v2764_v6 = vld [vmem:[#allocation2 + $0x8] sm:$0xf]  ;;  %v3467_v5 = vld [vmem:[#allocation2 + $0xcc] sm:$0xf] }
 0x1e2   :  { %v827_v15 = vmul.f32 0.5, %v823_v13  ;;  %v831_v16 = vmul.f32 0.5, %v824_v14  ;;  %v2845_v13 = vor.u32 %v3433_v11, %v2844_v10  ;;  %v2846_v14 = vld [vmem:[#allocation2 + $0xb8] sm:$0xf0]  ;;  %1334 = vmatpush.bf16.msra.mxu1 %v2841_v9  ;;  %v3411_v10 = vld [vmem:[#allocation2 + $0xc] sm:$0xf] }
 0x1e3   :  { %v2766_v11 = vld [vmem:[#allocation2 + $0x18] sm:$0xf0] }
 0x1e4   :  { %3562 = vtanh.f32 %v827_v15  ;;  %v2849_v15 = vor.u32 %v3431_v12, %v2846_v14  ;;  %1347 = vmatpush.bf16.msra.mxu2 %v2845_v13  ;;  %v2769_v12 = vor.u32 %v3411_v10, %v2766_v11  ;;  %v2617_v13 = vld [vmem:[%s3814_s0 + $0x60] sm:$0xff]  ;;  %v2618_v14 = vld [vmem:[%s3814_s0 + $0x68] sm:$0xff] }
 0x1e5   :  { %3564 = vtanh.f32 %v831_v16  ;;  %v2820_v16 = vld [vmem:[#allocation2 + $0x80] sm:$0xf]  ;;  %v3462_v10 = vld [vmem:[#allocation2 + $0xa4] sm:$0xf] }
 0x1e6   :  { %v806_v19 = vpop.f32.mrf.mxu2  ;;  %v819_v20 = vpop.f32.mrf.mxu3  ;;  %1360 = vmatpush.bf16.msra.mxu3 %v2849_v15 }
 0x1e7   :  { %v825_v21 = vadd.f32 %v2486_v17, %v806_v19  ;;  %v826_v22 = vadd.f32 %v2487_v18, %v819_v20  ;;  %v782_v23 = vpop.f32.mrf.mxu0  ;;  %v795_v24 = vpop.f32.mrf.mxu1  ;;  %v3428_v17 = vld [vmem:[#allocation2 + $0x8c] sm:$0xf0]  ;;  %v3426_v18 = vld [vmem:[#allocation2 + $0x84] sm:$0xf]  ;;  %v2822_v20 = vld [vmem:[#allocation2 + $0x90] sm:$0xf0] }
 0x1e8   :  { %v2821_v19 = vor.u32 %v3428_v17, %v2820_v16  ;;  %v2825_v23 = vor.u32 %v3426_v18, %v2822_v20 }
 0x1e9   :  { %3566 = vtanh.f32 %v825_v21  ;;  %v836_v25 = vmul.f32 0.5, %v826_v22  ;;  %v2828_v21 = vld [vmem:[#allocation2 + $0x88] sm:$0xf]  ;;  %v3429_v22 = vld [vmem:[#allocation2 + $0x94] sm:$0xf0] }
 0x1ea   :  { %v3563_v26 = vpop.eup %3562  ;;  %v2829_v24 = vor.u32 %v3429_v22, %v2828_v21  ;;  %1335 = vmatpush.bf16.msra.mxu1 %v2825_v23  ;;  %v2619_v21 = vld [vmem:[%s3814_s0 + $0x70] sm:$0xff]  ;;  %v2620_v22 = vld [vmem:[%s3814_s0 + $0x78] sm:$0xff] }
 0x1eb   :  { %v3565_v27 = vpop.eup %3564  ;;  %v829_v28 = vmul.f32 0.5, %v3563_v26  ;;  %3568 = vtanh.f32 %v836_v25  ;;  %v3427_v25 = vld [vmem:[#allocation2 + $0x8c] sm:$0xf]  ;;  %v2830_v26 = vld [vmem:[#allocation2 + $0x98] sm:$0xf0] }
 0x1ec   :  { %v833_v29 = vmul.f32 0.5, %v3565_v27  ;;  %v2833_v27 = vor.u32 %v3427_v25, %v2830_v26  ;;  %1348 = vmatpush.bf16.msra.mxu2 %v2829_v24 }
 0x1ed   :  { %v830_v31 = vadd.f32 0.5, %v829_v28  ;;  %v2804_v28 = vld [vmem:[#allocation2 + $0x60] sm:$0xf] }
 0x1ee   :  { %v834_v32 = vadd.f32 0.5, %v833_v29  ;;  %v808_v33 = vpop.f32.mrf.mxu2  ;;  %v821_v34 = vpop.f32.mrf.mxu3  ;;  %v3424_v29 = vld [vmem:[#allocation2 + $0x6c] sm:$0xf0]  ;;  %1361 = vmatpush.bf16.msra.mxu3 %v2833_v27 }
 0x1ef   :  { %v3567_v36 = vpop.eup %3566  ;;  %v2806_v33 = vld [vmem:[#allocation2 + $0x70] sm:$0xf0]  ;;  %v2812_v34 = vld [vmem:[#allocation2 + $0x68] sm:$0xf] }
 0x1f0   :  { %v840_v37 = vmul.f32 %v834_v32, %v3701_v35  ;;  %v841_v38 = vmul.f32 %v3567_v36, %v830_v31  ;;  %v2868_v35 = vld [vmem:[#allocation2 + $0xe0] sm:$0xf]  ;;  %v3422_v31 = vld [vmem:[#allocation2 + $0x64] sm:$0xf]  ;;  %v2805_v32 = vor.u32 %v3424_v29, %v2804_v28  ;;  %v3425_v36 = vld [vmem:[#allocation2 + $0x74] sm:$0xf0] }
 0x1f1   :  { %v3569_v39 = vpop.eup %3568  ;;  %v2869_v47 = vor.u32 %v3440_v45, %v2868_v35  ;;  %v2790_v45 = vld [vmem:[#allocation2 + $0x50] sm:$0xf0] }
 0x1f2   :  { %v3720_v40 = vadd.f32 %v841_v38, %v840_v37  ;;  %v838_v30 = vmul.f32 0.5, %v3569_v39  ;;  %v2809_v37 = vor.u32 %v3422_v31, %v2806_v33  ;;  %v2813_v38 = vor.u32 %v3425_v36, %v2812_v34  ;;  %v3423_v39 = vld [vmem:[#allocation2 + $0x6c] sm:$0xf] }
 0x1f3   :  { %1319 = vmatpush.bf16.msra.mxu0 %v2869_v47  ;;  %v3421_v47 = vld [vmem:[#allocation2 + $0x54] sm:$0xf0] }
 0x1f4   :  { %3570 = vtanh.f32 %v3720_v40  ;;  %v839_v41 = vadd.f32 0.5, %v838_v30  ;;  %v2814_v30 = vld [vmem:[#allocation2 + $0x78] sm:$0xf0]  ;;  %1336 = vmatpush.bf16.msra.mxu1 %v2809_v37  ;;  %1349 = vmatpush.bf16.msra.mxu2 %v2813_v38  ;;  %v2797_v49 = vor.u32 %v3421_v47, %v2796_v46 }
 0x1f7   :  { %1320 = vmatpush.bf16.msra.mxu0 %v2853_v59  ;;  %v3417_v59 = vld [vmem:[#allocation2 + $0x34] sm:$0xf0] }
 0x1f8   :  { %1350 = vmatpush.bf16.msra.mxu2 %v2797_v49  ;;  %v2781_v61 = vor.u32 %v3417_v59, %v2780_v58  ;;  %v3472_v49 = vld [vmem:[#allocation2 + $0xec] sm:$0xf0]  ;;  %v3011_v58 = vld [vmem:[#allocation2 + $0xf8] sm:$0xf0] }
 0x1f9   :  { %v3014_v59 = vor.u32 %v3471_v57, %v3011_v58  ;;  %v2905_v57 = vld [vmem:[#allocation2 + $0x20] sm:$0xf]  ;;  %v3448_v58 = vld [vmem:[#allocation2 + $0x2c] sm:$0xf0] }
 0x1fa   :  { %v3571_v42 = vpop.eup %3570 }
 0x1fb   :  { %v844_v43 = vmul.f32 %v3571_v42, %v839_v41  ;;  %1321 = vmatpush.bf16.msra.mxu0 %v2837_v7  ;;  %v2817_v41 = vor.u32 %v3423_v39, %v2814_v30  ;;  %v2788_v42 = vld [vmem:[#allocation2 + $0x40] sm:$0xf]  ;;  %v3413_v7 = vld [vmem:[#allocation2 + $0x14] sm:$0xf0] }
 0x1fc   :  { %1351 = vmatpush.bf16.msra.mxu2 %v2781_v61  ;;  %v2765_v9 = vor.u32 %v3413_v7, %v2764_v6  ;;  %v3468_v61 = vld [vmem:[#allocation2 + $0xcc] sm:$0xf0]  ;;  %v2995_v6 = vld [vmem:[#allocation2 + $0xd8] sm:$0xf0] }
 0x1fd   :  { %v845_v44 = vpack.c.bf16 %v844_v43, %v844_v43  ;;  %v3420_v43 = vld [vmem:[#allocation2 + $0x4c] sm:$0xf0]  ;;  %1362 = vmatpush.bf16.msra.mxu3 %v2817_v41  ;;  %v2998_v7 = vor.u32 %v3467_v5, %v2995_v6  ;;  %v2889_v5 = vld [vmem:[#allocation2] sm:$0xf] }
 0x1fe   :  { %v2789_v35 = vor.u32 %v3420_v43, %v2788_v42  ;;  %v3444_v6 = vld [vmem:[#allocation2 + $0xc] sm:$0xf0] }
 0x1ff   :  { %2616 = vst [vmem:[%s3816_s2 + $0x8] sm:$0xf] %v845_v44  ;;  %1053 = vmatmul.bf16.vlgmr.msrb.gmra.mxu0 %v845_v44  ;;  %1066 = vmatmul.bf16.vlgmr.msrb.gmra.mxu1 %v845_v44 }
 0x200   :  { %1079 = vmatmul.bf16.vlgmr.msrb.gmra.mxu2 %v845_v44  ;;  %1092 = vmatmul.bf16.vlgmr.msrb.gmra.mxu3 %v845_v44  ;;  %v3418_v44 = vld [vmem:[#allocation2 + $0x44] sm:$0xf] }
 0x201   :  { %1322 = vmatpush.bf16.msra.mxu0 %v2821_v19  ;;  %v2793_v48 = vor.u32 %v3418_v44, %v2790_v45  ;;  %1363 = vmatpush.bf16.msra.mxu3 %v2801_v52  ;;  %v3003_v52 = vld [vmem:[#allocation2 + $0xf0] sm:$0xf0] }
 0x202   :  { %1352 = vmatpush.bf16.msra.mxu2 %v2765_v9  ;;  %v3006_v55 = vor.u32 %v3470_v50, %v3003_v52  ;;  %v3464_v9 = vld [vmem:[#allocation2 + $0xac] sm:$0xf0]  ;;  %v2929_v50 = vld [vmem:[#allocation2 + $0x48] sm:$0xf] }
 0x203   :  { %1337 = vmatpush.bf16.msra.mxu1 %v2793_v48 }
 0x205   :  { %1323 = vmatpush.bf16.msra.mxu0 %v2805_v32  ;;  %1364 = vmatpush.bf16.msra.mxu3 %v2785_v0  ;;  %v2987_v0 = vld [vmem:[#allocation2 + $0xd0] sm:$0xf0] }
 0x206   :  { %v2990_v3 = vor.u32 %v3466_v62, %v2987_v0  ;;  %v2913_v62 = vld [vmem:[#allocation2 + $0x28] sm:$0xf] }
 0x207   :  { %1338 = vmatpush.bf16.msra.mxu1 %v2777_v60  ;;  %v2985_v60 = vld [vmem:[#allocation2 + $0xc0] sm:$0xf] }
 0x208   :  { %v2986_v63 = vor.u32 %v3468_v61, %v2985_v60  ;;  %v2906_v60 = vor.u32 %v3448_v58, %v2905_v57  ;;  %v2907_v61 = vld [vmem:[#allocation2 + $0x30] sm:$0xf0]  ;;  %v3142_v57 = vld [vmem:[#allocation2 + $0xe8] sm:$0xf]  ;;  %v3505_v58 = vld [vmem:[#allocation2 + $0xf4] sm:$0xf0] }
 0x209   :  { %1324 = vmatpush.bf16.msra.mxu0 %v2789_v35  ;;  %1365 = vmatpush.bf16.msra.mxu3 %v2769_v12  ;;  %v2971_v12 = vld [vmem:[#allocation2 + $0xb0] sm:$0xf0] }
 0x20b   :  { %1339 = vmatpush.bf16.msra.mxu1 %v2761_v8  ;;  %v2969_v8 = vld [vmem:[#allocation2 + $0xa0] sm:$0xf] }
 0x20c   :  { %v2970_v11 = vor.u32 %v3464_v9, %v2969_v8  ;;  %v2890_v8 = vor.u32 %v3444_v6, %v2889_v5  ;;  %v2891_v9 = vld [vmem:[#allocation2 + $0x10] sm:$0xf0]  ;;  %v3126_v5 = vld [vmem:[#allocation2 + $0xc8] sm:$0xf]  ;;  %v3501_v6 = vld [vmem:[#allocation2 + $0xd4] sm:$0xf0] }
 0x20d   :  { %1325 = vmatpush.bf16.msra.mxu0 %v2773_v56  ;;  %v3010_v56 = vor.u32 %v3473_v54, %v3009_v53  ;;  %1632 = vmatpush.bf16.msrb.mxu3 %v3014_v59  ;;  %v3451_v54 = vld [vmem:[#allocation2 + $0x4c] sm:$0xf]  ;;  %v3446_v59 = vld [vmem:[#allocation2 + $0x24] sm:$0xf] }
 0x20e   :  { %v2910_v0 = vor.u32 %v3446_v59, %v2907_v61  ;;  %v3503_v61 = vld [vmem:[#allocation2 + $0xec] sm:$0xf] }
 0x20f   :  { %1606 = vmatpush.bf16.msrb.mxu1 %v3006_v55  ;;  %1619 = vmatpush.bf16.msrb.mxu2 %v3010_v56  ;;  %v2931_v55 = vld [vmem:[#allocation2 + $0x58] sm:$0xf0] }
 0x210   :  { %v2934_v56 = vor.u32 %v3451_v54, %v2931_v55  ;;  %v3502_v54 = vld [vmem:[#allocation2 + $0xe4] sm:$0xf] }
 0x211   :  { %1326 = vmatpush.bf16.msra.mxu0 %v2757_v4  ;;  %v2994_v4 = vor.u32 %v3469_v2, %v2993_v1  ;;  %1633 = vmatpush.bf16.msrb.mxu3 %v2998_v7  ;;  %v3447_v2 = vld [vmem:[#allocation2 + $0x2c] sm:$0xf]  ;;  %v3442_v7 = vld [vmem:[#allocation2 + $0x4] sm:$0xf] }
 0x213   :  { %1607 = vmatpush.bf16.msrb.mxu1 %v2990_v3  ;;  %1620 = vmatpush.bf16.msrb.mxu2 %v2994_v4  ;;  %v2915_v3 = vld [vmem:[#allocation2 + $0x38] sm:$0xf0] }
 0x214   :  { %v2918_v4 = vor.u32 %v3447_v2, %v2915_v3  ;;  %v3498_v2 = vld [vmem:[#allocation2 + $0xc4] sm:$0xf] }
 0x27c   :  { %v1054_v15 = vpop.f32.mrf.mxu0  ;;  %v1067_v16 = vpop.f32.mrf.mxu1 }
 0x27d   :  { %v1097_v17 = vadd.f32 %v2617_v13, %v1054_v15  ;;  %v1098_v18 = vadd.f32 %v2618_v14, %v1067_v16  ;;  %v2974_v13 = vor.u32 %v3462_v10, %v2971_v12  ;;  %v2977_v14 = vld [vmem:[#allocation2 + $0xa8] sm:$0xf]  ;;  %v3465_v15 = vld [vmem:[#allocation2 + $0xb4] sm:$0xf0]  ;;  %v3463_v16 = vld [vmem:[#allocation2 + $0xac] sm:$0xf]  ;;  %v2894_v12 = vor.u32 %v3442_v7, %v2891_v9 }
 0x27e   :  { %v2897_v10 = vld [vmem:[#allocation2 + $0x8] sm:$0xf]  ;;  %v3499_v9 = vld [vmem:[#allocation2 + $0xcc] sm:$0xf] }
 0x27f   :  { %v1101_v19 = vmul.f32 0.5, %v1097_v17  ;;  %v1105_v20 = vmul.f32 0.5, %v1098_v18  ;;  %v2978_v17 = vor.u32 %v3465_v15, %v2977_v14  ;;  %v2979_v18 = vld [vmem:[#allocation2 + $0xb8] sm:$0xf0]  ;;  %1608 = vmatpush.bf16.msrb.mxu1 %v2974_v13  ;;  %v3443_v14 = vld [vmem:[#allocation2 + $0xc] sm:$0xf] }
 0x280   :  { %v2899_v15 = vld [vmem:[#allocation2 + $0x18] sm:$0xf0] }
 0x281   :  { %3572 = vtanh.f32 %v1101_v19  ;;  %v2982_v19 = vor.u32 %v3463_v16, %v2979_v18  ;;  %1621 = vmatpush.bf16.msrb.mxu2 %v2978_v17  ;;  %v2902_v16 = vor.u32 %v3443_v14, %v2899_v15  ;;  %v2750_v17 = vld [vmem:[%s3814_s0 + $0x80] sm:$0xff]  ;;  %v2751_v18 = vld [vmem:[%s3814_s0 + $0x88] sm:$0xff] }
 0x282   :  { %3574 = vtanh.f32 %v1105_v20  ;;  %v2953_v20 = vld [vmem:[#allocation2 + $0x80] sm:$0xf]  ;;  %v3494_v14 = vld [vmem:[#allocation2 + $0xa4] sm:$0xf] }
 0x283   :  { %v1080_v23 = vpop.f32.mrf.mxu2  ;;  %v1093_v24 = vpop.f32.mrf.mxu3  ;;  %1634 = vmatpush.bf16.msrb.mxu3 %v2982_v19 }
 0x284   :  { %v1099_v25 = vadd.f32 %v2619_v21, %v1080_v23  ;;  %v1100_v26 = vadd.f32 %v2620_v22, %v1093_v24  ;;  %v1056_v27 = vpop.f32.mrf.mxu0  ;;  %v1069_v28 = vpop.f32.mrf.mxu1  ;;  %v3460_v21 = vld [vmem:[#allocation2 + $0x8c] sm:$0xf0]  ;;  %v3458_v22 = vld [vmem:[#allocation2 + $0x84] sm:$0xf]  ;;  %v2955_v24 = vld [vmem:[#allocation2 + $0x90] sm:$0xf0] }
 0x285   :  { %v2954_v23 = vor.u32 %v3460_v21, %v2953_v20  ;;  %v2958_v27 = vor.u32 %v3458_v22, %v2955_v24 }
 0x286   :  { %3576 = vtanh.f32 %v1099_v25  ;;  %v1110_v29 = vmul.f32 0.5, %v1100_v26  ;;  %v2961_v25 = vld [vmem:[#allocation2 + $0x88] sm:$0xf]  ;;  %v3461_v26 = vld [vmem:[#allocation2 + $0x94] sm:$0xf0] }
 0x287   :  { %v3573_v31 = vpop.eup %3572  ;;  %v2962_v28 = vor.u32 %v3461_v26, %v2961_v25  ;;  %1609 = vmatpush.bf16.msrb.mxu1 %v2958_v27  ;;  %v2752_v25 = vld [vmem:[%s3814_s0 + $0x90] sm:$0xff]  ;;  %v2753_v26 = vld [vmem:[%s3814_s0 + $0x98] sm:$0xff] }
 0x288   :  { %v3575_v32 = vpop.eup %3574  ;;  %v1103_v33 = vmul.f32 0.5, %v3573_v31  ;;  %3578 = vtanh.f32 %v1110_v29  ;;  %v3459_v29 = vld [vmem:[#allocation2 + $0x8c] sm:$0xf]  ;;  %v2963_v31 = vld [vmem:[#allocation2 + $0x98] sm:$0xf0] }
 0x289   :  { %v1107_v34 = vmul.f32 0.5, %v3575_v32  ;;  %v2966_v32 = vor.u32 %v3459_v29, %v2963_v31  ;;  %1622 = vmatpush.bf16.msrb.mxu2 %v2962_v28 }
 0x28a   :  { %v1104_v36 = vadd.f32 0.5, %v1103_v33  ;;  %v2937_v33 = vld [vmem:[#allocation2 + $0x60] sm:$0xf] }
 0x28b   :  { %v1108_v37 = vadd.f32 0.5, %v1107_v34  ;;  %v1082_v38 = vpop.f32.mrf.mxu2  ;;  %v1095_v39 = vpop.f32.mrf.mxu3  ;;  %v3456_v34 = vld [vmem:[#allocation2 + $0x6c] sm:$0xf0]  ;;  %1635 = vmatpush.bf16.msrb.mxu3 %v2966_v32 }
 0x28c   :  { %v3577_v30 = vpop.eup %3576  ;;  %v2939_v38 = vld [vmem:[#allocation2 + $0x70] sm:$0xf0]  ;;  %v2945_v39 = vld [vmem:[#allocation2 + $0x68] sm:$0xf] }
 0x28d   :  { %v1114_v41 = vmul.f32 %v1108_v37, %v3720_v40  ;;  %v1115_v42 = vmul.f32 %v3577_v30, %v1104_v36  ;;  %v3001_v40 = vld [vmem:[#allocation2 + $0xe0] sm:$0xf]  ;;  %v3454_v36 = vld [vmem:[#allocation2 + $0x64] sm:$0xf]  ;;  %v2938_v37 = vor.u32 %v3456_v34, %v2937_v33  ;;  %v3457_v30 = vld [vmem:[#allocation2 + $0x74] sm:$0xf0] }
 0x28e   :  { %v3579_v43 = vpop.eup %3578  ;;  %v3002_v51 = vor.u32 %v3472_v49, %v3001_v40  ;;  %v2923_v49 = vld [vmem:[#allocation2 + $0x50] sm:$0xf0] }
 0x28f   :  { %v3739_v44 = vadd.f32 %v1115_v42, %v1114_v41  ;;  %v1112_v35 = vmul.f32 0.5, %v3579_v43  ;;  %v2942_v41 = vor.u32 %v3454_v36, %v2939_v38  ;;  %v2946_v42 = vor.u32 %v3457_v30, %v2945_v39  ;;  %v3455_v43 = vld [vmem:[#allocation2 + $0x6c] sm:$0xf] }
 0x290   :  { %1593 = vmatpush.bf16.msrb.mxu0 %v3002_v51  ;;  %v3453_v51 = vld [vmem:[#allocation2 + $0x54] sm:$0xf0] }
 0x291   :  { %3580 = vtanh.f32 %v3739_v44  ;;  %v1113_v45 = vadd.f32 0.5, %v1112_v35  ;;  %v2947_v35 = vld [vmem:[#allocation2 + $0x78] sm:$0xf0]  ;;  %1610 = vmatpush.bf16.msrb.mxu1 %v2942_v41  ;;  %1623 = vmatpush.bf16.msrb.mxu2 %v2946_v42  ;;  %v2930_v53 = vor.u32 %v3453_v51, %v2929_v50 }
 0x294   :  { %1594 = vmatpush.bf16.msrb.mxu0 %v2986_v63  ;;  %v3449_v63 = vld [vmem:[#allocation2 + $0x34] sm:$0xf0] }
 0x295   :  { %1624 = vmatpush.bf16.msrb.mxu2 %v2930_v53  ;;  %v2914_v1 = vor.u32 %v3449_v63, %v2913_v62  ;;  %v3504_v53 = vld [vmem:[#allocation2 + $0xec] sm:$0xf0]  ;;  %v3144_v62 = vld [vmem:[#allocation2 + $0xf8] sm:$0xf0] }
 0x296   :  { %v3147_v63 = vor.u32 %v3503_v61, %v3144_v62  ;;  %v3038_v61 = vld [vmem:[#allocation2 + $0x20] sm:$0xf]  ;;  %v3480_v62 = vld [vmem:[#allocation2 + $0x2c] sm:$0xf0] }
 0x297   :  { %v3581_v46 = vpop.eup %3580 }
 0x298   :  { %v1118_v47 = vmul.f32 %v3581_v46, %v1113_v45  ;;  %1595 = vmatpush.bf16.msrb.mxu0 %v2970_v11  ;;  %v2950_v45 = vor.u32 %v3455_v43, %v2947_v35  ;;  %v2921_v46 = vld [vmem:[#allocation2 + $0x40] sm:$0xf]  ;;  %v3445_v11 = vld [vmem:[#allocation2 + $0x14] sm:$0xf0] }
 0x299   :  { %1625 = vmatpush.bf16.msrb.mxu2 %v2914_v1  ;;  %v2898_v13 = vor.u32 %v3445_v11, %v2897_v10  ;;  %v3500_v1 = vld [vmem:[#allocation2 + $0xcc] sm:$0xf0]  ;;  %v3128_v10 = vld [vmem:[#allocation2 + $0xd8] sm:$0xf0] }
 0x29a   :  { %v1119_v48 = vpack.c.bf16 %v1118_v47, %v1118_v47  ;;  %v3452_v47 = vld [vmem:[#allocation2 + $0x4c] sm:$0xf0]  ;;  %1636 = vmatpush.bf16.msrb.mxu3 %v2950_v45  ;;  %v3131_v11 = vor.u32 %v3499_v9, %v3128_v10  ;;  %v3022_v9 = vld [vmem:[#allocation2] sm:$0xf] }
 0x29b   :  { %v2922_v40 = vor.u32 %v3452_v47, %v2921_v46  ;;  %v3476_v10 = vld [vmem:[#allocation2 + $0xc] sm:$0xf0] }
 0x29c   :  { %2749 = vst [vmem:[%s3816_s2 + $0xc] sm:$0xf] %v1119_v48  ;;  %1327 = vmatmul.bf16.vlgmr.msra.gmra.mxu0 %v1119_v48  ;;  %1340 = vmatmul.bf16.vlgmr.msra.gmra.mxu1 %v1119_v48 }
 0x29d   :  { %1353 = vmatmul.bf16.vlgmr.msra.gmra.mxu2 %v1119_v48  ;;  %1366 = vmatmul.bf16.vlgmr.msra.gmra.mxu3 %v1119_v48  ;;  %v3450_v48 = vld [vmem:[#allocation2 + $0x44] sm:$0xf] }
 0x29e   :  { %1596 = vmatpush.bf16.msrb.mxu0 %v2954_v23  ;;  %v2926_v52 = vor.u32 %v3450_v48, %v2923_v49  ;;  %1637 = vmatpush.bf16.msrb.mxu3 %v2934_v56  ;;  %v3136_v56 = vld [vmem:[#allocation2 + $0xf0] sm:$0xf0] }
 0x29f   :  { %1626 = vmatpush.bf16.msrb.mxu2 %v2898_v13  ;;  %v3139_v59 = vor.u32 %v3502_v54, %v3136_v56  ;;  %v3496_v13 = vld [vmem:[#allocation2 + $0xac] sm:$0xf0]  ;;  %v3062_v54 = vld [vmem:[#allocation2 + $0x48] sm:$0xf] }
 0x2a0   :  { %1611 = vmatpush.bf16.msrb.mxu1 %v2926_v52 }
 0x2a2   :  { %1597 = vmatpush.bf16.msrb.mxu0 %v2938_v37  ;;  %1638 = vmatpush.bf16.msrb.mxu3 %v2918_v4  ;;  %v3120_v4 = vld [vmem:[#allocation2 + $0xd0] sm:$0xf0] }
 0x2a3   :  { %v3123_v7 = vor.u32 %v3498_v2, %v3120_v4  ;;  %v3046_v2 = vld [vmem:[#allocation2 + $0x28] sm:$0xf] }
 0x2a4   :  { %1612 = vmatpush.bf16.msrb.mxu1 %v2910_v0  ;;  %v3118_v0 = vld [vmem:[#allocation2 + $0xc0] sm:$0xf] }
 0x2a5   :  { %v3119_v3 = vor.u32 %v3500_v1, %v3118_v0  ;;  %v3039_v0 = vor.u32 %v3480_v62, %v3038_v61  ;;  %v3040_v1 = vld [vmem:[#allocation2 + $0x30] sm:$0xf0]  ;;  %v3275_v61 = vld [vmem:[#allocation2 + $0xe8] sm:$0xf]  ;;  %v3537_v62 = vld [vmem:[#allocation2 + $0xf4] sm:$0xf0] }
 0x2a6   :  { %1598 = vmatpush.bf16.msrb.mxu0 %v2922_v40  ;;  %1639 = vmatpush.bf16.msrb.mxu3 %v2902_v16  ;;  %v3104_v16 = vld [vmem:[#allocation2 + $0xb0] sm:$0xf0] }
 0x2a8   :  { %1613 = vmatpush.bf16.msrb.mxu1 %v2894_v12  ;;  %v3102_v12 = vld [vmem:[#allocation2 + $0xa0] sm:$0xf] }
 0x2a9   :  { %v3103_v15 = vor.u32 %v3496_v13, %v3102_v12  ;;  %v3023_v12 = vor.u32 %v3476_v10, %v3022_v9  ;;  %v3024_v13 = vld [vmem:[#allocation2 + $0x10] sm:$0xf0]  ;;  %v3259_v9 = vld [vmem:[#allocation2 + $0xc8] sm:$0xf]  ;;  %v3533_v10 = vld [vmem:[#allocation2 + $0xd4] sm:$0xf0] }
 0x2aa   :  { %1599 = vmatpush.bf16.msrb.mxu0 %v2906_v60  ;;  %v3143_v60 = vor.u32 %v3505_v58, %v3142_v57  ;;  %1906 = vmatpush.bf16.msra.mxu3 %v3147_v63  ;;  %v3483_v58 = vld [vmem:[#allocation2 + $0x4c] sm:$0xf]  ;;  %v3478_v63 = vld [vmem:[#allocation2 + $0x24] sm:$0xf] }
 0x2ab   :  { %v3043_v4 = vor.u32 %v3478_v63, %v3040_v1  ;;  %v3535_v1 = vld [vmem:[#allocation2 + $0xec] sm:$0xf] }
 0x2ac   :  { %1880 = vmatpush.bf16.msra.mxu1 %v3139_v59  ;;  %1893 = vmatpush.bf16.msra.mxu2 %v3143_v60  ;;  %v3064_v59 = vld [vmem:[#allocation2 + $0x58] sm:$0xf0] }
 0x2ad   :  { %v3067_v60 = vor.u32 %v3483_v58, %v3064_v59  ;;  %v3534_v58 = vld [vmem:[#allocation2 + $0xe4] sm:$0xf] }
 0x2ae   :  { %1600 = vmatpush.bf16.msrb.mxu0 %v2890_v8  ;;  %v3127_v8 = vor.u32 %v3501_v6, %v3126_v5  ;;  %1907 = vmatpush.bf16.msra.mxu3 %v3131_v11  ;;  %v3479_v6 = vld [vmem:[#allocation2 + $0x2c] sm:$0xf]  ;;  %v3474_v11 = vld [vmem:[#allocation2 + $0x4] sm:$0xf] }
 0x2b0   :  { %1881 = vmatpush.bf16.msra.mxu1 %v3123_v7  ;;  %1894 = vmatpush.bf16.msra.mxu2 %v3127_v8  ;;  %v3048_v7 = vld [vmem:[#allocation2 + $0x38] sm:$0xf0] }
 0x2b1   :  { %v3051_v8 = vor.u32 %v3479_v6, %v3048_v7  ;;  %v3530_v6 = vld [vmem:[#allocation2 + $0xc4] sm:$0xf] }
 0x319   :  { %v1328_v19 = vpop.f32.mrf.mxu0  ;;  %v1341_v20 = vpop.f32.mrf.mxu1 }
 0x31a   :  { %v1371_v21 = vadd.f32 %v2750_v17, %v1328_v19  ;;  %v1372_v22 = vadd.f32 %v2751_v18, %v1341_v20  ;;  %v3107_v17 = vor.u32 %v3494_v14, %v3104_v16  ;;  %v3110_v18 = vld [vmem:[#allocation2 + $0xa8] sm:$0xf]  ;;  %v3497_v19 = vld [vmem:[#allocation2 + $0xb4] sm:$0xf0]  ;;  %v3495_v20 = vld [vmem:[#allocation2 + $0xac] sm:$0xf]  ;;  %v3027_v16 = vor.u32 %v3474_v11, %v3024_v13 }
 0x31b   :  { %v3030_v14 = vld [vmem:[#allocation2 + $0x8] sm:$0xf]  ;;  %v3531_v13 = vld [vmem:[#allocation2 + $0xcc] sm:$0xf] }
 0x31c   :  { %v1375_v23 = vmul.f32 0.5, %v1371_v21  ;;  %v1379_v24 = vmul.f32 0.5, %v1372_v22  ;;  %v3111_v21 = vor.u32 %v3497_v19, %v3110_v18  ;;  %v3112_v22 = vld [vmem:[#allocation2 + $0xb8] sm:$0xf0]  ;;  %1882 = vmatpush.bf16.msra.mxu1 %v3107_v17  ;;  %v3475_v18 = vld [vmem:[#allocation2 + $0xc] sm:$0xf] }
 0x31d   :  { %v3032_v19 = vld [vmem:[#allocation2 + $0x18] sm:$0xf0] }
 0x31e   :  { %3582 = vtanh.f32 %v1375_v23  ;;  %v3115_v23 = vor.u32 %v3495_v20, %v3112_v22  ;;  %1895 = vmatpush.bf16.msra.mxu2 %v3111_v21  ;;  %v3035_v20 = vor.u32 %v3475_v18, %v3032_v19  ;;  %v2883_v21 = vld [vmem:[%s3814_s0 + $0xa0] sm:$0xff]  ;;  %v2884_v22 = vld [vmem:[%s3814_s0 + $0xa8] sm:$0xff] }
 0x31f   :  { %3584 = vtanh.f32 %v1379_v24  ;;  %v3086_v24 = vld [vmem:[#allocation2 + $0x80] sm:$0xf]  ;;  %v3526_v18 = vld [vmem:[#allocation2 + $0xa4] sm:$0xf] }
 0x320   :  { %v1354_v27 = vpop.f32.mrf.mxu2  ;;  %v1367_v28 = vpop.f32.mrf.mxu3  ;;  %1908 = vmatpush.bf16.msra.mxu3 %v3115_v23 }
 0x321   :  { %v1373_v29 = vadd.f32 %v2752_v25, %v1354_v27  ;;  %v1374_v31 = vadd.f32 %v2753_v26, %v1367_v28  ;;  %v1330_v32 = vpop.f32.mrf.mxu0  ;;  %v1343_v33 = vpop.f32.mrf.mxu1  ;;  %v3492_v25 = vld [vmem:[#allocation2 + $0x8c] sm:$0xf0]  ;;  %v3490_v26 = vld [vmem:[#allocation2 + $0x84] sm:$0xf]  ;;  %v3088_v28 = vld [vmem:[#allocation2 + $0x90] sm:$0xf0] }
 0x322   :  { %v3087_v27 = vor.u32 %v3492_v25, %v3086_v24  ;;  %v3091_v32 = vor.u32 %v3490_v26, %v3088_v28 }
 0x323   :  { %3586 = vtanh.f32 %v1373_v29  ;;  %v1384_v34 = vmul.f32 0.5, %v1374_v31  ;;  %v3094_v29 = vld [vmem:[#allocation2 + $0x88] sm:$0xf]  ;;  %v3493_v31 = vld [vmem:[#allocation2 + $0x94] sm:$0xf0] }
 0x324   :  { %v3583_v36 = vpop.eup %3582  ;;  %v3095_v33 = vor.u32 %v3493_v31, %v3094_v29  ;;  %1883 = vmatpush.bf16.msra.mxu1 %v3091_v32  ;;  %v2885_v29 = vld [vmem:[%s3814_s0 + $0xb0] sm:$0xff]  ;;  %v2886_v31 = vld [vmem:[%s3814_s0 + $0xb8] sm:$0xff] }
 0x325   :  { %v3585_v37 = vpop.eup %3584  ;;  %v1377_v38 = vmul.f32 0.5, %v3583_v36  ;;  %3588 = vtanh.f32 %v1384_v34  ;;  %v3491_v34 = vld [vmem:[#allocation2 + $0x8c] sm:$0xf]  ;;  %v3096_v36 = vld [vmem:[#allocation2 + $0x98] sm:$0xf0] }
 0x326   :  { %v1381_v39 = vmul.f32 0.5, %v3585_v37  ;;  %v3099_v37 = vor.u32 %v3491_v34, %v3096_v36  ;;  %1896 = vmatpush.bf16.msra.mxu2 %v3095_v33 }
 0x327   :  { %v1378_v30 = vadd.f32 0.5, %v1377_v38  ;;  %v3070_v38 = vld [vmem:[#allocation2 + $0x60] sm:$0xf] }
 0x328   :  { %v1382_v41 = vadd.f32 0.5, %v1381_v39  ;;  %v1356_v42 = vpop.f32.mrf.mxu2  ;;  %v1369_v43 = vpop.f32.mrf.mxu3  ;;  %v3488_v39 = vld [vmem:[#allocation2 + $0x6c] sm:$0xf0]  ;;  %1909 = vmatpush.bf16.msra.mxu3 %v3099_v37 }
 0x329   :  { %v3587_v35 = vpop.eup %3586  ;;  %v3072_v42 = vld [vmem:[#allocation2 + $0x70] sm:$0xf0]  ;;  %v3078_v43 = vld [vmem:[#allocation2 + $0x68] sm:$0xf] }
 0x32a   :  { %v1388_v45 = vmul.f32 %v1382_v41, %v3739_v44  ;;  %v1389_v46 = vmul.f32 %v3587_v35, %v1378_v30  ;;  %v3134_v44 = vld [vmem:[#allocation2 + $0xe0] sm:$0xf]  ;;  %v3486_v30 = vld [vmem:[#allocation2 + $0x64] sm:$0xf]  ;;  %v3071_v41 = vor.u32 %v3488_v39, %v3070_v38  ;;  %v3489_v35 = vld [vmem:[#allocation2 + $0x74] sm:$0xf0] }
 0x32b   :  { %v3589_v47 = vpop.eup %3588  ;;  %v3135_v55 = vor.u32 %v3504_v53, %v3134_v44  ;;  %v3056_v53 = vld [vmem:[#allocation2 + $0x50] sm:$0xf0] }
 0x32c   :  { %v3758_v48 = vadd.f32 %v1389_v46, %v1388_v45  ;;  %v1386_v40 = vmul.f32 0.5, %v3589_v47  ;;  %v3075_v45 = vor.u32 %v3486_v30, %v3072_v42  ;;  %v3079_v46 = vor.u32 %v3489_v35, %v3078_v43  ;;  %v3487_v47 = vld [vmem:[#allocation2 + $0x6c] sm:$0xf] }
 0x32d   :  { %1867 = vmatpush.bf16.msra.mxu0 %v3135_v55  ;;  %v3485_v55 = vld [vmem:[#allocation2 + $0x54] sm:$0xf0] }
 0x32e   :  { %3590 = vtanh.f32 %v3758_v48  ;;  %v1387_v49 = vadd.f32 0.5, %v1386_v40  ;;  %v3080_v40 = vld [vmem:[#allocation2 + $0x78] sm:$0xf0]  ;;  %1884 = vmatpush.bf16.msra.mxu1 %v3075_v45  ;;  %1897 = vmatpush.bf16.msra.mxu2 %v3079_v46  ;;  %v3063_v57 = vor.u32 %v3485_v55, %v3062_v54 }
 0x331   :  { %1868 = vmatpush.bf16.msra.mxu0 %v3119_v3  ;;  %v3481_v3 = vld [vmem:[#allocation2 + $0x34] sm:$0xf0] }
 0x332   :  { %1898 = vmatpush.bf16.msra.mxu2 %v3063_v57  ;;  %v3047_v5 = vor.u32 %v3481_v3, %v3046_v2  ;;  %v3536_v57 = vld [vmem:[#allocation2 + $0xec] sm:$0xf0]  ;;  %v3277_v2 = vld [vmem:[#allocation2 + $0xf8] sm:$0xf0] }
 0x333   :  { %v3280_v3 = vor.u32 %v3535_v1, %v3277_v2  ;;  %v3171_v1 = vld [vmem:[#allocation2 + $0x20] sm:$0xf]  ;;  %v3512_v2 = vld [vmem:[#allocation2 + $0x2c] sm:$0xf0] }
 0x334   :  { %v3591_v50 = vpop.eup %3590 }
 0x335   :  { %v1392_v51 = vmul.f32 %v3591_v50, %v1387_v49  ;;  %1869 = vmatpush.bf16.msra.mxu0 %v3103_v15  ;;  %v3083_v49 = vor.u32 %v3487_v47, %v3080_v40  ;;  %v3054_v50 = vld [vmem:[#allocation2 + $0x40] sm:$0xf]  ;;  %v3477_v15 = vld [vmem:[#allocation2 + $0x14] sm:$0xf0] }
 0x336   :  { %1899 = vmatpush.bf16.msra.mxu2 %v3047_v5  ;;  %v3031_v17 = vor.u32 %v3477_v15, %v3030_v14  ;;  %v3532_v5 = vld [vmem:[#allocation2 + $0xcc] sm:$0xf0]  ;;  %v3261_v14 = vld [vmem:[#allocation2 + $0xd8] sm:$0xf0] }
 0x337   :  { %v1393_v52 = vpack.c.bf16 %v1392_v51, %v1392_v51  ;;  %v3484_v51 = vld [vmem:[#allocation2 + $0x4c] sm:$0xf0]  ;;  %1910 = vmatpush.bf16.msra.mxu3 %v3083_v49  ;;  %v3264_v15 = vor.u32 %v3531_v13, %v3261_v14  ;;  %v3155_v13 = vld [vmem:[#allocation2] sm:$0xf] }
 0x338   :  { %v3055_v44 = vor.u32 %v3484_v51, %v3054_v50  ;;  %v3508_v14 = vld [vmem:[#allocation2 + $0xc] sm:$0xf0] }
 0x339   :  { %2882 = vst [vmem:[%s3816_s2 + $0x10] sm:$0xf] %v1393_v52  ;;  %1601 = vmatmul.bf16.vlgmr.msrb.gmra.mxu0 %v1393_v52  ;;  %1614 = vmatmul.bf16.vlgmr.msrb.gmra.mxu1 %v1393_v52 }
 0x33a   :  { %1627 = vmatmul.bf16.vlgmr.msrb.gmra.mxu2 %v1393_v52  ;;  %1640 = vmatmul.bf16.vlgmr.msrb.gmra.mxu3 %v1393_v52  ;;  %v3482_v52 = vld [vmem:[#allocation2 + $0x44] sm:$0xf] }
 0x33b   :  { %1870 = vmatpush.bf16.msra.mxu0 %v3087_v27  ;;  %v3059_v56 = vor.u32 %v3482_v52, %v3056_v53  ;;  %1911 = vmatpush.bf16.msra.mxu3 %v3067_v60  ;;  %v3269_v60 = vld [vmem:[#allocation2 + $0xf0] sm:$0xf0] }
 0x33c   :  { %1900 = vmatpush.bf16.msra.mxu2 %v3031_v17  ;;  %v3272_v63 = vor.u32 %v3534_v58, %v3269_v60  ;;  %v3528_v17 = vld [vmem:[#allocation2 + $0xac] sm:$0xf0]  ;;  %v3195_v58 = vld [vmem:[#allocation2 + $0x48] sm:$0xf] }
 0x33d   :  { %1885 = vmatpush.bf16.msra.mxu1 %v3059_v56 }
 0x33f   :  { %1871 = vmatpush.bf16.msra.mxu0 %v3071_v41  ;;  %1912 = vmatpush.bf16.msra.mxu3 %v3051_v8  ;;  %v3253_v8 = vld [vmem:[#allocation2 + $0xd0] sm:$0xf0] }
 0x340   :  { %v3256_v11 = vor.u32 %v3530_v6, %v3253_v8  ;;  %v3179_v6 = vld [vmem:[#allocation2 + $0x28] sm:$0xf] }
 0x341   :  { %1886 = vmatpush.bf16.msra.mxu1 %v3043_v4  ;;  %v3251_v4 = vld [vmem:[#allocation2 + $0xc0] sm:$0xf] }
 0x342   :  { %v3252_v7 = vor.u32 %v3532_v5, %v3251_v4  ;;  %v3172_v4 = vor.u32 %v3512_v2, %v3171_v1  ;;  %v3173_v5 = vld [vmem:[#allocation2 + $0x30] sm:$0xf0] }
 0x343   :  { %1872 = vmatpush.bf16.msra.mxu0 %v3055_v44  ;;  %1913 = vmatpush.bf16.msra.mxu3 %v3035_v20  ;;  %v3237_v20 = vld [vmem:[#allocation2 + $0xb0] sm:$0xf0] }
 0x345   :  { %1887 = vmatpush.bf16.msra.mxu1 %v3027_v16  ;;  %v3235_v16 = vld [vmem:[#allocation2 + $0xa0] sm:$0xf] }
 0x346   :  { %v3236_v19 = vor.u32 %v3528_v17, %v3235_v16  ;;  %v3156_v16 = vor.u32 %v3508_v14, %v3155_v13  ;;  %v3157_v17 = vld [vmem:[#allocation2 + $0x10] sm:$0xf0] }
 0x347   :  { %1873 = vmatpush.bf16.msra.mxu0 %v3039_v0  ;;  %v3276_v0 = vor.u32 %v3537_v62, %v3275_v61  ;;  %2180 = vmatpush.bf16.msrb.mxu3 %v3280_v3  ;;  %v3515_v62 = vld [vmem:[#allocation2 + $0x4c] sm:$0xf]  ;;  %v3510_v3 = vld [vmem:[#allocation2 + $0x24] sm:$0xf] }
 0x348   :  { %v3176_v8 = vor.u32 %v3510_v3, %v3173_v5  ;;  %v3152_v5 = vld [vmem:[%s3814_s0 + $0xf8] sm:$0xff] }
 0x349   :  { %2154 = vmatpush.bf16.msrb.mxu1 %v3272_v63  ;;  %2167 = vmatpush.bf16.msrb.mxu2 %v3276_v0  ;;  %v3197_v63 = vld [vmem:[#allocation2 + $0x58] sm:$0xf0] }
 0x34a   :  { %v3200_v0 = vor.u32 %v3515_v62, %v3197_v63 }
 0x34b   :  { %1874 = vmatpush.bf16.msra.mxu0 %v3023_v12  ;;  %v3260_v12 = vor.u32 %v3533_v10, %v3259_v9  ;;  %2181 = vmatpush.bf16.msrb.mxu3 %v3264_v15  ;;  %v3511_v10 = vld [vmem:[#allocation2 + $0x2c] sm:$0xf]  ;;  %v3506_v15 = vld [vmem:[#allocation2 + $0x4] sm:$0xf] }
 0x34d   :  { %2155 = vmatpush.bf16.msrb.mxu1 %v3256_v11  ;;  %2168 = vmatpush.bf16.msrb.mxu2 %v3260_v12  ;;  %v3181_v11 = vld [vmem:[#allocation2 + $0x38] sm:$0xf0] }
 0x34e   :  { %v3184_v12 = vor.u32 %v3511_v10, %v3181_v11 }
 0x3b6   :  { %v1602_v23 = vpop.f32.mrf.mxu0  ;;  %v1615_v24 = vpop.f32.mrf.mxu1 }
 0x3b7   :  { %v1645_v25 = vadd.f32 %v2883_v21, %v1602_v23  ;;  %v1646_v26 = vadd.f32 %v2884_v22, %v1615_v24  ;;  %v3240_v21 = vor.u32 %v3526_v18, %v3237_v20  ;;  %v3243_v22 = vld [vmem:[#allocation2 + $0xa8] sm:$0xf]  ;;  %v3529_v23 = vld [vmem:[#allocation2 + $0xb4] sm:$0xf0]  ;;  %v3527_v24 = vld [vmem:[#allocation2 + $0xac] sm:$0xf]  ;;  %v3160_v20 = vor.u32 %v3506_v15, %v3157_v17 }
 0x3b8   :  { %v3163_v18 = vld [vmem:[#allocation2 + $0x8] sm:$0xf] }
 0x3b9   :  { %v1649_v27 = vmul.f32 0.5, %v1645_v25  ;;  %v1653_v28 = vmul.f32 0.5, %v1646_v26  ;;  %v3244_v25 = vor.u32 %v3529_v23, %v3243_v22  ;;  %v3245_v26 = vld [vmem:[#allocation2 + $0xb8] sm:$0xf0]  ;;  %2156 = vmatpush.bf16.msrb.mxu1 %v3240_v21  ;;  %v3507_v22 = vld [vmem:[#allocation2 + $0xc] sm:$0xf] }
 0x3ba   :  { %v3165_v23 = vld [vmem:[#allocation2 + $0x18] sm:$0xf0] }
 0x3bb   :  { %3592 = vtanh.f32 %v1649_v27  ;;  %v3248_v27 = vor.u32 %v3527_v24, %v3245_v26  ;;  %2169 = vmatpush.bf16.msrb.mxu2 %v3244_v25  ;;  %v3168_v24 = vor.u32 %v3507_v22, %v3165_v23  ;;  %v3016_v25 = vld [vmem:[%s3814_s0 + $0xc0] sm:$0xff]  ;;  %v3017_v26 = vld [vmem:[%s3814_s0 + $0xc8] sm:$0xff] }
 0x3bc   :  { %3594 = vtanh.f32 %v1653_v28  ;;  %v3219_v28 = vld [vmem:[#allocation2 + $0x80] sm:$0xf] }
 0x3bd   :  { %v1628_v32 = vpop.f32.mrf.mxu2  ;;  %v1641_v33 = vpop.f32.mrf.mxu3  ;;  %2182 = vmatpush.bf16.msrb.mxu3 %v3248_v27 }
 0x3be   :  { %v1647_v34 = vadd.f32 %v2885_v29, %v1628_v32  ;;  %v1648_v36 = vadd.f32 %v2886_v31, %v1641_v33  ;;  %v1604_v37 = vpop.f32.mrf.mxu0  ;;  %v1617_v38 = vpop.f32.mrf.mxu1  ;;  %v3524_v29 = vld [vmem:[#allocation2 + $0x8c] sm:$0xf0]  ;;  %v3522_v31 = vld [vmem:[#allocation2 + $0x84] sm:$0xf]  ;;  %v3221_v33 = vld [vmem:[#allocation2 + $0x90] sm:$0xf0] }
 0x3bf   :  { %v3220_v32 = vor.u32 %v3524_v29, %v3219_v28  ;;  %v3224_v37 = vor.u32 %v3522_v31, %v3221_v33 }
 0x3c0   :  { %3596 = vtanh.f32 %v1647_v34  ;;  %v1658_v39 = vmul.f32 0.5, %v1648_v36  ;;  %v3227_v34 = vld [vmem:[#allocation2 + $0x88] sm:$0xf]  ;;  %v3525_v36 = vld [vmem:[#allocation2 + $0x94] sm:$0xf0] }
 0x3c1   :  { %v3593_v30 = vpop.eup %3592  ;;  %v3228_v38 = vor.u32 %v3525_v36, %v3227_v34  ;;  %2157 = vmatpush.bf16.msrb.mxu1 %v3224_v37  ;;  %v3018_v34 = vld [vmem:[%s3814_s0 + $0xd0] sm:$0xff]  ;;  %v3019_v36 = vld [vmem:[%s3814_s0 + $0xd8] sm:$0xff] }
 0x3c2   :  { %v3595_v41 = vpop.eup %3594  ;;  %v1651_v42 = vmul.f32 0.5, %v3593_v30  ;;  %3598 = vtanh.f32 %v1658_v39  ;;  %v3523_v39 = vld [vmem:[#allocation2 + $0x8c] sm:$0xf]  ;;  %v3229_v30 = vld [vmem:[#allocation2 + $0x98] sm:$0xf0] }
 0x3c3   :  { %v1655_v43 = vmul.f32 0.5, %v3595_v41  ;;  %v3232_v41 = vor.u32 %v3523_v39, %v3229_v30  ;;  %2170 = vmatpush.bf16.msrb.mxu2 %v3228_v38 }
 0x3c4   :  { %v1652_v35 = vadd.f32 0.5, %v1651_v42  ;;  %v3203_v42 = vld [vmem:[#allocation2 + $0x60] sm:$0xf] }
 0x3c5   :  { %v1656_v45 = vadd.f32 0.5, %v1655_v43  ;;  %v1630_v46 = vpop.f32.mrf.mxu2  ;;  %v1643_v47 = vpop.f32.mrf.mxu3  ;;  %v3520_v43 = vld [vmem:[#allocation2 + $0x6c] sm:$0xf0]  ;;  %2183 = vmatpush.bf16.msrb.mxu3 %v3232_v41 }
 0x3c6   :  { %v3597_v40 = vpop.eup %3596  ;;  %v3205_v46 = vld [vmem:[#allocation2 + $0x70] sm:$0xf0]  ;;  %v3211_v47 = vld [vmem:[#allocation2 + $0x68] sm:$0xf] }
 0x3c7   :  { %v1662_v49 = vmul.f32 %v1656_v45, %v3758_v48  ;;  %v1663_v50 = vmul.f32 %v3597_v40, %v1652_v35  ;;  %v3267_v48 = vld [vmem:[#allocation2 + $0xe0] sm:$0xf]  ;;  %v3518_v35 = vld [vmem:[#allocation2 + $0x64] sm:$0xf]  ;;  %v3204_v45 = vor.u32 %v3520_v43, %v3203_v42  ;;  %v3521_v40 = vld [vmem:[#allocation2 + $0x74] sm:$0xf0] }
 0x3c8   :  { %v3599_v51 = vpop.eup %3598  ;;  %v3268_v59 = vor.u32 %v3536_v57, %v3267_v48  ;;  %v3189_v57 = vld [vmem:[#allocation2 + $0x50] sm:$0xf0] }
 0x3c9   :  { %v3777_v52 = vadd.f32 %v1663_v50, %v1662_v49  ;;  %v1660_v44 = vmul.f32 0.5, %v3599_v51  ;;  %v3208_v49 = vor.u32 %v3518_v35, %v3205_v46  ;;  %v3212_v50 = vor.u32 %v3521_v40, %v3211_v47  ;;  %v3519_v51 = vld [vmem:[#allocation2 + $0x6c] sm:$0xf] }
 0x3ca   :  { %2141 = vmatpush.bf16.msrb.mxu0 %v3268_v59  ;;  %v3517_v59 = vld [vmem:[#allocation2 + $0x54] sm:$0xf0] }
 0x3cb   :  { %3600 = vtanh.f32 %v3777_v52  ;;  %v1661_v53 = vadd.f32 0.5, %v1660_v44  ;;  %v3213_v44 = vld [vmem:[#allocation2 + $0x78] sm:$0xf0]  ;;  %2158 = vmatpush.bf16.msrb.mxu1 %v3208_v49  ;;  %2171 = vmatpush.bf16.msrb.mxu2 %v3212_v50  ;;  %v3196_v61 = vor.u32 %v3517_v59, %v3195_v58 }
 0x3ce   :  { %2142 = vmatpush.bf16.msrb.mxu0 %v3252_v7  ;;  %v3513_v7 = vld [vmem:[#allocation2 + $0x34] sm:$0xf0] }
 0x3cf   :  { %2172 = vmatpush.bf16.msrb.mxu2 %v3196_v61  ;;  %v3180_v9 = vor.u32 %v3513_v7, %v3179_v6  ;;  %v3150_v61 = vld [vmem:[%s3814_s0 + $0xe8] sm:$0xff] }
 0x3d1   :  { %v3601_v54 = vpop.eup %3600 }
 0x3d2   :  { %v1666_v55 = vmul.f32 %v3601_v54, %v1661_v53  ;;  %2143 = vmatpush.bf16.msrb.mxu0 %v3236_v19  ;;  %v3216_v53 = vor.u32 %v3519_v51, %v3213_v44  ;;  %v3187_v54 = vld [vmem:[#allocation2 + $0x40] sm:$0xf]  ;;  %v3509_v19 = vld [vmem:[#allocation2 + $0x14] sm:$0xf0] }
 0x3d3   :  { %2173 = vmatpush.bf16.msrb.mxu2 %v3180_v9  ;;  %v3164_v21 = vor.u32 %v3509_v19, %v3163_v18 }
 0x3d4   :  { %v1667_v56 = vpack.c.bf16 %v1666_v55, %v1666_v55  ;;  %v3516_v55 = vld [vmem:[#allocation2 + $0x4c] sm:$0xf0]  ;;  %2184 = vmatpush.bf16.msrb.mxu3 %v3216_v53 }
 0x3d5   :  { %v3188_v48 = vor.u32 %v3516_v55, %v3187_v54 }
 0x3d6   :  { %3015 = vst [vmem:[%s3816_s2 + $0x14] sm:$0xf] %v1667_v56  ;;  %1875 = vmatmul.bf16.vlgmr.msra.gmra.mxu0 %v1667_v56  ;;  %1888 = vmatmul.bf16.vlgmr.msra.gmra.mxu1 %v1667_v56 }
 0x3d7   :  { %1901 = vmatmul.bf16.vlgmr.msra.gmra.mxu2 %v1667_v56  ;;  %1914 = vmatmul.bf16.vlgmr.msra.gmra.mxu3 %v1667_v56  ;;  %v3514_v56 = vld [vmem:[#allocation2 + $0x44] sm:$0xf] }
 0x3d8   :  { %2144 = vmatpush.bf16.msrb.mxu0 %v3220_v32  ;;  %v3192_v60 = vor.u32 %v3514_v56, %v3189_v57  ;;  %2185 = vmatpush.bf16.msrb.mxu3 %v3200_v0 }
 0x3d9   :  { %2174 = vmatpush.bf16.msrb.mxu2 %v3164_v21 }
 0x3da   :  { %2159 = vmatpush.bf16.msrb.mxu1 %v3192_v60 }
 0x3dc   :  { %2145 = vmatpush.bf16.msrb.mxu0 %v3204_v45  ;;  %2186 = vmatpush.bf16.msrb.mxu3 %v3184_v12 }
 0x3de   :  { %2160 = vmatpush.bf16.msrb.mxu1 %v3176_v8 }
 0x3e0   :  { %2146 = vmatpush.bf16.msrb.mxu0 %v3188_v48  ;;  %2187 = vmatpush.bf16.msrb.mxu3 %v3168_v24 }
 0x3e2   :  { %2161 = vmatpush.bf16.msrb.mxu1 %v3160_v20 }
 0x3e4   :  { %2147 = vmatpush.bf16.msrb.mxu0 %v3172_v4  ;;  %v3151_v4 = vld [vmem:[%s3814_s0 + $0xf0] sm:$0xff] }
 0x3e8   :  { %2148 = vmatpush.bf16.msrb.mxu0 %v3156_v16 }
 0x453   :  { %v1876_v27 = vpop.f32.mrf.mxu0  ;;  %v1889_v28 = vpop.f32.mrf.mxu1 }
 0x454   :  { %v1919_v29 = vadd.f32 %v3016_v25, %v1876_v27  ;;  %v1920_v31 = vadd.f32 %v3017_v26, %v1889_v28 }
 0x456   :  { %v1923_v32 = vmul.f32 0.5, %v1919_v29  ;;  %v1927_v33 = vmul.f32 0.5, %v1920_v31 }
 0x458   :  { %3602 = vtanh.f32 %v1923_v32 }
 0x459   :  { %3604 = vtanh.f32 %v1927_v33 }
 0x45a   :  { %v1902_v37 = vpop.f32.mrf.mxu2  ;;  %v1915_v38 = vpop.f32.mrf.mxu3 }
 0x45b   :  { %v1921_v39 = vadd.f32 %v3018_v34, %v1902_v37  ;;  %v1922_v30 = vadd.f32 %v3019_v36, %v1915_v38  ;;  %v1878_v41 = vpop.f32.mrf.mxu0  ;;  %v1891_v42 = vpop.f32.mrf.mxu1 }
 0x45d   :  { %3606 = vtanh.f32 %v1921_v39  ;;  %v1932_v43 = vmul.f32 0.5, %v1922_v30 }
 0x45e   :  { %v3603_v35 = vpop.eup %3602 }
 0x45f   :  { %v3605_v45 = vpop.eup %3604  ;;  %v1925_v46 = vmul.f32 0.5, %v3603_v35  ;;  %3608 = vtanh.f32 %v1932_v43 }
 0x460   :  { %v1929_v47 = vmul.f32 0.5, %v3605_v45 }
 0x461   :  { %v1926_v40 = vadd.f32 0.5, %v1925_v46 }
 0x462   :  { %v1930_v49 = vadd.f32 0.5, %v1929_v47  ;;  %v1904_v50 = vpop.f32.mrf.mxu2  ;;  %v1917_v51 = vpop.f32.mrf.mxu3 }
 0x463   :  { %v3607_v44 = vpop.eup %3606 }
 0x464   :  { %v1936_v53 = vmul.f32 %v1930_v49, %v3777_v52  ;;  %v1937_v54 = vmul.f32 %v3607_v44, %v1926_v40  ;;  %v3149_v52 = vld [vmem:[%s3814_s0 + $0xe0] sm:$0xff] }
 0x465   :  { %v3609_v55 = vpop.eup %3608 }
 0x466   :  { %v1938_v56 = vadd.f32 %v1937_v54, %v1936_v53  ;;  %v1934_v48 = vmul.f32 0.5, %v3609_v55 }
 0x468   :  { %3610 = vtanh.f32 %v1938_v56  ;;  %v1935_v57 = vadd.f32 0.5, %v1934_v48 }
 0x46e   :  { %v3611_v58 = vpop.eup %3610 }
 0x46f   :  { %v1940_v59 = vmul.f32 %v3611_v58, %v1935_v57 }
 0x471   :  { %v1941_v60 = vpack.c.bf16 %v1940_v59, %v1940_v59 }
 0x473   :  { %3148 = vst [vmem:[%s3816_s2 + $0x18] sm:$0xf] %v1941_v60  ;;  %2149 = vmatmul.bf16.vlgmr.msrb.gmra.mxu0 %v1941_v60  ;;  %2162 = vmatmul.bf16.vlgmr.msrb.gmra.mxu1 %v1941_v60 }
 0x474   :  { %2175 = vmatmul.bf16.vlgmr.msrb.gmra.mxu2 %v1941_v60  ;;  %2188 = vmatmul.bf16.vlgmr.msrb.gmra.mxu3 %v1941_v60 }
 0x4f0   :  { %v2150_v62 = vpop.f32.mrf.mxu0  ;;  %v2163_v63 = vpop.f32.mrf.mxu1 }
 0x4f1   :  { %v2193_v0 = vadd.f32 %v3149_v52, %v2150_v62  ;;  %v2194_v1 = vadd.f32 %v3150_v61, %v2163_v63 }
 0x4f3   :  { %v2197_v2 = vmul.f32 0.5, %v2193_v0  ;;  %v2201_v3 = vmul.f32 0.5, %v2194_v1 }
 0x4f5   :  { %3612 = vtanh.f32 %v2197_v2 }
 0x4f6   :  { %3614 = vtanh.f32 %v2201_v3 }
 0x4f7   :  { %v2176_v6 = vpop.f32.mrf.mxu2  ;;  %v2189_v7 = vpop.f32.mrf.mxu3 }
 0x4f8   :  { %v2195_v8 = vadd.f32 %v3151_v4, %v2176_v6  ;;  %v2196_v9 = vadd.f32 %v3152_v5, %v2189_v7  ;;  %v2152_v10 = vpop.f32.mrf.mxu0  ;;  %v2165_v11 = vpop.f32.mrf.mxu1 }
 0x4fa   :  { %3616 = vtanh.f32 %v2195_v8  ;;  %v2206_v12 = vmul.f32 0.5, %v2196_v9 }
 0x4fb   :  { %v3613_v13 = vpop.eup %3612 }
 0x4fc   :  { %v3615_v14 = vpop.eup %3614  ;;  %v2199_v15 = vmul.f32 0.5, %v3613_v13  ;;  %3618 = vtanh.f32 %v2206_v12 }
 0x4fd   :  { %v2203_v16 = vmul.f32 0.5, %v3615_v14 }
 0x4fe   :  { %v2200_v17 = vadd.f32 0.5, %v2199_v15 }
 0x4ff   :  { %v2204_v18 = vadd.f32 0.5, %v2203_v16  ;;  %v2178_v19 = vpop.f32.mrf.mxu2  ;;  %v2191_v20 = vpop.f32.mrf.mxu3 }
 0x500   :  { %v3617_v21 = vpop.eup %3616 }
 0x501   :  { %v2210_v22 = vmul.f32 %v2204_v18, %v1938_v56  ;;  %v2211_v23 = vmul.f32 %v3617_v21, %v2200_v17 }
 0x502   :  { %v3619_v24 = vpop.eup %3618 }
 0x503   :  { %v2212_v25 = vadd.f32 %v2211_v23, %v2210_v22  ;;  %v2208_v26 = vmul.f32 0.5, %v3619_v24 }
 0x505   :  { %3620 = vtanh.f32 %v2212_v25  ;;  %v2209_v27 = vadd.f32 0.5, %v2208_v26 }
 0x50b   :  { %v3621_v28 = vpop.eup %3620 }
 0x50c   :  { %v2214_v29 = vmul.f32 %v3621_v28, %v2209_v27 }
 0x50e   :  { %v2215_v31 = vpack.c.bf16 %v2214_v29, %v2214_v29 }
 0x510   :  { %3281 = vst [vmem:[%s3816_s2 + $0x1c] sm:$0xf] %v2215_v31 }
 0x511   :  { %2222 = vsyncpa [#allocation3], 1 }

</bundles_post_ra>
